<compile_context>
chip_gen: v7x
topology: tpu7x:2x2x1
jax: 0.10.0
libtpu: 0.0.40
codegen_flags: <defaults>
</compile_context>

<pallas_src>
import functools

import jax
import jax.numpy as jnp
from jax.experimental import pallas as pl
from jax.experimental.pallas import tpu as pltpu


_NEG_CAP = -1e30  # guard for the max-shift: all-(-inf) alphas stay -inf, no NaN


def _mmi_fwd_kernel(den_scale,
                    num_a_ref, den_a_ref,
                    num_start_ref, num_final_ref,
                    den_start_ref, den_final_ref,
                    em_ref, out_ref,
                    a_num_ref, a_den_ref):
    """One (graph-block, time-chunk) grid step of the log-semiring forward pass.

    num_a_ref   : (B, S, S) exp-space numerator transition matrices
    den_a_ref   : (1, S, S) exp-space denominator transition matrix (shared;
                  constant block index -> DMA'd once, resident in VMEM)
    num_start_ref, num_final_ref : (B, S) log start / final weights (numerator)
    den_start_ref, den_final_ref : (1, S) log start / final weights (denominator)
    em_ref      : (tT, B, S) emission log-probs, frame-major: each frame is one
                  aligned (B, S) tile
    out_ref     : (B, S) tot_scores = num - den_scale * den, broadcast on lanes
    a_num_ref, a_den_ref : (B, S) VMEM scratch carrying alpha across time chunks
    """
    tT, B, S = em_ref.shape
    tc = pl.program_id(1)
    n_tc = pl.num_programs(1)

    @pl.when(tc == 0)
    def _init():
        em0 = em_ref[0]                                    # (B, S)
        a_num_ref[...] = num_start_ref[...] + em0
        a_den_ref[...] = den_start_ref[...] + em0          # (1,S)+(B,S)->(B,S)

    a_num = a_num_ref[...]
    a_den = a_den_ref[...]

    def recur(a_num, a_den, em_t):
        # numerator: B independent (1,S)x(S,S) matvecs, issued back-to-back
        m_n = jnp.maximum(jnp.max(a_num, axis=-1, keepdims=True), _NEG_CAP)
        w_n = jnp.exp(a_num - m_n)                         # (B, S)
        rows = [
            jnp.dot(w_n[b:b + 1, :], num_a_ref[b],
                    preferred_element_type=jnp.float32)    # (1, S)
            for b in range(B)
        ]
        s_n = jnp.concatenate(rows, axis=0)                # (B, S)
        a_num = jnp.log(s_n) + m_n + em_t

        # denominator: one (B,S)x(S,S) matmul against the shared resident graph
        m_d = jnp.maximum(jnp.max(a_den, axis=-1, keepdims=True), _NEG_CAP)
        w_d = jnp.exp(a_den - m_d)
        s_d = jnp.dot(w_d, den_a_ref[0],
                      preferred_element_type=jnp.float32)  # (B, S)
        a_den = jnp.log(s_d) + m_d + em_t
        return a_num, a_den

    # Frame 0 of this chunk: on the very first chunk it is the init frame, so
    # the recursion result is discarded there.
    a_num_r, a_den_r = recur(a_num, a_den, em_ref[0])
    is_first = tc == 0
    a_num = jnp.where(is_first, a_num, a_num_r)
    a_den = jnp.where(is_first, a_den, a_den_r)

    # Remaining frames of the chunk: fully unrolled, static indices.
    for i in range(1, tT):
        a_num, a_den = recur(a_num, a_den, em_ref[i])

    a_num_ref[...] = a_num
    a_den_ref[...] = a_den

    @pl.when(tc == n_tc - 1)
    def _finalize():
        v_n = a_num + num_final_ref[...]
        m_n = jnp.maximum(jnp.max(v_n, axis=-1, keepdims=True), _NEG_CAP)
        num_tot = jnp.log(jnp.sum(jnp.exp(v_n - m_n), axis=-1,
                                  keepdims=True)) + m_n            # (B, 1)
        v_d = a_den + den_final_ref[...]
        m_d = jnp.maximum(jnp.max(v_d, axis=-1, keepdims=True), _NEG_CAP)
        den_tot = jnp.log(jnp.sum(jnp.exp(v_d - m_d), axis=-1,
                                  keepdims=True)) + m_d            # (B, 1)
        tot = num_tot - den_scale * den_tot                        # (B, 1)
        out_ref[...] = jnp.broadcast_to(tot, (B, S)).astype(out_ref.dtype)


def mmi_tot_scores(nnet_output, num_graphs, num_sf, den_graph, den_sf,
                   den_scale=1.0):
    """tot_scores[n] = num_score[n] - den_scale * den_score[n], where *_score
    is the log-semiring total path score of the dense graph intersected with
    utterance n's emissions (what intersect_dense + get_tot_scores compute)."""
    N, T, C = nnet_output.shape
    S = num_graphs.shape[-1]
    assert C == S and num_graphs.shape == (N, S, S)
    assert den_graph.shape == (S, S)
    assert num_sf.shape == (N, 2, S) and den_sf.shape == (2, S)

    f32 = jnp.float32
    # exp(A) hoisted out of the kernel: computed once here, not per grid step,
    # and the shared den graph is NOT replicated N times.
    num_p = jnp.exp(num_graphs.astype(f32))                 # (N, S, S)
    den_p = jnp.exp(den_graph.astype(f32))[None]            # (1, S, S)
    num_start = num_sf[:, 0, :].astype(f32)                 # (N, S)
    num_final = num_sf[:, 1, :].astype(f32)                 # (N, S)
    den_start = den_sf[0:1, :].astype(f32)                  # (1, S)
    den_final = den_sf[1:2, :].astype(f32)                  # (1, S)
    # Frame-major emissions: each time step is one aligned (B, S) tile load.
    em = jnp.transpose(nnet_output.astype(f32), (1, 0, 2))  # (T, N, S)

    # Graph-block / time-chunk sizes.  Fall back to the full extent when not a
    # multiple of 8 so the (8, 128) block constraint stays satisfied.
    B = 8 if N % 8 == 0 else N
    tT = 16 if T % 16 == 0 else (8 if T % 8 == 0 else T)
    grid = (N // B, T // tT)

    out = pl.pallas_call(
        functools.partial(_mmi_fwd_kernel, float(den_scale)),
        out_shape=jax.ShapeDtypeStruct((N, S), f32),
        grid=grid,
        in_specs=[
            pl.BlockSpec((B, S, S), lambda g, t: (g, 0, 0)),   # num graphs
            pl.BlockSpec((1, S, S), lambda g, t: (0, 0, 0)),   # den graph (resident)
            pl.BlockSpec((B, S), lambda g, t: (g, 0)),         # num start
            pl.BlockSpec((B, S), lambda g, t: (g, 0)),         # num final
            pl.BlockSpec((1, S), lambda g, t: (0, 0)),         # den start
            pl.BlockSpec((1, S), lambda g, t: (0, 0)),         # den final
            pl.BlockSpec((tT, B, S), lambda g, t: (t, g, 0)),  # emissions
        ],
        out_specs=pl.BlockSpec((B, S), lambda g, t: (g, 0)),
        scratch_shapes=[
            pltpu.VMEM((B, S), f32),   # alpha carry (numerator)
            pltpu.VMEM((B, S), f32),   # alpha carry (denominator)
        ],
        compiler_params=pltpu.CompilerParams(
            dimension_semantics=("parallel", "arbitrary")),
    )(num_p, den_p, num_start, num_final, den_start, den_final, em)
    return out[:, 0]


def lfmmi_loss(nnet_output, supervision_segments,
               num_graphs, num_sf, den_graph, den_sf, den_scale=1.0):
    """Mirrors LFMMILoss.forward semantics:
       tot_scores = num_tot_scores - den_scale * den_tot_scores,
       then (tot_score, tot_frames, all_frames) a la get_tot_objf_and_num_frames.
    """
    # TODO(synk): k2 graph compilation / ragged FSA ops (graph_compiler.compile,
    # k2.cat, convert_attr_to_ragged_, k2.index, pruned intersect_dense with
    # output_beam) have no Pallas equivalent; dense (S, S) graphs are used.
    # TODO(synk): per-utterance supervision_segments (start_frame / num_frames)
    # are not applied in-kernel; every utterance is scored over the full T.
    # use_double_scores=True is kept in float32 (no f64 on the TPU vector path).
    tot_scores = mmi_tot_scores(nnet_output, num_graphs, num_sf,
                                den_graph, den_sf, den_scale)

    frames = supervision_segments[:, 2].astype(jnp.float32)
    finite = jnp.isfinite(tot_scores)
    tot_score = jnp.sum(jnp.where(finite, tot_scores, 0.0))
    tot_frames = jnp.sum(jnp.where(finite, frames, 0.0))
    all_frames = jnp.sum(frames)
    return tot_score, tot_frames, all_frames


if __name__ == "__main__":
    N, T, C = 16, 24, 128   # batch, frames, symbols (== graph states)
    S = C
    den_scale = 1.0

    key = jax.random.PRNGKey(0)
    k1, k2_, k3, k4, k5 = jax.random.split(key, 5)

    # nnet_output: log-posteriors over C symbols per frame.
    logits = jax.random.normal(k1, (N, T, C), dtype=jnp.float32)
    nnet_output = jax.nn.log_softmax(logits, axis=-1)

    # Deterministic synthetic dense graphs (log-weights).
    num_graphs = jax.random.uniform(k2_, (N, S, S), minval=-4.0, maxval=0.0)
    den_graph = jax.random.uniform(k3, (S, S), minval=-4.0, maxval=0.0)
    num_sf = jax.random.uniform(k4, (N, 2, S), minval=-2.0, maxval=0.0)
    den_sf = jax.random.uniform(k5, (2, S), minval=-2.0, maxval=0.0)

    # supervision_segments: [utt_index, start_frame, num_frames]
    supervision_segments = jnp.stack(
        [jnp.arange(N, dtype=jnp.int32),
         jnp.zeros((N,), dtype=jnp.int32),
         jnp.full((N,), T, dtype=jnp.int32)], axis=1)

    fn = jax.jit(functools.partial(lfmmi_loss, den_scale=den_scale))
    tot_score, tot_frames, all_frames = fn(
        nnet_output, supervision_segments, num_graphs, num_sf, den_graph, den_sf)
    jax.block_until_ready((tot_score, tot_frames, all_frames))
    print("KERNEL_OK")
</pallas_src>

<mosaic_0001>
module attributes {stable_mosaic.version = 11 : i64} {
  func.func @_mmi_fwd_kernel(%arg0: i32, %arg1: i32, %arg2: memref<8x128x128xf32, #tpu.memory_space<vmem>>, %arg3: memref<1x128x128xf32, #tpu.memory_space<vmem>>, %arg4: memref<8x128xf32, #tpu.memory_space<vmem>>, %arg5: memref<8x128xf32, #tpu.memory_space<vmem>>, %arg6: memref<1x128xf32, #tpu.memory_space<vmem>>, %arg7: memref<1x128xf32, #tpu.memory_space<vmem>>, %arg8: memref<8x8x128xf32, #tpu.memory_space<vmem>>, %arg9: memref<8x128xf32, #tpu.memory_space<vmem>>, %arg10: memref<8x128xf32, #tpu.memory_space<vmem>>, %arg11: memref<8x128xf32, #tpu.memory_space<vmem>>) attributes {dimension_semantics = [#tpu.dimension_semantics<parallel>, #tpu.dimension_semantics<arbitrary>], iteration_bounds = array<i64: 2, 3>, scalar_prefetch = 0 : i64, scratch_operands = 2 : i64, tpu.core_type = #tpu.core_type<tc>, window_params = [{transform_indices = @transform_0, window_bounds = array<i64: 8, 128, 128>}, {pipeline_mode = #tpu.pipeline_mode<synchronous>, transform_indices = @transform_1, window_bounds = array<i64: 1, 128, 128>}, {transform_indices = @transform_2, window_bounds = array<i64: 8, 128>}, {transform_indices = @transform_3, window_bounds = array<i64: 8, 128>}, {pipeline_mode = #tpu.pipeline_mode<synchronous>, transform_indices = @transform_4, window_bounds = array<i64: 1, 128>}, {pipeline_mode = #tpu.pipeline_mode<synchronous>, transform_indices = @transform_5, window_bounds = array<i64: 1, 128>}, {transform_indices = @transform_6, window_bounds = array<i64: 8, 8, 128>}, {transform_indices = @transform_7, window_bounds = array<i64: 8, 128>}]} {
    %c0_i32 = arith.constant 0 : i32
    %0 = arith.cmpi eq, %arg1, %c0_i32 : i32
    %1 = arith.extui %0 : i1 to i32
    %c0_i32_0 = arith.constant 0 : i32
    %2 = arith.cmpi ne, %1, %c0_i32_0 : i32
    scf.if %2 {
      %c0_346 = arith.constant 0 : index
      %c0_347 = arith.constant 0 : index
      %c0_348 = arith.constant 0 : index
      %493 = vector.load %arg8[%c0_346, %c0_347, %c0_348] : memref<8x8x128xf32, #tpu.memory_space<vmem>>, vector<1x8x128xf32>
      %494 = vector.shape_cast %493 : vector<1x8x128xf32> to vector<8x128xf32>
      %c0_349 = arith.constant 0 : index
      %c0_350 = arith.constant 0 : index
      %495 = vector.load %arg4[%c0_349, %c0_350] : memref<8x128xf32, #tpu.memory_space<vmem>>, vector<8x128xf32>
      %496 = arith.addf %495, %494 : vector<8x128xf32>
      %c0_351 = arith.constant 0 : index
      %c0_352 = arith.constant 0 : index
      %497 = vector.load %arg10[%c0_351, %c0_352] : memref<8x128xf32, #tpu.memory_space<vmem>>, vector<8x128xf32>
      tpu.vector_store %arg10[%c0_351, %c0_352], %496 {strides = array<i32>} : memref<8x128xf32, #tpu.memory_space<vmem>>, vector<8x128xf32>,
      %c0_353 = arith.constant 0 : index
      %c0_354 = arith.constant 0 : index
      %498 = vector.load %arg6[%c0_353, %c0_354] : memref<1x128xf32, #tpu.memory_space<vmem>>, vector<1x128xf32>
      %499 = vector.broadcast %498 : vector<1x128xf32> to vector<8x128xf32>
      %500 = arith.addf %499, %494 : vector<8x128xf32>
      %c0_355 = arith.constant 0 : index
      %c0_356 = arith.constant 0 : index
      %501 = vector.load %arg11[%c0_355, %c0_356] : memref<8x128xf32, #tpu.memory_space<vmem>>, vector<8x128xf32>
      tpu.vector_store %arg11[%c0_355, %c0_356], %500 {strides = array<i32>} : memref<8x128xf32, #tpu.memory_space<vmem>>, vector<8x128xf32>,
    } else {
    }
    %c0 = arith.constant 0 : index
    %c0_1 = arith.constant 0 : index
    %3 = vector.load %arg10[%c0, %c0_1] : memref<8x128xf32, #tpu.memory_space<vmem>>, vector<8x128xf32>
    %c0_2 = arith.constant 0 : index
    %c0_3 = arith.constant 0 : index
    %4 = vector.load %arg11[%c0_2, %c0_3] : memref<8x128xf32, #tpu.memory_space<vmem>>, vector<8x128xf32>
    %c0_4 = arith.constant 0 : index
    %c0_5 = arith.constant 0 : index
    %c0_6 = arith.constant 0 : index
    %5 = vector.load %arg8[%c0_4, %c0_5, %c0_6] : memref<8x8x128xf32, #tpu.memory_space<vmem>>, vector<1x8x128xf32>
    %6 = vector.shape_cast %5 : vector<1x8x128xf32> to vector<8x128xf32>
    %cst = arith.constant dense<0xFF800000> : vector<8xf32>
    %7 = vector.multi_reduction <maximumf>, %3, %cst [1] : vector<8x128xf32> to vector<8xf32>
    %8 = vector.shape_cast %7 : vector<8xf32> to vector<8x1xf32>
    %cst_7 = arith.constant -1.000000e+30 : f32
    %9 = vector.broadcast %cst_7 : f32 to vector<8x1xf32>
    %10 = arith.maximumf %8, %9 : vector<8x1xf32>
    %11 = vector.broadcast %10 : vector<8x1xf32> to vector<8x128xf32>
    %12 = arith.subf %3, %11 : vector<8x128xf32>
    %13 = math.exp %12 : vector<8x128xf32>
    %14 = vector.extract_strided_slice %13 {offsets = [0, 0], sizes = [1, 128], strides = [1, 1]} : vector<8x128xf32> to vector<1x128xf32>
    %c0_8 = arith.constant 0 : index
    %c0_9 = arith.constant 0 : index
    %c0_10 = arith.constant 0 : index
    %15 = vector.load %arg2[%c0_8, %c0_9, %c0_10] : memref<8x128x128xf32, #tpu.memory_space<vmem>>, vector<1x128x128xf32>
    %16 = vector.shape_cast %15 : vector<1x128x128xf32> to vector<128x128xf32>
    %cst_11 = arith.constant dense<0.000000e+00> : vector<1x128xf32>
    %17 = tpu.matmul %14, %16, %cst_11 {dimension_numbers = #tpu.dot_dimension_numbers<[1], [0], [0], [1], [0, 0, 1, 1], [], []>} : vector<1x128xf32>, vector<128x128xf32>, vector<1x128xf32> -> vector<1x128xf32>
    %18 = vector.extract_strided_slice %13 {offsets = [1, 0], sizes = [1, 128], strides = [1, 1]} : vector<8x128xf32> to vector<1x128xf32>
    %c1 = arith.constant 1 : index
    %c0_12 = arith.constant 0 : index
    %c0_13 = arith.constant 0 : index
    %19 = vector.load %arg2[%c1, %c0_12, %c0_13] : memref<8x128x128xf32, #tpu.memory_space<vmem>>, vector<1x128x128xf32>
    %20 = vector.shape_cast %19 : vector<1x128x128xf32> to vector<128x128xf32>
    %cst_14 = arith.constant dense<0.000000e+00> : vector<1x128xf32>
    %21 = tpu.matmul %18, %20, %cst_14 {dimension_numbers = #tpu.dot_dimension_numbers<[1], [0], [0], [1], [0, 0, 1, 1], [], []>} : vector<1x128xf32>, vector<128x128xf32>, vector<1x128xf32> -> vector<1x128xf32>
    %22 = vector.extract_strided_slice %13 {offsets = [2, 0], sizes = [1, 128], strides = [1, 1]} : vector<8x128xf32> to vector<1x128xf32>
    %c2 = arith.constant 2 : index
    %c0_15 = arith.constant 0 : index
    %c0_16 = arith.constant 0 : index
    %23 = vector.load %arg2[%c2, %c0_15, %c0_16] : memref<8x128x128xf32, #tpu.memory_space<vmem>>, vector<1x128x128xf32>
    %24 = vector.shape_cast %23 : vector<1x128x128xf32> to vector<128x128xf32>
    %cst_17 = arith.constant dense<0.000000e+00> : vector<1x128xf32>
    %25 = tpu.matmul %22, %24, %cst_17 {dimension_numbers = #tpu.dot_dimension_numbers<[1], [0], [0], [1], [0, 0, 1, 1], [], []>} : vector<1x128xf32>, vector<128x128xf32>, vector<1x128xf32> -> vector<1x128xf32>
    %26 = vector.extract_strided_slice %13 {offsets = [3, 0], sizes = [1, 128], strides = [1, 1]} : vector<8x128xf32> to vector<1x128xf32>
    %c3 = arith.constant 3 : index
    %c0_18 = arith.constant 0 : index
    %c0_19 = arith.constant 0 : index
    %27 = vector.load %arg2[%c3, %c0_18, %c0_19] : memref<8x128x128xf32, #tpu.memory_space<vmem>>, vector<1x128x128xf32>
    %28 = vector.shape_cast %27 : vector<1x128x128xf32> to vector<128x128xf32>
    %cst_20 = arith.constant dense<0.000000e+00> : vector<1x128xf32>
    %29 = tpu.matmul %26, %28, %cst_20 {dimension_numbers = #tpu.dot_dimension_numbers<[1], [0], [0], [1], [0, 0, 1, 1], [], []>} : vector<1x128xf32>, vector<128x128xf32>, vector<1x128xf32> -> vector<1x128xf32>
    %30 = vector.extract_strided_slice %13 {offsets = [4, 0], sizes = [1, 128], strides = [1, 1]} : vector<8x128xf32> to vector<1x128xf32>
    %c4 = arith.constant 4 : index
    %c0_21 = arith.constant 0 : index
    %c0_22 = arith.constant 0 : index
    %31 = vector.load %arg2[%c4, %c0_21, %c0_22] : memref<8x128x128xf32, #tpu.memory_space<vmem>>, vector<1x128x128xf32>
    %32 = vector.shape_cast %31 : vector<1x128x128xf32> to vector<128x128xf32>
    %cst_23 = arith.constant dense<0.000000e+00> : vector<1x128xf32>
    %33 = tpu.matmul %30, %32, %cst_23 {dimension_numbers = #tpu.dot_dimension_numbers<[1], [0], [0], [1], [0, 0, 1, 1], [], []>} : vector<1x128xf32>, vector<128x128xf32>, vector<1x128xf32> -> vector<1x128xf32>
    %34 = vector.extract_strided_slice %13 {offsets = [5, 0], sizes = [1, 128], strides = [1, 1]} : vector<8x128xf32> to vector<1x128xf32>
    %c5 = arith.constant 5 : index
    %c0_24 = arith.constant 0 : index
    %c0_25 = arith.constant 0 : index
    %35 = vector.load %arg2[%c5, %c0_24, %c0_25] : memref<8x128x128xf32, #tpu.memory_space<vmem>>, vector<1x128x128xf32>
    %36 = vector.shape_cast %35 : vector<1x128x128xf32> to vector<128x128xf32>
    %cst_26 = arith.constant dense<0.000000e+00> : vector<1x128xf32>
    %37 = tpu.matmul %34, %36, %cst_26 {dimension_numbers = #tpu.dot_dimension_numbers<[1], [0], [0], [1], [0, 0, 1, 1], [], []>} : vector<1x128xf32>, vector<128x128xf32>, vector<1x128xf32> -> vector<1x128xf32>
    %38 = vector.extract_strided_slice %13 {offsets = [6, 0], sizes = [1, 128], strides = [1, 1]} : vector<8x128xf32> to vector<1x128xf32>
    %c6 = arith.constant 6 : index
    %c0_27 = arith.constant 0 : index
    %c0_28 = arith.constant 0 : index
    %39 = vector.load %arg2[%c6, %c0_27, %c0_28] : memref<8x128x128xf32, #tpu.memory_space<vmem>>, vector<1x128x128xf32>
    %40 = vector.shape_cast %39 : vector<1x128x128xf32> to vector<128x128xf32>
    %cst_29 = arith.constant dense<0.000000e+00> : vector<1x128xf32>
    %41 = tpu.matmul %38, %40, %cst_29 {dimension_numbers = #tpu.dot_dimension_numbers<[1], [0], [0], [1], [0, 0, 1, 1], [], []>} : vector<1x128xf32>, vector<128x128xf32>, vector<1x128xf32> -> vector<1x128xf32>
    %42 = vector.extract_strided_slice %13 {offsets = [7, 0], sizes = [1, 128], strides = [1, 1]} : vector<8x128xf32> to vector<1x128xf32>
    %c7 = arith.constant 7 : index
    %c0_30 = arith.constant 0 : index
    %c0_31 = arith.constant 0 : index
    %43 = vector.load %arg2[%c7, %c0_30, %c0_31] : memref<8x128x128xf32, #tpu.memory_space<vmem>>, vector<1x128x128xf32>
    %44 = vector.shape_cast %43 : vector<1x128x128xf32> to vector<128x128xf32>
    %cst_32 = arith.constant dense<0.000000e+00> : vector<1x128xf32>
    %45 = tpu.matmul %42, %44, %cst_32 {dimension_numbers = #tpu.dot_dimension_numbers<[1], [0], [0], [1], [0, 0, 1, 1], [], []>} : vector<1x128xf32>, vector<128x128xf32>, vector<1x128xf32> -> vector<1x128xf32>
    %46 = tpu.concatenate %17, %21, %25, %29, %33, %37, %41, %45 in 0 : vector<1x128xf32>, vector<1x128xf32>, vector<1x128xf32>, vector<1x128xf32>, vector<1x128xf32>, vector<1x128xf32>, vector<1x128xf32>, vector<1x128xf32> -> vector<8x128xf32>
    %47 = math.log %46 : vector<8x128xf32>
    %48 = vector.broadcast %10 : vector<8x1xf32> to vector<8x128xf32>
    %49 = arith.addf %47, %48 : vector<8x128xf32>
    %50 = arith.addf %49, %6 : vector<8x128xf32>
    %cst_33 = arith.constant dense<0xFF800000> : vector<8xf32>
    %51 = vector.multi_reduction <maximumf>, %4, %cst_33 [1] : vector<8x128xf32> to vector<8xf32>
    %52 = vector.shape_cast %51 : vector<8xf32> to vector<8x1xf32>
    %cst_34 = arith.constant -1.000000e+30 : f32
    %53 = vector.broadcast %cst_34 : f32 to vector<8x1xf32>
    %54 = arith.maximumf %52, %53 : vector<8x1xf32>
    %55 = vector.broadcast %54 : vector<8x1xf32> to vector<8x128xf32>
    %56 = arith.subf %4, %55 : vector<8x128xf32>
    %57 = math.exp %56 : vector<8x128xf32>
    %c0_35 = arith.constant 0 : index
    %c0_36 = arith.constant 0 : index
    %c0_37 = arith.constant 0 : index
    %58 = vector.load %arg3[%c0_35, %c0_36, %c0_37] : memref<1x128x128xf32, #tpu.memory_space<vmem>>, vector<1x128x128xf32>
    %59 = vector.shape_cast %58 : vector<1x128x128xf32> to vector<128x128xf32>
    %cst_38 = arith.constant dense<0.000000e+00> : vector<8x128xf32>
    %60 = tpu.matmul %57, %59, %cst_38 {dimension_numbers = #tpu.dot_dimension_numbers<[1], [0], [0], [1], [0, 0, 1, 1], [], []>} : vector<8x128xf32>, vector<128x128xf32>, vector<8x128xf32> -> vector<8x128xf32>
    %61 = math.log %60 : vector<8x128xf32>
    %62 = vector.broadcast %54 : vector<8x1xf32> to vector<8x128xf32>
    %63 = arith.addf %61, %62 : vector<8x128xf32>
    %64 = arith.addf %63, %6 : vector<8x128xf32>
    %c0_i32_39 = arith.constant 0 : i32
    %65 = arith.cmpi eq, %arg1, %c0_i32_39 : i32
    %66 = arith.select %65, %3, %50 : vector<8x128xf32>
    %67 = arith.select %65, %4, %64 : vector<8x128xf32>
    %c1_40 = arith.constant 1 : index
    %c0_41 = arith.constant 0 : index
    %c0_42 = arith.constant 0 : index
    %68 = vector.load %arg8[%c1_40, %c0_41, %c0_42] : memref<8x8x128xf32, #tpu.memory_space<vmem>>, vector<1x8x128xf32>
    %69 = vector.shape_cast %68 : vector<1x8x128xf32> to vector<8x128xf32>
    %cst_43 = arith.constant dense<0xFF800000> : vector<8xf32>
    %70 = vector.multi_reduction <maximumf>, %66, %cst_43 [1] : vector<8x128xf32> to vector<8xf32>
    %71 = vector.shape_cast %70 : vector<8xf32> to vector<8x1xf32>
    %cst_44 = arith.constant -1.000000e+30 : f32
    %72 = vector.broadcast %cst_44 : f32 to vector<8x1xf32>
    %73 = arith.maximumf %71, %72 : vector<8x1xf32>
    %74 = vector.broadcast %73 : vector<8x1xf32> to vector<8x128xf32>
    %75 = arith.subf %66, %74 : vector<8x128xf32>
    %76 = math.exp %75 : vector<8x128xf32>
    %77 = vector.extract_strided_slice %76 {offsets = [0, 0], sizes = [1, 128], strides = [1, 1]} : vector<8x128xf32> to vector<1x128xf32>
    %c0_45 = arith.constant 0 : index
    %c0_46 = arith.constant 0 : index
    %c0_47 = arith.constant 0 : index
    %78 = vector.load %arg2[%c0_45, %c0_46, %c0_47] : memref<8x128x128xf32, #tpu.memory_space<vmem>>, vector<1x128x128xf32>
    %79 = vector.shape_cast %78 : vector<1x128x128xf32> to vector<128x128xf32>
    %cst_48 = arith.constant dense<0.000000e+00> : vector<1x128xf32>
    %80 = tpu.matmul %77, %79, %cst_48 {dimension_numbers = #tpu.dot_dimension_numbers<[1], [0], [0], [1], [0, 0, 1, 1], [], []>} : vector<1x128xf32>, vector<128x128xf32>, vector<1x128xf32> -> vector<1x128xf32>
    %81 = vector.extract_strided_slice %76 {offsets = [1, 0], sizes = [1, 128], strides = [1, 1]} : vector<8x128xf32> to vector<1x128xf32>
    %c1_49 = arith.constant 1 : index
    %c0_50 = arith.constant 0 : index
    %c0_51 = arith.constant 0 : index
    %82 = vector.load %arg2[%c1_49, %c0_50, %c0_51] : memref<8x128x128xf32, #tpu.memory_space<vmem>>, vector<1x128x128xf32>
    %83 = vector.shape_cast %82 : vector<1x128x128xf32> to vector<128x128xf32>
    %cst_52 = arith.constant dense<0.000000e+00> : vector<1x128xf32>
    %84 = tpu.matmul %81, %83, %cst_52 {dimension_numbers = #tpu.dot_dimension_numbers<[1], [0], [0], [1], [0, 0, 1, 1], [], []>} : vector<1x128xf32>, vector<128x128xf32>, vector<1x128xf32> -> vector<1x128xf32>
    %85 = vector.extract_strided_slice %76 {offsets = [2, 0], sizes = [1, 128], strides = [1, 1]} : vector<8x128xf32> to vector<1x128xf32>
    %c2_53 = arith.constant 2 : index
    %c0_54 = arith.constant 0 : index
    %c0_55 = arith.constant 0 : index
    %86 = vector.load %arg2[%c2_53, %c0_54, %c0_55] : memref<8x128x128xf32, #tpu.memory_space<vmem>>, vector<1x128x128xf32>
    %87 = vector.shape_cast %86 : vector<1x128x128xf32> to vector<128x128xf32>
    %cst_56 = arith.constant dense<0.000000e+00> : vector<1x128xf32>
    %88 = tpu.matmul %85, %87, %cst_56 {dimension_numbers = #tpu.dot_dimension_numbers<[1], [0], [0], [1], [0, 0, 1, 1], [], []>} : vector<1x128xf32>, vector<128x128xf32>, vector<1x128xf32> -> vector<1x128xf32>
    %89 = vector.extract_strided_slice %76 {offsets = [3, 0], sizes = [1, 128], strides = [1, 1]} : vector<8x128xf32> to vector<1x128xf32>
    %c3_57 = arith.constant 3 : index
    %c0_58 = arith.constant 0 : index
    %c0_59 = arith.constant 0 : index
    %90 = vector.load %arg2[%c3_57, %c0_58, %c0_59] : memref<8x128x128xf32, #tpu.memory_space<vmem>>, vector<1x128x128xf32>
    %91 = vector.shape_cast %90 : vector<1x128x128xf32> to vector<128x128xf32>
    %cst_60 = arith.constant dense<0.000000e+00> : vector<1x128xf32>
    %92 = tpu.matmul %89, %91, %cst_60 {dimension_numbers = #tpu.dot_dimension_numbers<[1], [0], [0], [1], [0, 0, 1, 1], [], []>} : vector<1x128xf32>, vector<128x128xf32>, vector<1x128xf32> -> vector<1x128xf32>
    %93 = vector.extract_strided_slice %76 {offsets = [4, 0], sizes = [1, 128], strides = [1, 1]} : vector<8x128xf32> to vector<1x128xf32>
    %c4_61 = arith.constant 4 : index
    %c0_62 = arith.constant 0 : index
    %c0_63 = arith.constant 0 : index
    %94 = vector.load %arg2[%c4_61, %c0_62, %c0_63] : memref<8x128x128xf32, #tpu.memory_space<vmem>>, vector<1x128x128xf32>
    %95 = vector.shape_cast %94 : vector<1x128x128xf32> to vector<128x128xf32>
    %cst_64 = arith.constant dense<0.000000e+00> : vector<1x128xf32>
    %96 = tpu.matmul %93, %95, %cst_64 {dimension_numbers = #tpu.dot_dimension_numbers<[1], [0], [0], [1], [0, 0, 1, 1], [], []>} : vector<1x128xf32>, vector<128x128xf32>, vector<1x128xf32> -> vector<1x128xf32>
    %97 = vector.extract_strided_slice %76 {offsets = [5, 0], sizes = [1, 128], strides = [1, 1]} : vector<8x128xf32> to vector<1x128xf32>
    %c5_65 = arith.constant 5 : index
    %c0_66 = arith.constant 0 : index
    %c0_67 = arith.constant 0 : index
    %98 = vector.load %arg2[%c5_65, %c0_66, %c0_67] : memref<8x128x128xf32, #tpu.memory_space<vmem>>, vector<1x128x128xf32>
    %99 = vector.shape_cast %98 : vector<1x128x128xf32> to vector<128x128xf32>
    %cst_68 = arith.constant dense<0.000000e+00> : vector<1x128xf32>
    %100 = tpu.matmul %97, %99, %cst_68 {dimension_numbers = #tpu.dot_dimension_numbers<[1], [0], [0], [1], [0, 0, 1, 1], [], []>} : vector<1x128xf32>, vector<128x128xf32>, vector<1x128xf32> -> vector<1x128xf32>
    %101 = vector.extract_strided_slice %76 {offsets = [6, 0], sizes = [1, 128], strides = [1, 1]} : vector<8x128xf32> to vector<1x128xf32>
    %c6_69 = arith.constant 6 : index
    %c0_70 = arith.constant 0 : index
    %c0_71 = arith.constant 0 : index
    %102 = vector.load %arg2[%c6_69, %c0_70, %c0_71] : memref<8x128x128xf32, #tpu.memory_space<vmem>>, vector<1x128x128xf32>
    %103 = vector.shape_cast %102 : vector<1x128x128xf32> to vector<128x128xf32>
    %cst_72 = arith.constant dense<0.000000e+00> : vector<1x128xf32>
    %104 = tpu.matmul %101, %103, %cst_72 {dimension_numbers = #tpu.dot_dimension_numbers<[1], [0], [0], [1], [0, 0, 1, 1], [], []>} : vector<1x128xf32>, vector<128x128xf32>, vector<1x128xf32> -> vector<1x128xf32>
    %105 = vector.extract_strided_slice %76 {offsets = [7, 0], sizes = [1, 128], strides = [1, 1]} : vector<8x128xf32> to vector<1x128xf32>
    %c7_73 = arith.constant 7 : index
    %c0_74 = arith.constant 0 : index
    %c0_75 = arith.constant 0 : index
    %106 = vector.load %arg2[%c7_73, %c0_74, %c0_75] : memref<8x128x128xf32, #tpu.memory_space<vmem>>, vector<1x128x128xf32>
    %107 = vector.shape_cast %106 : vector<1x128x128xf32> to vector<128x128xf32>
    %cst_76 = arith.constant dense<0.000000e+00> : vector<1x128xf32>
    %108 = tpu.matmul %105, %107, %cst_76 {dimension_numbers = #tpu.dot_dimension_numbers<[1], [0], [0], [1], [0, 0, 1, 1], [], []>} : vector<1x128xf32>, vector<128x128xf32>, vector<1x128xf32> -> vector<1x128xf32>
    %109 = tpu.concatenate %80, %84, %88, %92, %96, %100, %104, %108 in 0 : vector<1x128xf32>, vector<1x128xf32>, vector<1x128xf32>, vector<1x128xf32>, vector<1x128xf32>, vector<1x128xf32>, vector<1x128xf32>, vector<1x128xf32> -> vector<8x128xf32>
    %110 = math.log %109 : vector<8x128xf32>
    %111 = vector.broadcast %73 : vector<8x1xf32> to vector<8x128xf32>
    %112 = arith.addf %110, %111 : vector<8x128xf32>
    %113 = arith.addf %112, %69 : vector<8x128xf32>
    %cst_77 = arith.constant dense<0xFF800000> : vector<8xf32>
    %114 = vector.multi_reduction <maximumf>, %67, %cst_77 [1] : vector<8x128xf32> to vector<8xf32>
    %115 = vector.shape_cast %114 : vector<8xf32> to vector<8x1xf32>
    %cst_78 = arith.constant -1.000000e+30 : f32
    %116 = vector.broadcast %cst_78 : f32 to vector<8x1xf32>
    %117 = arith.maximumf %115, %116 : vector<8x1xf32>
    %118 = vector.broadcast %117 : vector<8x1xf32> to vector<8x128xf32>
    %119 = arith.subf %67, %118 : vector<8x128xf32>
    %120 = math.exp %119 : vector<8x128xf32>
    %c0_79 = arith.constant 0 : index
    %c0_80 = arith.constant 0 : index
    %c0_81 = arith.constant 0 : index
    %121 = vector.load %arg3[%c0_79, %c0_80, %c0_81] : memref<1x128x128xf32, #tpu.memory_space<vmem>>, vector<1x128x128xf32>
    %122 = vector.shape_cast %121 : vector<1x128x128xf32> to vector<128x128xf32>
    %cst_82 = arith.constant dense<0.000000e+00> : vector<8x128xf32>
    %123 = tpu.matmul %120, %122, %cst_82 {dimension_numbers = #tpu.dot_dimension_numbers<[1], [0], [0], [1], [0, 0, 1, 1], [], []>} : vector<8x128xf32>, vector<128x128xf32>, vector<8x128xf32> -> vector<8x128xf32>
    %124 = math.log %123 : vector<8x128xf32>
    %125 = vector.broadcast %117 : vector<8x1xf32> to vector<8x128xf32>
    %126 = arith.addf %124, %125 : vector<8x128xf32>
    %127 = arith.addf %126, %69 : vector<8x128xf32>
    %c2_83 = arith.constant 2 : index
    %c0_84 = arith.constant 0 : index
    %c0_85 = arith.constant 0 : index
    %128 = vector.load %arg8[%c2_83, %c0_84, %c0_85] : memref<8x8x128xf32, #tpu.memory_space<vmem>>, vector<1x8x128xf32>
    %129 = vector.shape_cast %128 : vector<1x8x128xf32> to vector<8x128xf32>
    %cst_86 = arith.constant dense<0xFF800000> : vector<8xf32>
    %130 = vector.multi_reduction <maximumf>, %113, %cst_86 [1] : vector<8x128xf32> to vector<8xf32>
    %131 = vector.shape_cast %130 : vector<8xf32> to vector<8x1xf32>
    %cst_87 = arith.constant -1.000000e+30 : f32
    %132 = vector.broadcast %cst_87 : f32 to vector<8x1xf32>
    %133 = arith.maximumf %131, %132 : vector<8x1xf32>
    %134 = vector.broadcast %133 : vector<8x1xf32> to vector<8x128xf32>
    %135 = arith.subf %113, %134 : vector<8x128xf32>
    %136 = math.exp %135 : vector<8x128xf32>
    %137 = vector.extract_strided_slice %136 {offsets = [0, 0], sizes = [1, 128], strides = [1, 1]} : vector<8x128xf32> to vector<1x128xf32>
    %c0_88 = arith.constant 0 : index
    %c0_89 = arith.constant 0 : index
    %c0_90 = arith.constant 0 : index
    %138 = vector.load %arg2[%c0_88, %c0_89, %c0_90] : memref<8x128x128xf32, #tpu.memory_space<vmem>>, vector<1x128x128xf32>
    %139 = vector.shape_cast %138 : vector<1x128x128xf32> to vector<128x128xf32>
    %cst_91 = arith.constant dense<0.000000e+00> : vector<1x128xf32>
    %140 = tpu.matmul %137, %139, %cst_91 {dimension_numbers = #tpu.dot_dimension_numbers<[1], [0], [0], [1], [0, 0, 1, 1], [], []>} : vector<1x128xf32>, vector<128x128xf32>, vector<1x128xf32> -> vector<1x128xf32>
    %141 = vector.extract_strided_slice %136 {offsets = [1, 0], sizes = [1, 128], strides = [1, 1]} : vector<8x128xf32> to vector<1x128xf32>
    %c1_92 = arith.constant 1 : index
    %c0_93 = arith.constant 0 : index
    %c0_94 = arith.constant 0 : index
    %142 = vector.load %arg2[%c1_92, %c0_93, %c0_94] : memref<8x128x128xf32, #tpu.memory_space<vmem>>, vector<1x128x128xf32>
    %143 = vector.shape_cast %142 : vector<1x128x128xf32> to vector<128x128xf32>
    %cst_95 = arith.constant dense<0.000000e+00> : vector<1x128xf32>
    %144 = tpu.matmul %141, %143, %cst_95 {dimension_numbers = #tpu.dot_dimension_numbers<[1], [0], [0], [1], [0, 0, 1, 1], [], []>} : vector<1x128xf32>, vector<128x128xf32>, vector<1x128xf32> -> vector<1x128xf32>
    %145 = vector.extract_strided_slice %136 {offsets = [2, 0], sizes = [1, 128], strides = [1, 1]} : vector<8x128xf32> to vector<1x128xf32>
    %c2_96 = arith.constant 2 : index
    %c0_97 = arith.constant 0 : index
    %c0_98 = arith.constant 0 : index
    %146 = vector.load %arg2[%c2_96, %c0_97, %c0_98] : memref<8x128x128xf32, #tpu.memory_space<vmem>>, vector<1x128x128xf32>
    %147 = vector.shape_cast %146 : vector<1x128x128xf32> to vector<128x128xf32>
    %cst_99 = arith.constant dense<0.000000e+00> : vector<1x128xf32>
    %148 = tpu.matmul %145, %147, %cst_99 {dimension_numbers = #tpu.dot_dimension_numbers<[1], [0], [0], [1], [0, 0, 1, 1], [], []>} : vector<1x128xf32>, vector<128x128xf32>, vector<1x128xf32> -> vector<1x128xf32>
    %149 = vector.extract_strided_slice %136 {offsets = [3, 0], sizes = [1, 128], strides = [1, 1]} : vector<8x128xf32> to vector<1x128xf32>
    %c3_100 = arith.constant 3 : index
    %c0_101 = arith.constant 0 : index
    %c0_102 = arith.constant 0 : index
    %150 = vector.load %arg2[%c3_100, %c0_101, %c0_102] : memref<8x128x128xf32, #tpu.memory_space<vmem>>, vector<1x128x128xf32>
    %151 = vector.shape_cast %150 : vector<1x128x128xf32> to vector<128x128xf32>
    %cst_103 = arith.constant dense<0.000000e+00> : vector<1x128xf32>
    %152 = tpu.matmul %149, %151, %cst_103 {dimension_numbers = #tpu.dot_dimension_numbers<[1], [0], [0], [1], [0, 0, 1, 1], [], []>} : vector<1x128xf32>, vector<128x128xf32>, vector<1x128xf32> -> vector<1x128xf32>
    %153 = vector.extract_strided_slice %136 {offsets = [4, 0], sizes = [1, 128], strides = [1, 1]} : vector<8x128xf32> to vector<1x128xf32>
    %c4_104 = arith.constant 4 : index
    %c0_105 = arith.constant 0 : index
    %c0_106 = arith.constant 0 : index
    %154 = vector.load %arg2[%c4_104, %c0_105, %c0_106] : memref<8x128x128xf32, #tpu.memory_space<vmem>>, vector<1x128x128xf32>
    %155 = vector.shape_cast %154 : vector<1x128x128xf32> to vector<128x128xf32>
    %cst_107 = arith.constant dense<0.000000e+00> : vector<1x128xf32>
    %156 = tpu.matmul %153, %155, %cst_107 {dimension_numbers = #tpu.dot_dimension_numbers<[1], [0], [0], [1], [0, 0, 1, 1], [], []>} : vector<1x128xf32>, vector<128x128xf32>, vector<1x128xf32> -> vector<1x128xf32>
    %157 = vector.extract_strided_slice %136 {offsets = [5, 0], sizes = [1, 128], strides = [1, 1]} : vector<8x128xf32> to vector<1x128xf32>
    %c5_108 = arith.constant 5 : index
    %c0_109 = arith.constant 0 : index
    %c0_110 = arith.constant 0 : index
    %158 = vector.load %arg2[%c5_108, %c0_109, %c0_110] : memref<8x128x128xf32, #tpu.memory_space<vmem>>, vector<1x128x128xf32>
    %159 = vector.shape_cast %158 : vector<1x128x128xf32> to vector<128x128xf32>
    %cst_111 = arith.constant dense<0.000000e+00> : vector<1x128xf32>
    %160 = tpu.matmul %157, %159, %cst_111 {dimension_numbers = #tpu.dot_dimension_numbers<[1], [0], [0], [1], [0, 0, 1, 1], [], []>} : vector<1x128xf32>, vector<128x128xf32>, vector<1x128xf32> -> vector<1x128xf32>
    %161 = vector.extract_strided_slice %136 {offsets = [6, 0], sizes = [1, 128], strides = [1, 1]} : vector<8x128xf32> to vector<1x128xf32>
    %c6_112 = arith.constant 6 : index
    %c0_113 = arith.constant 0 : index
    %c0_114 = arith.constant 0 : index
    %162 = vector.load %arg2[%c6_112, %c0_113, %c0_114] : memref<8x128x128xf32, #tpu.memory_space<vmem>>, vector<1x128x128xf32>
    %163 = vector.shape_cast %162 : vector<1x128x128xf32> to vector<128x128xf32>
    %cst_115 = arith.constant dense<0.000000e+00> : vector<1x128xf32>
    %164 = tpu.matmul %161, %163, %cst_115 {dimension_numbers = #tpu.dot_dimension_numbers<[1], [0], [0], [1], [0, 0, 1, 1], [], []>} : vector<1x128xf32>, vector<128x128xf32>, vector<1x128xf32> -> vector<1x128xf32>
    %165 = vector.extract_strided_slice %136 {offsets = [7, 0], sizes = [1, 128], strides = [1, 1]} : vector<8x128xf32> to vector<1x128xf32>
    %c7_116 = arith.constant 7 : index
    %c0_117 = arith.constant 0 : index
    %c0_118 = arith.constant 0 : index
    %166 = vector.load %arg2[%c7_116, %c0_117, %c0_118] : memref<8x128x128xf32, #tpu.memory_space<vmem>>, vector<1x128x128xf32>
    %167 = vector.shape_cast %166 : vector<1x128x128xf32> to vector<128x128xf32>
    %cst_119 = arith.constant dense<0.000000e+00> : vector<1x128xf32>
    %168 = tpu.matmul %165, %167, %cst_119 {dimension_numbers = #tpu.dot_dimension_numbers<[1], [0], [0], [1], [0, 0, 1, 1], [], []>} : vector<1x128xf32>, vector<128x128xf32>, vector<1x128xf32> -> vector<1x128xf32>
    %169 = tpu.concatenate %140, %144, %148, %152, %156, %160, %164, %168 in 0 : vector<1x128xf32>, vector<1x128xf32>, vector<1x128xf32>, vector<1x128xf32>, vector<1x128xf32>, vector<1x128xf32>, vector<1x128xf32>, vector<1x128xf32> -> vector<8x128xf32>
    %170 = math.log %169 : vector<8x128xf32>
    %171 = vector.broadcast %133 : vector<8x1xf32> to vector<8x128xf32>
    %172 = arith.addf %170, %171 : vector<8x128xf32>
    %173 = arith.addf %172, %129 : vector<8x128xf32>
    %cst_120 = arith.constant dense<0xFF800000> : vector<8xf32>
    %174 = vector.multi_reduction <maximumf>, %127, %cst_120 [1] : vector<8x128xf32> to vector<8xf32>
    %175 = vector.shape_cast %174 : vector<8xf32> to vector<8x1xf32>
    %cst_121 = arith.constant -1.000000e+30 : f32
    %176 = vector.broadcast %cst_121 : f32 to vector<8x1xf32>
    %177 = arith.maximumf %175, %176 : vector<8x1xf32>
    %178 = vector.broadcast %177 : vector<8x1xf32> to vector<8x128xf32>
    %179 = arith.subf %127, %178 : vector<8x128xf32>
    %180 = math.exp %179 : vector<8x128xf32>
    %c0_122 = arith.constant 0 : index
    %c0_123 = arith.constant 0 : index
    %c0_124 = arith.constant 0 : index
    %181 = vector.load %arg3[%c0_122, %c0_123, %c0_124] : memref<1x128x128xf32, #tpu.memory_space<vmem>>, vector<1x128x128xf32>
    %182 = vector.shape_cast %181 : vector<1x128x128xf32> to vector<128x128xf32>
    %cst_125 = arith.constant dense<0.000000e+00> : vector<8x128xf32>
    %183 = tpu.matmul %180, %182, %cst_125 {dimension_numbers = #tpu.dot_dimension_numbers<[1], [0], [0], [1], [0, 0, 1, 1], [], []>} : vector<8x128xf32>, vector<128x128xf32>, vector<8x128xf32> -> vector<8x128xf32>
    %184 = math.log %183 : vector<8x128xf32>
    %185 = vector.broadcast %177 : vector<8x1xf32> to vector<8x128xf32>
    %186 = arith.addf %184, %185 : vector<8x128xf32>
    %187 = arith.addf %186, %129 : vector<8x128xf32>
    %c3_126 = arith.constant 3 : index
    %c0_127 = arith.constant 0 : index
    %c0_128 = arith.constant 0 : index
    %188 = vector.load %arg8[%c3_126, %c0_127, %c0_128] : memref<8x8x128xf32, #tpu.memory_space<vmem>>, vector<1x8x128xf32>
    %189 = vector.shape_cast %188 : vector<1x8x128xf32> to vector<8x128xf32>
    %cst_129 = arith.constant dense<0xFF800000> : vector<8xf32>
    %190 = vector.multi_reduction <maximumf>, %173, %cst_129 [1] : vector<8x128xf32> to vector<8xf32>
    %191 = vector.shape_cast %190 : vector<8xf32> to vector<8x1xf32>
    %cst_130 = arith.constant -1.000000e+30 : f32
    %192 = vector.broadcast %cst_130 : f32 to vector<8x1xf32>
    %193 = arith.maximumf %191, %192 : vector<8x1xf32>
    %194 = vector.broadcast %193 : vector<8x1xf32> to vector<8x128xf32>
    %195 = arith.subf %173, %194 : vector<8x128xf32>
    %196 = math.exp %195 : vector<8x128xf32>
    %197 = vector.extract_strided_slice %196 {offsets = [0, 0], sizes = [1, 128], strides = [1, 1]} : vector<8x128xf32> to vector<1x128xf32>
    %c0_131 = arith.constant 0 : index
    %c0_132 = arith.constant 0 : index
    %c0_133 = arith.constant 0 : index
    %198 = vector.load %arg2[%c0_131, %c0_132, %c0_133] : memref<8x128x128xf32, #tpu.memory_space<vmem>>, vector<1x128x128xf32>
    %199 = vector.shape_cast %198 : vector<1x128x128xf32> to vector<128x128xf32>
    %cst_134 = arith.constant dense<0.000000e+00> : vector<1x128xf32>
    %200 = tpu.matmul %197, %199, %cst_134 {dimension_numbers = #tpu.dot_dimension_numbers<[1], [0], [0], [1], [0, 0, 1, 1], [], []>} : vector<1x128xf32>, vector<128x128xf32>, vector<1x128xf32> -> vector<1x128xf32>
    %201 = vector.extract_strided_slice %196 {offsets = [1, 0], sizes = [1, 128], strides = [1, 1]} : vector<8x128xf32> to vector<1x128xf32>
    %c1_135 = arith.constant 1 : index
    %c0_136 = arith.constant 0 : index
    %c0_137 = arith.constant 0 : index
    %202 = vector.load %arg2[%c1_135, %c0_136, %c0_137] : memref<8x128x128xf32, #tpu.memory_space<vmem>>, vector<1x128x128xf32>
    %203 = vector.shape_cast %202 : vector<1x128x128xf32> to vector<128x128xf32>
    %cst_138 = arith.constant dense<0.000000e+00> : vector<1x128xf32>
    %204 = tpu.matmul %201, %203, %cst_138 {dimension_numbers = #tpu.dot_dimension_numbers<[1], [0], [0], [1], [0, 0, 1, 1], [], []>} : vector<1x128xf32>, vector<128x128xf32>, vector<1x128xf32> -> vector<1x128xf32>
    %205 = vector.extract_strided_slice %196 {offsets = [2, 0], sizes = [1, 128], strides = [1, 1]} : vector<8x128xf32> to vector<1x128xf32>
    %c2_139 = arith.constant 2 : index
    %c0_140 = arith.constant 0 : index
    %c0_141 = arith.constant 0 : index
    %206 = vector.load %arg2[%c2_139, %c0_140, %c0_141] : memref<8x128x128xf32, #tpu.memory_space<vmem>>, vector<1x128x128xf32>
    %207 = vector.shape_cast %206 : vector<1x128x128xf32> to vector<128x128xf32>
    %cst_142 = arith.constant dense<0.000000e+00> : vector<1x128xf32>
    %208 = tpu.matmul %205, %207, %cst_142 {dimension_numbers = #tpu.dot_dimension_numbers<[1], [0], [0], [1], [0, 0, 1, 1], [], []>} : vector<1x128xf32>, vector<128x128xf32>, vector<1x128xf32> -> vector<1x128xf32>
    %209 = vector.extract_strided_slice %196 {offsets = [3, 0], sizes = [1, 128], strides = [1, 1]} : vector<8x128xf32> to vector<1x128xf32>
    %c3_143 = arith.constant 3 : index
    %c0_144 = arith.constant 0 : index
    %c0_145 = arith.constant 0 : index
    %210 = vector.load %arg2[%c3_143, %c0_144, %c0_145] : memref<8x128x128xf32, #tpu.memory_space<vmem>>, vector<1x128x128xf32>
    %211 = vector.shape_cast %210 : vector<1x128x128xf32> to vector<128x128xf32>
    %cst_146 = arith.constant dense<0.000000e+00> : vector<1x128xf32>
    %212 = tpu.matmul %209, %211, %cst_146 {dimension_numbers = #tpu.dot_dimension_numbers<[1], [0], [0], [1], [0, 0, 1, 1], [], []>} : vector<1x128xf32>, vector<128x128xf32>, vector<1x128xf32> -> vector<1x128xf32>
    %213 = vector.extract_strided_slice %196 {offsets = [4, 0], sizes = [1, 128], strides = [1, 1]} : vector<8x128xf32> to vector<1x128xf32>
    %c4_147 = arith.constant 4 : index
    %c0_148 = arith.constant 0 : index
    %c0_149 = arith.constant 0 : index
    %214 = vector.load %arg2[%c4_147, %c0_148, %c0_149] : memref<8x128x128xf32, #tpu.memory_space<vmem>>, vector<1x128x128xf32>
    %215 = vector.shape_cast %214 : vector<1x128x128xf32> to vector<128x128xf32>
    %cst_150 = arith.constant dense<0.000000e+00> : vector<1x128xf32>
    %216 = tpu.matmul %213, %215, %cst_150 {dimension_numbers = #tpu.dot_dimension_numbers<[1], [0], [0], [1], [0, 0, 1, 1], [], []>} : vector<1x128xf32>, vector<128x128xf32>, vector<1x128xf32> -> vector<1x128xf32>
    %217 = vector.extract_strided_slice %196 {offsets = [5, 0], sizes = [1, 128], strides = [1, 1]} : vector<8x128xf32> to vector<1x128xf32>
    %c5_151 = arith.constant 5 : index
    %c0_152 = arith.constant 0 : index
    %c0_153 = arith.constant 0 : index
    %218 = vector.load %arg2[%c5_151, %c0_152, %c0_153] : memref<8x128x128xf32, #tpu.memory_space<vmem>>, vector<1x128x128xf32>
    %219 = vector.shape_cast %218 : vector<1x128x128xf32> to vector<128x128xf32>
    %cst_154 = arith.constant dense<0.000000e+00> : vector<1x128xf32>
    %220 = tpu.matmul %217, %219, %cst_154 {dimension_numbers = #tpu.dot_dimension_numbers<[1], [0], [0], [1], [0, 0, 1, 1], [], []>} : vector<1x128xf32>, vector<128x128xf32>, vector<1x128xf32> -> vector<1x128xf32>
    %221 = vector.extract_strided_slice %196 {offsets = [6, 0], sizes = [1, 128], strides = [1, 1]} : vector<8x128xf32> to vector<1x128xf32>
    %c6_155 = arith.constant 6 : index
    %c0_156 = arith.constant 0 : index
    %c0_157 = arith.constant 0 : index
    %222 = vector.load %arg2[%c6_155, %c0_156, %c0_157] : memref<8x128x128xf32, #tpu.memory_space<vmem>>, vector<1x128x128xf32>
    %223 = vector.shape_cast %222 : vector<1x128x128xf32> to vector<128x128xf32>
    %cst_158 = arith.constant dense<0.000000e+00> : vector<1x128xf32>
    %224 = tpu.matmul %221, %223, %cst_158 {dimension_numbers = #tpu.dot_dimension_numbers<[1], [0], [0], [1], [0, 0, 1, 1], [], []>} : vector<1x128xf32>, vector<128x128xf32>, vector<1x128xf32> -> vector<1x128xf32>
    %225 = vector.extract_strided_slice %196 {offsets = [7, 0], sizes = [1, 128], strides = [1, 1]} : vector<8x128xf32> to vector<1x128xf32>
    %c7_159 = arith.constant 7 : index
    %c0_160 = arith.constant 0 : index
    %c0_161 = arith.constant 0 : index
    %226 = vector.load %arg2[%c7_159, %c0_160, %c0_161] : memref<8x128x128xf32, #tpu.memory_space<vmem>>, vector<1x128x128xf32>
    %227 = vector.shape_cast %226 : vector<1x128x128xf32> to vector<128x128xf32>
    %cst_162 = arith.constant dense<0.000000e+00> : vector<1x128xf32>
    %228 = tpu.matmul %225, %227, %cst_162 {dimension_numbers = #tpu.dot_dimension_numbers<[1], [0], [0], [1], [0, 0, 1, 1], [], []>} : vector<1x128xf32>, vector<128x128xf32>, vector<1x128xf32> -> vector<1x128xf32>
    %229 = tpu.concatenate %200, %204, %208, %212, %216, %220, %224, %228 in 0 : vector<1x128xf32>, vector<1x128xf32>, vector<1x128xf32>, vector<1x128xf32>, vector<1x128xf32>, vector<1x128xf32>, vector<1x128xf32>, vector<1x128xf32> -> vector<8x128xf32>
    %230 = math.log %229 : vector<8x128xf32>
    %231 = vector.broadcast %193 : vector<8x1xf32> to vector<8x128xf32>
    %232 = arith.addf %230, %231 : vector<8x128xf32>
    %233 = arith.addf %232, %189 : vector<8x128xf32>
    %cst_163 = arith.constant dense<0xFF800000> : vector<8xf32>
    %234 = vector.multi_reduction <maximumf>, %187, %cst_163 [1] : vector<8x128xf32> to vector<8xf32>
    %235 = vector.shape_cast %234 : vector<8xf32> to vector<8x1xf32>
    %cst_164 = arith.constant -1.000000e+30 : f32
    %236 = vector.broadcast %cst_164 : f32 to vector<8x1xf32>
    %237 = arith.maximumf %235, %236 : vector<8x1xf32>
    %238 = vector.broadcast %237 : vector<8x1xf32> to vector<8x128xf32>
    %239 = arith.subf %187, %238 : vector<8x128xf32>
    %240 = math.exp %239 : vector<8x128xf32>
    %c0_165 = arith.constant 0 : index
    %c0_166 = arith.constant 0 : index
    %c0_167 = arith.constant 0 : index
    %241 = vector.load %arg3[%c0_165, %c0_166, %c0_167] : memref<1x128x128xf32, #tpu.memory_space<vmem>>, vector<1x128x128xf32>
    %242 = vector.shape_cast %241 : vector<1x128x128xf32> to vector<128x128xf32>
    %cst_168 = arith.constant dense<0.000000e+00> : vector<8x128xf32>
    %243 = tpu.matmul %240, %242, %cst_168 {dimension_numbers = #tpu.dot_dimension_numbers<[1], [0], [0], [1], [0, 0, 1, 1], [], []>} : vector<8x128xf32>, vector<128x128xf32>, vector<8x128xf32> -> vector<8x128xf32>
    %244 = math.log %243 : vector<8x128xf32>
    %245 = vector.broadcast %237 : vector<8x1xf32> to vector<8x128xf32>
    %246 = arith.addf %244, %245 : vector<8x128xf32>
    %247 = arith.addf %246, %189 : vector<8x128xf32>
    %c4_169 = arith.constant 4 : index
    %c0_170 = arith.constant 0 : index
    %c0_171 = arith.constant 0 : index
    %248 = vector.load %arg8[%c4_169, %c0_170, %c0_171] : memref<8x8x128xf32, #tpu.memory_space<vmem>>, vector<1x8x128xf32>
    %249 = vector.shape_cast %248 : vector<1x8x128xf32> to vector<8x128xf32>
    %cst_172 = arith.constant dense<0xFF800000> : vector<8xf32>
    %250 = vector.multi_reduction <maximumf>, %233, %cst_172 [1] : vector<8x128xf32> to vector<8xf32>
    %251 = vector.shape_cast %250 : vector<8xf32> to vector<8x1xf32>
    %cst_173 = arith.constant -1.000000e+30 : f32
    %252 = vector.broadcast %cst_173 : f32 to vector<8x1xf32>
    %253 = arith.maximumf %251, %252 : vector<8x1xf32>
    %254 = vector.broadcast %253 : vector<8x1xf32> to vector<8x128xf32>
    %255 = arith.subf %233, %254 : vector<8x128xf32>
    %256 = math.exp %255 : vector<8x128xf32>
    %257 = vector.extract_strided_slice %256 {offsets = [0, 0], sizes = [1, 128], strides = [1, 1]} : vector<8x128xf32> to vector<1x128xf32>
    %c0_174 = arith.constant 0 : index
    %c0_175 = arith.constant 0 : index
    %c0_176 = arith.constant 0 : index
    %258 = vector.load %arg2[%c0_174, %c0_175, %c0_176] : memref<8x128x128xf32, #tpu.memory_space<vmem>>, vector<1x128x128xf32>
    %259 = vector.shape_cast %258 : vector<1x128x128xf32> to vector<128x128xf32>
    %cst_177 = arith.constant dense<0.000000e+00> : vector<1x128xf32>
    %260 = tpu.matmul %257, %259, %cst_177 {dimension_numbers = #tpu.dot_dimension_numbers<[1], [0], [0], [1], [0, 0, 1, 1], [], []>} : vector<1x128xf32>, vector<128x128xf32>, vector<1x128xf32> -> vector<1x128xf32>
    %261 = vector.extract_strided_slice %256 {offsets = [1, 0], sizes = [1, 128], strides = [1, 1]} : vector<8x128xf32> to vector<1x128xf32>
    %c1_178 = arith.constant 1 : index
    %c0_179 = arith.constant 0 : index
    %c0_180 = arith.constant 0 : index
    %262 = vector.load %arg2[%c1_178, %c0_179, %c0_180] : memref<8x128x128xf32, #tpu.memory_space<vmem>>, vector<1x128x128xf32>
    %263 = vector.shape_cast %262 : vector<1x128x128xf32> to vector<128x128xf32>
    %cst_181 = arith.constant dense<0.000000e+00> : vector<1x128xf32>
    %264 = tpu.matmul %261, %263, %cst_181 {dimension_numbers = #tpu.dot_dimension_numbers<[1], [0], [0], [1], [0, 0, 1, 1], [], []>} : vector<1x128xf32>, vector<128x128xf32>, vector<1x128xf32> -> vector<1x128xf32>
    %265 = vector.extract_strided_slice %256 {offsets = [2, 0], sizes = [1, 128], strides = [1, 1]} : vector<8x128xf32> to vector<1x128xf32>
    %c2_182 = arith.constant 2 : index
    %c0_183 = arith.constant 0 : index
    %c0_184 = arith.constant 0 : index
    %266 = vector.load %arg2[%c2_182, %c0_183, %c0_184] : memref<8x128x128xf32, #tpu.memory_space<vmem>>, vector<1x128x128xf32>
    %267 = vector.shape_cast %266 : vector<1x128x128xf32> to vector<128x128xf32>
    %cst_185 = arith.constant dense<0.000000e+00> : vector<1x128xf32>
    %268 = tpu.matmul %265, %267, %cst_185 {dimension_numbers = #tpu.dot_dimension_numbers<[1], [0], [0], [1], [0, 0, 1, 1], [], []>} : vector<1x128xf32>, vector<128x128xf32>, vector<1x128xf32> -> vector<1x128xf32>
    %269 = vector.extract_strided_slice %256 {offsets = [3, 0], sizes = [1, 128], strides = [1, 1]} : vector<8x128xf32> to vector<1x128xf32>
    %c3_186 = arith.constant 3 : index
    %c0_187 = arith.constant 0 : index
    %c0_188 = arith.constant 0 : index
    %270 = vector.load %arg2[%c3_186, %c0_187, %c0_188] : memref<8x128x128xf32, #tpu.memory_space<vmem>>, vector<1x128x128xf32>
    %271 = vector.shape_cast %270 : vector<1x128x128xf32> to vector<128x128xf32>
    %cst_189 = arith.constant dense<0.000000e+00> : vector<1x128xf32>
    %272 = tpu.matmul %269, %271, %cst_189 {dimension_numbers = #tpu.dot_dimension_numbers<[1], [0], [0], [1], [0, 0, 1, 1], [], []>} : vector<1x128xf32>, vector<128x128xf32>, vector<1x128xf32> -> vector<1x128xf32>
    %273 = vector.extract_strided_slice %256 {offsets = [4, 0], sizes = [1, 128], strides = [1, 1]} : vector<8x128xf32> to vector<1x128xf32>
    %c4_190 = arith.constant 4 : index
    %c0_191 = arith.constant 0 : index
    %c0_192 = arith.constant 0 : index
    %274 = vector.load %arg2[%c4_190, %c0_191, %c0_192] : memref<8x128x128xf32, #tpu.memory_space<vmem>>, vector<1x128x128xf32>
    %275 = vector.shape_cast %274 : vector<1x128x128xf32> to vector<128x128xf32>
    %cst_193 = arith.constant dense<0.000000e+00> : vector<1x128xf32>
    %276 = tpu.matmul %273, %275, %cst_193 {dimension_numbers = #tpu.dot_dimension_numbers<[1], [0], [0], [1], [0, 0, 1, 1], [], []>} : vector<1x128xf32>, vector<128x128xf32>, vector<1x128xf32> -> vector<1x128xf32>
    %277 = vector.extract_strided_slice %256 {offsets = [5, 0], sizes = [1, 128], strides = [1, 1]} : vector<8x128xf32> to vector<1x128xf32>
    %c5_194 = arith.constant 5 : index
    %c0_195 = arith.constant 0 : index
    %c0_196 = arith.constant 0 : index
    %278 = vector.load %arg2[%c5_194, %c0_195, %c0_196] : memref<8x128x128xf32, #tpu.memory_space<vmem>>, vector<1x128x128xf32>
    %279 = vector.shape_cast %278 : vector<1x128x128xf32> to vector<128x128xf32>
    %cst_197 = arith.constant dense<0.000000e+00> : vector<1x128xf32>
    %280 = tpu.matmul %277, %279, %cst_197 {dimension_numbers = #tpu.dot_dimension_numbers<[1], [0], [0], [1], [0, 0, 1, 1], [], []>} : vector<1x128xf32>, vector<128x128xf32>, vector<1x128xf32> -> vector<1x128xf32>
    %281 = vector.extract_strided_slice %256 {offsets = [6, 0], sizes = [1, 128], strides = [1, 1]} : vector<8x128xf32> to vector<1x128xf32>
    %c6_198 = arith.constant 6 : index
    %c0_199 = arith.constant 0 : index
    %c0_200 = arith.constant 0 : index
    %282 = vector.load %arg2[%c6_198, %c0_199, %c0_200] : memref<8x128x128xf32, #tpu.memory_space<vmem>>, vector<1x128x128xf32>
    %283 = vector.shape_cast %282 : vector<1x128x128xf32> to vector<128x128xf32>
    %cst_201 = arith.constant dense<0.000000e+00> : vector<1x128xf32>
    %284 = tpu.matmul %281, %283, %cst_201 {dimension_numbers = #tpu.dot_dimension_numbers<[1], [0], [0], [1], [0, 0, 1, 1], [], []>} : vector<1x128xf32>, vector<128x128xf32>, vector<1x128xf32> -> vector<1x128xf32>
    %285 = vector.extract_strided_slice %256 {offsets = [7, 0], sizes = [1, 128], strides = [1, 1]} : vector<8x128xf32> to vector<1x128xf32>
    %c7_202 = arith.constant 7 : index
    %c0_203 = arith.constant 0 : index
    %c0_204 = arith.constant 0 : index
    %286 = vector.load %arg2[%c7_202, %c0_203, %c0_204] : memref<8x128x128xf32, #tpu.memory_space<vmem>>, vector<1x128x128xf32>
    %287 = vector.shape_cast %286 : vector<1x128x128xf32> to vector<128x128xf32>
    %cst_205 = arith.constant dense<0.000000e+00> : vector<1x128xf32>
    %288 = tpu.matmul %285, %287, %cst_205 {dimension_numbers = #tpu.dot_dimension_numbers<[1], [0], [0], [1], [0, 0, 1, 1], [], []>} : vector<1x128xf32>, vector<128x128xf32>, vector<1x128xf32> -> vector<1x128xf32>
    %289 = tpu.concatenate %260, %264, %268, %272, %276, %280, %284, %288 in 0 : vector<1x128xf32>, vector<1x128xf32>, vector<1x128xf32>, vector<1x128xf32>, vector<1x128xf32>, vector<1x128xf32>, vector<1x128xf32>, vector<1x128xf32> -> vector<8x128xf32>
    %290 = math.log %289 : vector<8x128xf32>
    %291 = vector.broadcast %253 : vector<8x1xf32> to vector<8x128xf32>
    %292 = arith.addf %290, %291 : vector<8x128xf32>
    %293 = arith.addf %292, %249 : vector<8x128xf32>
    %cst_206 = arith.constant dense<0xFF800000> : vector<8xf32>
    %294 = vector.multi_reduction <maximumf>, %247, %cst_206 [1] : vector<8x128xf32> to vector<8xf32>
    %295 = vector.shape_cast %294 : vector<8xf32> to vector<8x1xf32>
    %cst_207 = arith.constant -1.000000e+30 : f32
    %296 = vector.broadcast %cst_207 : f32 to vector<8x1xf32>
    %297 = arith.maximumf %295, %296 : vector<8x1xf32>
    %298 = vector.broadcast %297 : vector<8x1xf32> to vector<8x128xf32>
    %299 = arith.subf %247, %298 : vector<8x128xf32>
    %300 = math.exp %299 : vector<8x128xf32>
    %c0_208 = arith.constant 0 : index
    %c0_209 = arith.constant 0 : index
    %c0_210 = arith.constant 0 : index
    %301 = vector.load %arg3[%c0_208, %c0_209, %c0_210] : memref<1x128x128xf32, #tpu.memory_space<vmem>>, vector<1x128x128xf32>
    %302 = vector.shape_cast %301 : vector<1x128x128xf32> to vector<128x128xf32>
    %cst_211 = arith.constant dense<0.000000e+00> : vector<8x128xf32>
    %303 = tpu.matmul %300, %302, %cst_211 {dimension_numbers = #tpu.dot_dimension_numbers<[1], [0], [0], [1], [0, 0, 1, 1], [], []>} : vector<8x128xf32>, vector<128x128xf32>, vector<8x128xf32> -> vector<8x128xf32>
    %304 = math.log %303 : vector<8x128xf32>
    %305 = vector.broadcast %297 : vector<8x1xf32> to vector<8x128xf32>
    %306 = arith.addf %304, %305 : vector<8x128xf32>
    %307 = arith.addf %306, %249 : vector<8x128xf32>
    %c5_212 = arith.constant 5 : index
    %c0_213 = arith.constant 0 : index
    %c0_214 = arith.constant 0 : index
    %308 = vector.load %arg8[%c5_212, %c0_213, %c0_214] : memref<8x8x128xf32, #tpu.memory_space<vmem>>, vector<1x8x128xf32>
    %309 = vector.shape_cast %308 : vector<1x8x128xf32> to vector<8x128xf32>
    %cst_215 = arith.constant dense<0xFF800000> : vector<8xf32>
    %310 = vector.multi_reduction <maximumf>, %293, %cst_215 [1] : vector<8x128xf32> to vector<8xf32>
    %311 = vector.shape_cast %310 : vector<8xf32> to vector<8x1xf32>
    %cst_216 = arith.constant -1.000000e+30 : f32
    %312 = vector.broadcast %cst_216 : f32 to vector<8x1xf32>
    %313 = arith.maximumf %311, %312 : vector<8x1xf32>
    %314 = vector.broadcast %313 : vector<8x1xf32> to vector<8x128xf32>
    %315 = arith.subf %293, %314 : vector<8x128xf32>
    %316 = math.exp %315 : vector<8x128xf32>
    %317 = vector.extract_strided_slice %316 {offsets = [0, 0], sizes = [1, 128], strides = [1, 1]} : vector<8x128xf32> to vector<1x128xf32>
    %c0_217 = arith.constant 0 : index
    %c0_218 = arith.constant 0 : index
    %c0_219 = arith.constant 0 : index
    %318 = vector.load %arg2[%c0_217, %c0_218, %c0_219] : memref<8x128x128xf32, #tpu.memory_space<vmem>>, vector<1x128x128xf32>
    %319 = vector.shape_cast %318 : vector<1x128x128xf32> to vector<128x128xf32>
    %cst_220 = arith.constant dense<0.000000e+00> : vector<1x128xf32>
    %320 = tpu.matmul %317, %319, %cst_220 {dimension_numbers = #tpu.dot_dimension_numbers<[1], [0], [0], [1], [0, 0, 1, 1], [], []>} : vector<1x128xf32>, vector<128x128xf32>, vector<1x128xf32> -> vector<1x128xf32>
    %321 = vector.extract_strided_slice %316 {offsets = [1, 0], sizes = [1, 128], strides = [1, 1]} : vector<8x128xf32> to vector<1x128xf32>
    %c1_221 = arith.constant 1 : index
    %c0_222 = arith.constant 0 : index
    %c0_223 = arith.constant 0 : index
    %322 = vector.load %arg2[%c1_221, %c0_222, %c0_223] : memref<8x128x128xf32, #tpu.memory_space<vmem>>, vector<1x128x128xf32>
    %323 = vector.shape_cast %322 : vector<1x128x128xf32> to vector<128x128xf32>
    %cst_224 = arith.constant dense<0.000000e+00> : vector<1x128xf32>
    %324 = tpu.matmul %321, %323, %cst_224 {dimension_numbers = #tpu.dot_dimension_numbers<[1], [0], [0], [1], [0, 0, 1, 1], [], []>} : vector<1x128xf32>, vector<128x128xf32>, vector<1x128xf32> -> vector<1x128xf32>
    %325 = vector.extract_strided_slice %316 {offsets = [2, 0], sizes = [1, 128], strides = [1, 1]} : vector<8x128xf32> to vector<1x128xf32>
    %c2_225 = arith.constant 2 : index
    %c0_226 = arith.constant 0 : index
    %c0_227 = arith.constant 0 : index
    %326 = vector.load %arg2[%c2_225, %c0_226, %c0_227] : memref<8x128x128xf32, #tpu.memory_space<vmem>>, vector<1x128x128xf32>
    %327 = vector.shape_cast %326 : vector<1x128x128xf32> to vector<128x128xf32>
    %cst_228 = arith.constant dense<0.000000e+00> : vector<1x128xf32>
    %328 = tpu.matmul %325, %327, %cst_228 {dimension_numbers = #tpu.dot_dimension_numbers<[1], [0], [0], [1], [0, 0, 1, 1], [], []>} : vector<1x128xf32>, vector<128x128xf32>, vector<1x128xf32> -> vector<1x128xf32>
    %329 = vector.extract_strided_slice %316 {offsets = [3, 0], sizes = [1, 128], strides = [1, 1]} : vector<8x128xf32> to vector<1x128xf32>
    %c3_229 = arith.constant 3 : index
    %c0_230 = arith.constant 0 : index
    %c0_231 = arith.constant 0 : index
    %330 = vector.load %arg2[%c3_229, %c0_230, %c0_231] : memref<8x128x128xf32, #tpu.memory_space<vmem>>, vector<1x128x128xf32>
    %331 = vector.shape_cast %330 : vector<1x128x128xf32> to vector<128x128xf32>
    %cst_232 = arith.constant dense<0.000000e+00> : vector<1x128xf32>
    %332 = tpu.matmul %329, %331, %cst_232 {dimension_numbers = #tpu.dot_dimension_numbers<[1], [0], [0], [1], [0, 0, 1, 1], [], []>} : vector<1x128xf32>, vector<128x128xf32>, vector<1x128xf32> -> vector<1x128xf32>
    %333 = vector.extract_strided_slice %316 {offsets = [4, 0], sizes = [1, 128], strides = [1, 1]} : vector<8x128xf32> to vector<1x128xf32>
    %c4_233 = arith.constant 4 : index
    %c0_234 = arith.constant 0 : index
    %c0_235 = arith.constant 0 : index
    %334 = vector.load %arg2[%c4_233, %c0_234, %c0_235] : memref<8x128x128xf32, #tpu.memory_space<vmem>>, vector<1x128x128xf32>
    %335 = vector.shape_cast %334 : vector<1x128x128xf32> to vector<128x128xf32>
    %cst_236 = arith.constant dense<0.000000e+00> : vector<1x128xf32>
    %336 = tpu.matmul %333, %335, %cst_236 {dimension_numbers = #tpu.dot_dimension_numbers<[1], [0], [0], [1], [0, 0, 1, 1], [], []>} : vector<1x128xf32>, vector<128x128xf32>, vector<1x128xf32> -> vector<1x128xf32>
    %337 = vector.extract_strided_slice %316 {offsets = [5, 0], sizes = [1, 128], strides = [1, 1]} : vector<8x128xf32> to vector<1x128xf32>
    %c5_237 = arith.constant 5 : index
    %c0_238 = arith.constant 0 : index
    %c0_239 = arith.constant 0 : index
    %338 = vector.load %arg2[%c5_237, %c0_238, %c0_239] : memref<8x128x128xf32, #tpu.memory_space<vmem>>, vector<1x128x128xf32>
    %339 = vector.shape_cast %338 : vector<1x128x128xf32> to vector<128x128xf32>
    %cst_240 = arith.constant dense<0.000000e+00> : vector<1x128xf32>
    %340 = tpu.matmul %337, %339, %cst_240 {dimension_numbers = #tpu.dot_dimension_numbers<[1], [0], [0], [1], [0, 0, 1, 1], [], []>} : vector<1x128xf32>, vector<128x128xf32>, vector<1x128xf32> -> vector<1x128xf32>
    %341 = vector.extract_strided_slice %316 {offsets = [6, 0], sizes = [1, 128], strides = [1, 1]} : vector<8x128xf32> to vector<1x128xf32>
    %c6_241 = arith.constant 6 : index
    %c0_242 = arith.constant 0 : index
    %c0_243 = arith.constant 0 : index
    %342 = vector.load %arg2[%c6_241, %c0_242, %c0_243] : memref<8x128x128xf32, #tpu.memory_space<vmem>>, vector<1x128x128xf32>
    %343 = vector.shape_cast %342 : vector<1x128x128xf32> to vector<128x128xf32>
    %cst_244 = arith.constant dense<0.000000e+00> : vector<1x128xf32>
    %344 = tpu.matmul %341, %343, %cst_244 {dimension_numbers = #tpu.dot_dimension_numbers<[1], [0], [0], [1], [0, 0, 1, 1], [], []>} : vector<1x128xf32>, vector<128x128xf32>, vector<1x128xf32> -> vector<1x128xf32>
    %345 = vector.extract_strided_slice %316 {offsets = [7, 0], sizes = [1, 128], strides = [1, 1]} : vector<8x128xf32> to vector<1x128xf32>
    %c7_245 = arith.constant 7 : index
    %c0_246 = arith.constant 0 : index
    %c0_247 = arith.constant 0 : index
    %346 = vector.load %arg2[%c7_245, %c0_246, %c0_247] : memref<8x128x128xf32, #tpu.memory_space<vmem>>, vector<1x128x128xf32>
    %347 = vector.shape_cast %346 : vector<1x128x128xf32> to vector<128x128xf32>
    %cst_248 = arith.constant dense<0.000000e+00> : vector<1x128xf32>
    %348 = tpu.matmul %345, %347, %cst_248 {dimension_numbers = #tpu.dot_dimension_numbers<[1], [0], [0], [1], [0, 0, 1, 1], [], []>} : vector<1x128xf32>, vector<128x128xf32>, vector<1x128xf32> -> vector<1x128xf32>
    %349 = tpu.concatenate %320, %324, %328, %332, %336, %340, %344, %348 in 0 : vector<1x128xf32>, vector<1x128xf32>, vector<1x128xf32>, vector<1x128xf32>, vector<1x128xf32>, vector<1x128xf32>, vector<1x128xf32>, vector<1x128xf32> -> vector<8x128xf32>
    %350 = math.log %349 : vector<8x128xf32>
    %351 = vector.broadcast %313 : vector<8x1xf32> to vector<8x128xf32>
    %352 = arith.addf %350, %351 : vector<8x128xf32>
    %353 = arith.addf %352, %309 : vector<8x128xf32>
    %cst_249 = arith.constant dense<0xFF800000> : vector<8xf32>
    %354 = vector.multi_reduction <maximumf>, %307, %cst_249 [1] : vector<8x128xf32> to vector<8xf32>
    %355 = vector.shape_cast %354 : vector<8xf32> to vector<8x1xf32>
    %cst_250 = arith.constant -1.000000e+30 : f32
    %356 = vector.broadcast %cst_250 : f32 to vector<8x1xf32>
    %357 = arith.maximumf %355, %356 : vector<8x1xf32>
    %358 = vector.broadcast %357 : vector<8x1xf32> to vector<8x128xf32>
    %359 = arith.subf %307, %358 : vector<8x128xf32>
    %360 = math.exp %359 : vector<8x128xf32>
    %c0_251 = arith.constant 0 : index
    %c0_252 = arith.constant 0 : index
    %c0_253 = arith.constant 0 : index
    %361 = vector.load %arg3[%c0_251, %c0_252, %c0_253] : memref<1x128x128xf32, #tpu.memory_space<vmem>>, vector<1x128x128xf32>
    %362 = vector.shape_cast %361 : vector<1x128x128xf32> to vector<128x128xf32>
    %cst_254 = arith.constant dense<0.000000e+00> : vector<8x128xf32>
    %363 = tpu.matmul %360, %362, %cst_254 {dimension_numbers = #tpu.dot_dimension_numbers<[1], [0], [0], [1], [0, 0, 1, 1], [], []>} : vector<8x128xf32>, vector<128x128xf32>, vector<8x128xf32> -> vector<8x128xf32>
    %364 = math.log %363 : vector<8x128xf32>
    %365 = vector.broadcast %357 : vector<8x1xf32> to vector<8x128xf32>
    %366 = arith.addf %364, %365 : vector<8x128xf32>
    %367 = arith.addf %366, %309 : vector<8x128xf32>
    %c6_255 = arith.constant 6 : index
    %c0_256 = arith.constant 0 : index
    %c0_257 = arith.constant 0 : index
    %368 = vector.load %arg8[%c6_255, %c0_256, %c0_257] : memref<8x8x128xf32, #tpu.memory_space<vmem>>, vector<1x8x128xf32>
    %369 = vector.shape_cast %368 : vector<1x8x128xf32> to vector<8x128xf32>
    %cst_258 = arith.constant dense<0xFF800000> : vector<8xf32>
    %370 = vector.multi_reduction <maximumf>, %353, %cst_258 [1] : vector<8x128xf32> to vector<8xf32>
    %371 = vector.shape_cast %370 : vector<8xf32> to vector<8x1xf32>
    %cst_259 = arith.constant -1.000000e+30 : f32
    %372 = vector.broadcast %cst_259 : f32 to vector<8x1xf32>
    %373 = arith.maximumf %371, %372 : vector<8x1xf32>
    %374 = vector.broadcast %373 : vector<8x1xf32> to vector<8x128xf32>
    %375 = arith.subf %353, %374 : vector<8x128xf32>
    %376 = math.exp %375 : vector<8x128xf32>
    %377 = vector.extract_strided_slice %376 {offsets = [0, 0], sizes = [1, 128], strides = [1, 1]} : vector<8x128xf32> to vector<1x128xf32>
    %c0_260 = arith.constant 0 : index
    %c0_261 = arith.constant 0 : index
    %c0_262 = arith.constant 0 : index
    %378 = vector.load %arg2[%c0_260, %c0_261, %c0_262] : memref<8x128x128xf32, #tpu.memory_space<vmem>>, vector<1x128x128xf32>
    %379 = vector.shape_cast %378 : vector<1x128x128xf32> to vector<128x128xf32>
    %cst_263 = arith.constant dense<0.000000e+00> : vector<1x128xf32>
    %380 = tpu.matmul %377, %379, %cst_263 {dimension_numbers = #tpu.dot_dimension_numbers<[1], [0], [0], [1], [0, 0, 1, 1], [], []>} : vector<1x128xf32>, vector<128x128xf32>, vector<1x128xf32> -> vector<1x128xf32>
    %381 = vector.extract_strided_slice %376 {offsets = [1, 0], sizes = [1, 128], strides = [1, 1]} : vector<8x128xf32> to vector<1x128xf32>
    %c1_264 = arith.constant 1 : index
    %c0_265 = arith.constant 0 : index
    %c0_266 = arith.constant 0 : index
    %382 = vector.load %arg2[%c1_264, %c0_265, %c0_266] : memref<8x128x128xf32, #tpu.memory_space<vmem>>, vector<1x128x128xf32>
    %383 = vector.shape_cast %382 : vector<1x128x128xf32> to vector<128x128xf32>
    %cst_267 = arith.constant dense<0.000000e+00> : vector<1x128xf32>
    %384 = tpu.matmul %381, %383, %cst_267 {dimension_numbers = #tpu.dot_dimension_numbers<[1], [0], [0], [1], [0, 0, 1, 1], [], []>} : vector<1x128xf32>, vector<128x128xf32>, vector<1x128xf32> -> vector<1x128xf32>
    %385 = vector.extract_strided_slice %376 {offsets = [2, 0], sizes = [1, 128], strides = [1, 1]} : vector<8x128xf32> to vector<1x128xf32>
    %c2_268 = arith.constant 2 : index
    %c0_269 = arith.constant 0 : index
    %c0_270 = arith.constant 0 : index
    %386 = vector.load %arg2[%c2_268, %c0_269, %c0_270] : memref<8x128x128xf32, #tpu.memory_space<vmem>>, vector<1x128x128xf32>
    %387 = vector.shape_cast %386 : vector<1x128x128xf32> to vector<128x128xf32>
    %cst_271 = arith.constant dense<0.000000e+00> : vector<1x128xf32>
    %388 = tpu.matmul %385, %387, %cst_271 {dimension_numbers = #tpu.dot_dimension_numbers<[1], [0], [0], [1], [0, 0, 1, 1], [], []>} : vector<1x128xf32>, vector<128x128xf32>, vector<1x128xf32> -> vector<1x128xf32>
    %389 = vector.extract_strided_slice %376 {offsets = [3, 0], sizes = [1, 128], strides = [1, 1]} : vector<8x128xf32> to vector<1x128xf32>
    %c3_272 = arith.constant 3 : index
    %c0_273 = arith.constant 0 : index
    %c0_274 = arith.constant 0 : index
    %390 = vector.load %arg2[%c3_272, %c0_273, %c0_274] : memref<8x128x128xf32, #tpu.memory_space<vmem>>, vector<1x128x128xf32>
    %391 = vector.shape_cast %390 : vector<1x128x128xf32> to vector<128x128xf32>
    %cst_275 = arith.constant dense<0.000000e+00> : vector<1x128xf32>
    %392 = tpu.matmul %389, %391, %cst_275 {dimension_numbers = #tpu.dot_dimension_numbers<[1], [0], [0], [1], [0, 0, 1, 1], [], []>} : vector<1x128xf32>, vector<128x128xf32>, vector<1x128xf32> -> vector<1x128xf32>
    %393 = vector.extract_strided_slice %376 {offsets = [4, 0], sizes = [1, 128], strides = [1, 1]} : vector<8x128xf32> to vector<1x128xf32>
    %c4_276 = arith.constant 4 : index
    %c0_277 = arith.constant 0 : index
    %c0_278 = arith.constant 0 : index
    %394 = vector.load %arg2[%c4_276, %c0_277, %c0_278] : memref<8x128x128xf32, #tpu.memory_space<vmem>>, vector<1x128x128xf32>
    %395 = vector.shape_cast %394 : vector<1x128x128xf32> to vector<128x128xf32>
    %cst_279 = arith.constant dense<0.000000e+00> : vector<1x128xf32>
    %396 = tpu.matmul %393, %395, %cst_279 {dimension_numbers = #tpu.dot_dimension_numbers<[1], [0], [0], [1], [0, 0, 1, 1], [], []>} : vector<1x128xf32>, vector<128x128xf32>, vector<1x128xf32> -> vector<1x128xf32>
    %397 = vector.extract_strided_slice %376 {offsets = [5, 0], sizes = [1, 128], strides = [1, 1]} : vector<8x128xf32> to vector<1x128xf32>
    %c5_280 = arith.constant 5 : index
    %c0_281 = arith.constant 0 : index
    %c0_282 = arith.constant 0 : index
    %398 = vector.load %arg2[%c5_280, %c0_281, %c0_282] : memref<8x128x128xf32, #tpu.memory_space<vmem>>, vector<1x128x128xf32>
    %399 = vector.shape_cast %398 : vector<1x128x128xf32> to vector<128x128xf32>
    %cst_283 = arith.constant dense<0.000000e+00> : vector<1x128xf32>
    %400 = tpu.matmul %397, %399, %cst_283 {dimension_numbers = #tpu.dot_dimension_numbers<[1], [0], [0], [1], [0, 0, 1, 1], [], []>} : vector<1x128xf32>, vector<128x128xf32>, vector<1x128xf32> -> vector<1x128xf32>
    %401 = vector.extract_strided_slice %376 {offsets = [6, 0], sizes = [1, 128], strides = [1, 1]} : vector<8x128xf32> to vector<1x128xf32>
    %c6_284 = arith.constant 6 : index
    %c0_285 = arith.constant 0 : index
    %c0_286 = arith.constant 0 : index
    %402 = vector.load %arg2[%c6_284, %c0_285, %c0_286] : memref<8x128x128xf32, #tpu.memory_space<vmem>>, vector<1x128x128xf32>
    %403 = vector.shape_cast %402 : vector<1x128x128xf32> to vector<128x128xf32>
    %cst_287 = arith.constant dense<0.000000e+00> : vector<1x128xf32>
    %404 = tpu.matmul %401, %403, %cst_287 {dimension_numbers = #tpu.dot_dimension_numbers<[1], [0], [0], [1], [0, 0, 1, 1], [], []>} : vector<1x128xf32>, vector<128x128xf32>, vector<1x128xf32> -> vector<1x128xf32>
    %405 = vector.extract_strided_slice %376 {offsets = [7, 0], sizes = [1, 128], strides = [1, 1]} : vector<8x128xf32> to vector<1x128xf32>
    %c7_288 = arith.constant 7 : index
    %c0_289 = arith.constant 0 : index
    %c0_290 = arith.constant 0 : index
    %406 = vector.load %arg2[%c7_288, %c0_289, %c0_290] : memref<8x128x128xf32, #tpu.memory_space<vmem>>, vector<1x128x128xf32>
    %407 = vector.shape_cast %406 : vector<1x128x128xf32> to vector<128x128xf32>
    %cst_291 = arith.constant dense<0.000000e+00> : vector<1x128xf32>
    %408 = tpu.matmul %405, %407, %cst_291 {dimension_numbers = #tpu.dot_dimension_numbers<[1], [0], [0], [1], [0, 0, 1, 1], [], []>} : vector<1x128xf32>, vector<128x128xf32>, vector<1x128xf32> -> vector<1x128xf32>
    %409 = tpu.concatenate %380, %384, %388, %392, %396, %400, %404, %408 in 0 : vector<1x128xf32>, vector<1x128xf32>, vector<1x128xf32>, vector<1x128xf32>, vector<1x128xf32>, vector<1x128xf32>, vector<1x128xf32>, vector<1x128xf32> -> vector<8x128xf32>
    %410 = math.log %409 : vector<8x128xf32>
    %411 = vector.broadcast %373 : vector<8x1xf32> to vector<8x128xf32>
    %412 = arith.addf %410, %411 : vector<8x128xf32>
    %413 = arith.addf %412, %369 : vector<8x128xf32>
    %cst_292 = arith.constant dense<0xFF800000> : vector<8xf32>
    %414 = vector.multi_reduction <maximumf>, %367, %cst_292 [1] : vector<8x128xf32> to vector<8xf32>
    %415 = vector.shape_cast %414 : vector<8xf32> to vector<8x1xf32>
    %cst_293 = arith.constant -1.000000e+30 : f32
    %416 = vector.broadcast %cst_293 : f32 to vector<8x1xf32>
    %417 = arith.maximumf %415, %416 : vector<8x1xf32>
    %418 = vector.broadcast %417 : vector<8x1xf32> to vector<8x128xf32>
    %419 = arith.subf %367, %418 : vector<8x128xf32>
    %420 = math.exp %419 : vector<8x128xf32>
    %c0_294 = arith.constant 0 : index
    %c0_295 = arith.constant 0 : index
    %c0_296 = arith.constant 0 : index
    %421 = vector.load %arg3[%c0_294, %c0_295, %c0_296] : memref<1x128x128xf32, #tpu.memory_space<vmem>>, vector<1x128x128xf32>
    %422 = vector.shape_cast %421 : vector<1x128x128xf32> to vector<128x128xf32>
    %cst_297 = arith.constant dense<0.000000e+00> : vector<8x128xf32>
    %423 = tpu.matmul %420, %422, %cst_297 {dimension_numbers = #tpu.dot_dimension_numbers<[1], [0], [0], [1], [0, 0, 1, 1], [], []>} : vector<8x128xf32>, vector<128x128xf32>, vector<8x128xf32> -> vector<8x128xf32>
    %424 = math.log %423 : vector<8x128xf32>
    %425 = vector.broadcast %417 : vector<8x1xf32> to vector<8x128xf32>
    %426 = arith.addf %424, %425 : vector<8x128xf32>
    %427 = arith.addf %426, %369 : vector<8x128xf32>
    %c7_298 = arith.constant 7 : index
    %c0_299 = arith.constant 0 : index
    %c0_300 = arith.constant 0 : index
    %428 = vector.load %arg8[%c7_298, %c0_299, %c0_300] : memref<8x8x128xf32, #tpu.memory_space<vmem>>, vector<1x8x128xf32>
    %429 = vector.shape_cast %428 : vector<1x8x128xf32> to vector<8x128xf32>
    %cst_301 = arith.constant dense<0xFF800000> : vector<8xf32>
    %430 = vector.multi_reduction <maximumf>, %413, %cst_301 [1] : vector<8x128xf32> to vector<8xf32>
    %431 = vector.shape_cast %430 : vector<8xf32> to vector<8x1xf32>
    %cst_302 = arith.constant -1.000000e+30 : f32
    %432 = vector.broadcast %cst_302 : f32 to vector<8x1xf32>
    %433 = arith.maximumf %431, %432 : vector<8x1xf32>
    %434 = vector.broadcast %433 : vector<8x1xf32> to vector<8x128xf32>
    %435 = arith.subf %413, %434 : vector<8x128xf32>
    %436 = math.exp %435 : vector<8x128xf32>
    %437 = vector.extract_strided_slice %436 {offsets = [0, 0], sizes = [1, 128], strides = [1, 1]} : vector<8x128xf32> to vector<1x128xf32>
    %c0_303 = arith.constant 0 : index
    %c0_304 = arith.constant 0 : index
    %c0_305 = arith.constant 0 : index
    %438 = vector.load %arg2[%c0_303, %c0_304, %c0_305] : memref<8x128x128xf32, #tpu.memory_space<vmem>>, vector<1x128x128xf32>
    %439 = vector.shape_cast %438 : vector<1x128x128xf32> to vector<128x128xf32>
    %cst_306 = arith.constant dense<0.000000e+00> : vector<1x128xf32>
    %440 = tpu.matmul %437, %439, %cst_306 {dimension_numbers = #tpu.dot_dimension_numbers<[1], [0], [0], [1], [0, 0, 1, 1], [], []>} : vector<1x128xf32>, vector<128x128xf32>, vector<1x128xf32> -> vector<1x128xf32>
    %441 = vector.extract_strided_slice %436 {offsets = [1, 0], sizes = [1, 128], strides = [1, 1]} : vector<8x128xf32> to vector<1x128xf32>
    %c1_307 = arith.constant 1 : index
    %c0_308 = arith.constant 0 : index
    %c0_309 = arith.constant 0 : index
    %442 = vector.load %arg2[%c1_307, %c0_308, %c0_309] : memref<8x128x128xf32, #tpu.memory_space<vmem>>, vector<1x128x128xf32>
    %443 = vector.shape_cast %442 : vector<1x128x128xf32> to vector<128x128xf32>
    %cst_310 = arith.constant dense<0.000000e+00> : vector<1x128xf32>
    %444 = tpu.matmul %441, %443, %cst_310 {dimension_numbers = #tpu.dot_dimension_numbers<[1], [0], [0], [1], [0, 0, 1, 1], [], []>} : vector<1x128xf32>, vector<128x128xf32>, vector<1x128xf32> -> vector<1x128xf32>
    %445 = vector.extract_strided_slice %436 {offsets = [2, 0], sizes = [1, 128], strides = [1, 1]} : vector<8x128xf32> to vector<1x128xf32>
    %c2_311 = arith.constant 2 : index
    %c0_312 = arith.constant 0 : index
    %c0_313 = arith.constant 0 : index
    %446 = vector.load %arg2[%c2_311, %c0_312, %c0_313] : memref<8x128x128xf32, #tpu.memory_space<vmem>>, vector<1x128x128xf32>
    %447 = vector.shape_cast %446 : vector<1x128x128xf32> to vector<128x128xf32>
    %cst_314 = arith.constant dense<0.000000e+00> : vector<1x128xf32>
    %448 = tpu.matmul %445, %447, %cst_314 {dimension_numbers = #tpu.dot_dimension_numbers<[1], [0], [0], [1], [0, 0, 1, 1], [], []>} : vector<1x128xf32>, vector<128x128xf32>, vector<1x128xf32> -> vector<1x128xf32>
    %449 = vector.extract_strided_slice %436 {offsets = [3, 0], sizes = [1, 128], strides = [1, 1]} : vector<8x128xf32> to vector<1x128xf32>
    %c3_315 = arith.constant 3 : index
    %c0_316 = arith.constant 0 : index
    %c0_317 = arith.constant 0 : index
    %450 = vector.load %arg2[%c3_315, %c0_316, %c0_317] : memref<8x128x128xf32, #tpu.memory_space<vmem>>, vector<1x128x128xf32>
    %451 = vector.shape_cast %450 : vector<1x128x128xf32> to vector<128x128xf32>
    %cst_318 = arith.constant dense<0.000000e+00> : vector<1x128xf32>
    %452 = tpu.matmul %449, %451, %cst_318 {dimension_numbers = #tpu.dot_dimension_numbers<[1], [0], [0], [1], [0, 0, 1, 1], [], []>} : vector<1x128xf32>, vector<128x128xf32>, vector<1x128xf32> -> vector<1x128xf32>
    %453 = vector.extract_strided_slice %436 {offsets = [4, 0], sizes = [1, 128], strides = [1, 1]} : vector<8x128xf32> to vector<1x128xf32>
    %c4_319 = arith.constant 4 : index
    %c0_320 = arith.constant 0 : index
    %c0_321 = arith.constant 0 : index
    %454 = vector.load %arg2[%c4_319, %c0_320, %c0_321] : memref<8x128x128xf32, #tpu.memory_space<vmem>>, vector<1x128x128xf32>
    %455 = vector.shape_cast %454 : vector<1x128x128xf32> to vector<128x128xf32>
    %cst_322 = arith.constant dense<0.000000e+00> : vector<1x128xf32>
    %456 = tpu.matmul %453, %455, %cst_322 {dimension_numbers = #tpu.dot_dimension_numbers<[1], [0], [0], [1], [0, 0, 1, 1], [], []>} : vector<1x128xf32>, vector<128x128xf32>, vector<1x128xf32> -> vector<1x128xf32>
    %457 = vector.extract_strided_slice %436 {offsets = [5, 0], sizes = [1, 128], strides = [1, 1]} : vector<8x128xf32> to vector<1x128xf32>
    %c5_323 = arith.constant 5 : index
    %c0_324 = arith.constant 0 : index
    %c0_325 = arith.constant 0 : index
    %458 = vector.load %arg2[%c5_323, %c0_324, %c0_325] : memref<8x128x128xf32, #tpu.memory_space<vmem>>, vector<1x128x128xf32>
    %459 = vector.shape_cast %458 : vector<1x128x128xf32> to vector<128x128xf32>
    %cst_326 = arith.constant dense<0.000000e+00> : vector<1x128xf32>
    %460 = tpu.matmul %457, %459, %cst_326 {dimension_numbers = #tpu.dot_dimension_numbers<[1], [0], [0], [1], [0, 0, 1, 1], [], []>} : vector<1x128xf32>, vector<128x128xf32>, vector<1x128xf32> -> vector<1x128xf32>
    %461 = vector.extract_strided_slice %436 {offsets = [6, 0], sizes = [1, 128], strides = [1, 1]} : vector<8x128xf32> to vector<1x128xf32>
    %c6_327 = arith.constant 6 : index
    %c0_328 = arith.constant 0 : index
    %c0_329 = arith.constant 0 : index
    %462 = vector.load %arg2[%c6_327, %c0_328, %c0_329] : memref<8x128x128xf32, #tpu.memory_space<vmem>>, vector<1x128x128xf32>
    %463 = vector.shape_cast %462 : vector<1x128x128xf32> to vector<128x128xf32>
    %cst_330 = arith.constant dense<0.000000e+00> : vector<1x128xf32>
    %464 = tpu.matmul %461, %463, %cst_330 {dimension_numbers = #tpu.dot_dimension_numbers<[1], [0], [0], [1], [0, 0, 1, 1], [], []>} : vector<1x128xf32>, vector<128x128xf32>, vector<1x128xf32> -> vector<1x128xf32>
    %465 = vector.extract_strided_slice %436 {offsets = [7, 0], sizes = [1, 128], strides = [1, 1]} : vector<8x128xf32> to vector<1x128xf32>
    %c7_331 = arith.constant 7 : index
    %c0_332 = arith.constant 0 : index
    %c0_333 = arith.constant 0 : index
    %466 = vector.load %arg2[%c7_331, %c0_332, %c0_333] : memref<8x128x128xf32, #tpu.memory_space<vmem>>, vector<1x128x128xf32>
    %467 = vector.shape_cast %466 : vector<1x128x128xf32> to vector<128x128xf32>
    %cst_334 = arith.constant dense<0.000000e+00> : vector<1x128xf32>
    %468 = tpu.matmul %465, %467, %cst_334 {dimension_numbers = #tpu.dot_dimension_numbers<[1], [0], [0], [1], [0, 0, 1, 1], [], []>} : vector<1x128xf32>, vector<128x128xf32>, vector<1x128xf32> -> vector<1x128xf32>
    %469 = tpu.concatenate %440, %444, %448, %452, %456, %460, %464, %468 in 0 : vector<1x128xf32>, vector<1x128xf32>, vector<1x128xf32>, vector<1x128xf32>, vector<1x128xf32>, vector<1x128xf32>, vector<1x128xf32>, vector<1x128xf32> -> vector<8x128xf32>
    %470 = math.log %469 : vector<8x128xf32>
    %471 = vector.broadcast %433 : vector<8x1xf32> to vector<8x128xf32>
    %472 = arith.addf %470, %471 : vector<8x128xf32>
    %473 = arith.addf %472, %429 : vector<8x128xf32>
    %cst_335 = arith.constant dense<0xFF800000> : vector<8xf32>
    %474 = vector.multi_reduction <maximumf>, %427, %cst_335 [1] : vector<8x128xf32> to vector<8xf32>
    %475 = vector.shape_cast %474 : vector<8xf32> to vector<8x1xf32>
    %cst_336 = arith.constant -1.000000e+30 : f32
    %476 = vector.broadcast %cst_336 : f32 to vector<8x1xf32>
    %477 = arith.maximumf %475, %476 : vector<8x1xf32>
    %478 = vector.broadcast %477 : vector<8x1xf32> to vector<8x128xf32>
    %479 = arith.subf %427, %478 : vector<8x128xf32>
    %480 = math.exp %479 : vector<8x128xf32>
    %c0_337 = arith.constant 0 : index
    %c0_338 = arith.constant 0 : index
    %c0_339 = arith.constant 0 : index
    %481 = vector.load %arg3[%c0_337, %c0_338, %c0_339] : memref<1x128x128xf32, #tpu.memory_space<vmem>>, vector<1x128x128xf32>
    %482 = vector.shape_cast %481 : vector<1x128x128xf32> to vector<128x128xf32>
    %cst_340 = arith.constant dense<0.000000e+00> : vector<8x128xf32>
    %483 = tpu.matmul %480, %482, %cst_340 {dimension_numbers = #tpu.dot_dimension_numbers<[1], [0], [0], [1], [0, 0, 1, 1], [], []>} : vector<8x128xf32>, vector<128x128xf32>, vector<8x128xf32> -> vector<8x128xf32>
    %484 = math.log %483 : vector<8x128xf32>
    %485 = vector.broadcast %477 : vector<8x1xf32> to vector<8x128xf32>
    %486 = arith.addf %484, %485 : vector<8x128xf32>
    %487 = arith.addf %486, %429 : vector<8x128xf32>
    %c0_341 = arith.constant 0 : index
    %c0_342 = arith.constant 0 : index
    %488 = vector.load %arg10[%c0_341, %c0_342] : memref<8x128xf32, #tpu.memory_space<vmem>>, vector<8x128xf32>
    tpu.vector_store %arg10[%c0_341, %c0_342], %473 {strides = array<i32>} : memref<8x128xf32, #tpu.memory_space<vmem>>, vector<8x128xf32>,
    %c0_343 = arith.constant 0 : index
    %c0_344 = arith.constant 0 : index
    %489 = vector.load %arg11[%c0_343, %c0_344] : memref<8x128xf32, #tpu.memory_space<vmem>>, vector<8x128xf32>
    tpu.vector_store %arg11[%c0_343, %c0_344], %487 {strides = array<i32>} : memref<8x128xf32, #tpu.memory_space<vmem>>, vector<8x128xf32>,
    %c2_i32 = arith.constant 2 : i32
    %490 = arith.cmpi eq, %arg1, %c2_i32 : i32
    %491 = arith.extui %490 : i1 to i32
    %c0_i32_345 = arith.constant 0 : i32
    %492 = arith.cmpi ne, %491, %c0_i32_345 : i32
    scf.if %492 {
      %c0_346 = arith.constant 0 : index
      %c0_347 = arith.constant 0 : index
      %493 = vector.load %arg5[%c0_346, %c0_347] : memref<8x128xf32, #tpu.memory_space<vmem>>, vector<8x128xf32>
      %494 = arith.addf %473, %493 : vector<8x128xf32>
      %cst_348 = arith.constant dense<0xFF800000> : vector<8xf32>
      %495 = vector.multi_reduction <maximumf>, %494, %cst_348 [1] : vector<8x128xf32> to vector<8xf32>
      %496 = vector.shape_cast %495 : vector<8xf32> to vector<8x1xf32>
      %cst_349 = arith.constant -1.000000e+30 : f32
      %497 = vector.broadcast %cst_349 : f32 to vector<8x1xf32>
      %498 = arith.maximumf %496, %497 : vector<8x1xf32>
      %499 = vector.broadcast %498 : vector<8x1xf32> to vector<8x128xf32>
      %500 = arith.subf %494, %499 : vector<8x128xf32>
      %501 = math.exp %500 : vector<8x128xf32>
      %cst_350 = arith.constant dense<0.000000e+00> : vector<8xf32>
      %502 = vector.multi_reduction <add>, %501, %cst_350 [1] : vector<8x128xf32> to vector<8xf32>
      %503 = vector.shape_cast %502 : vector<8xf32> to vector<8x1xf32>
      %504 = math.log %503 : vector<8x1xf32>
      %505 = arith.addf %504, %498 : vector<8x1xf32>
      %c0_351 = arith.constant 0 : index
      %c0_352 = arith.constant 0 : index
      %506 = vector.load %arg7[%c0_351, %c0_352] : memref<1x128xf32, #tpu.memory_space<vmem>>, vector<1x128xf32>
      %507 = vector.broadcast %506 : vector<1x128xf32> to vector<8x128xf32>
      %508 = arith.addf %487, %507 : vector<8x128xf32>
      %cst_353 = arith.constant dense<0xFF800000> : vector<8xf32>
      %509 = vector.multi_reduction <maximumf>, %508, %cst_353 [1] : vector<8x128xf32> to vector<8xf32>
      %510 = vector.shape_cast %509 : vector<8xf32> to vector<8x1xf32>
      %cst_354 = arith.constant -1.000000e+30 : f32
      %511 = vector.broadcast %cst_354 : f32 to vector<8x1xf32>
      %512 = arith.maximumf %510, %511 : vector<8x1xf32>
      %513 = vector.broadcast %512 : vector<8x1xf32> to vector<8x128xf32>
      %514 = arith.subf %508, %513 : vector<8x128xf32>
      %515 = math.exp %514 : vector<8x128xf32>
      %cst_355 = arith.constant dense<0.000000e+00> : vector<8xf32>
      %516 = vector.multi_reduction <add>, %515, %cst_355 [1] : vector<8x128xf32> to vector<8xf32>
      %517 = vector.shape_cast %516 : vector<8xf32> to vector<8x1xf32>
      %518 = math.log %517 : vector<8x1xf32>
      %519 = arith.addf %518, %512 : vector<8x1xf32>
      %cst_356 = arith.constant 1.000000e+00 : f32
      %520 = vector.broadcast %cst_356 : f32 to vector<8x1xf32>
      %521 = arith.mulf %520, %519 : vector<8x1xf32>
      %522 = arith.subf %505, %521 : vector<8x1xf32>
      %523 = vector.shape_cast %522 : vector<8x1xf32> to vector<8x1xf32>
      %524 = vector.broadcast %523 : vector<8x1xf32> to vector<8x128xf32>
      %c0_357 = arith.constant 0 : index
      %c0_358 = arith.constant 0 : index
      %525 = vector.load %arg9[%c0_357, %c0_358] : memref<8x128xf32, #tpu.memory_space<vmem>>, vector<8x128xf32>
      tpu.vector_store %arg9[%c0_357, %c0_358], %524 {strides = array<i32>} : memref<8x128xf32, #tpu.memory_space<vmem>>, vector<8x128xf32>,
    } else {
    }
    return
  }
  func.func @transform_0(%arg0: i32, %arg1: i32) -> (i32, i32, i32) {
    %c0_i32 = arith.constant 0 : i32
    %c0_i32_0 = arith.constant 0 : i32
    %c0_i32_1 = arith.constant 0 : i32
    return %arg0, %c0_i32, %c0_i32_0 : i32, i32, i32
  }
  func.func @transform_1(%arg0: i32, %arg1: i32) -> (i32, i32, i32) {
    %c0_i32 = arith.constant 0 : i32
    %c0_i32_0 = arith.constant 0 : i32
    %c0_i32_1 = arith.constant 0 : i32
    %c0_i32_2 = arith.constant 0 : i32
    return %c0_i32, %c0_i32_0, %c0_i32_1 : i32, i32, i32
  }
  func.func @transform_2(%arg0: i32, %arg1: i32) -> (i32, i32) {
    %c0_i32 = arith.constant 0 : i32
    %c0_i32_0 = arith.constant 0 : i32
    return %arg0, %c0_i32 : i32, i32
  }
  func.func @transform_3(%arg0: i32, %arg1: i32) -> (i32, i32) {
    %c0_i32 = arith.constant 0 : i32
    %c0_i32_0 = arith.constant 0 : i32
    return %arg0, %c0_i32 : i32, i32
  }
  func.func @transform_4(%arg0: i32, %arg1: i32) -> (i32, i32) {
    %c0_i32 = arith.constant 0 : i32
    %c0_i32_0 = arith.constant 0 : i32
    %c0_i32_1 = arith.constant 0 : i32
    return %c0_i32, %c0_i32_0 : i32, i32
  }
  func.func @transform_5(%arg0: i32, %arg1: i32) -> (i32, i32) {
    %c0_i32 = arith.constant 0 : i32
    %c0_i32_0 = arith.constant 0 : i32
    %c0_i32_1 = arith.constant 0 : i32
    return %c0_i32, %c0_i32_0 : i32, i32
  }
  func.func @transform_6(%arg0: i32, %arg1: i32) -> (i32, i32, i32) {
    %c0_i32 = arith.constant 0 : i32
    %c0_i32_0 = arith.constant 0 : i32
    return %arg1, %arg0, %c0_i32 : i32, i32, i32
  }
  func.func @transform_7(%arg0: i32, %arg1: i32) -> (i32, i32) {
    %c0_i32 = arith.constant 0 : i32
    %c0_i32_0 = arith.constant 0 : i32
    return %arg0, %c0_i32 : i32, i32
  }
}

</mosaic_0001>

<bundles_post_ra>
// kernel: lfmmi_loss.1
= control target key start
LH: loop header
LB: loop body
LE: loop exit
PB: predicated region body
PF: predicated region fallthrough
CT: control target
= control target key end

     0   :  { %s14183_s0 = inlined_call_operand.vmem [shape: f32[16,128,128], index: 0, kind: input, shape index: {}]   ;;  %s14184_s1 = inlined_call_operand.vmem [shape: f32[1,128,128], index: 1, kind: input, shape index: {}]   ;;  %s14185_s2 = inlined_call_operand.vmem [shape: f32[16,128], index: 2, kind: input, shape index: {}]   ;;  %s14186_s3 = inlined_call_operand.vmem [shape: f32[16,128], index: 3, kind: input, shape index: {}]   ;;  %s14187_s4 = inlined_call_operand.vmem [shape: f32[1,128], index: 4, kind: input, shape index: {}]   ;;  %s14188_s5 = inlined_call_operand.vmem [shape: f32[1,128], index: 5, kind: input, shape index: {}]   ;;  %s14189_s6 = inlined_call_operand.vmem [shape: f32[24,16,128], index: 6, kind: input, shape index: {}]   ;;  %s14190_s7 = inlined_call_operand.vmem [shape: f32[16,128], index: 7, kind: output, shape index: {}]  }
   0x1   :  { %14295 = sst [smem:[#allocation48_spill]] %s14189_s6 }
   0x2   :  { %s12150_s24 = smov 0   ;;  %s12152_s25 = smov 0  }
   0x3   :  { %s12154_s26 = smov 0   ;;  %s12156_s27 = smov 0  }
   0x4   :  { %s12158_s28 = smov 0   ;;  %s12160_s29 = smov 0  }
   0x5   :  { %s12162_s30 = smov 0  }
   0x6 LB: > { %s26_s8 = sadd.s32 1, %s12097_s28  ;;  %s29_s9 = sadd.s32 1, %s12101_s29  ;;  %s12105_s30 = sphi %s12162_s30, %s17_s30   ;;  %s12101_s29 = sphi %s12160_s29, %s14560_s29   ;;  %s12097_s28 = sphi %s12158_s28, %s14559_s28   ;;  %s12093_s27 = sphi %s12156_s27, %s14558_s27   ;;  %s12089_s26 = sphi %s12154_s26, %s14557_s26   ;;  %s12085_s25 = sphi %s12152_s25, %s14556_s25   ;;  %s12081_s24 = sphi %s12150_s24, %s14555_s24  }
   0x7   : > { %p27_p0 = scmp.ge.s32.totalorder %s26_s8, 3  ;;  %p186_p1 = scmp.ne.s32.totalorder %s12085_s25, %s12081_s24 }
   0x8   : > { %p187_p2 = scmp.eq.s32.totalorder %s12105_s30, 0  ;;  %s179_s13 = sadd.s32 1, %s12085_s25 }
   0x9   : > { %s14562_s8 = smov (%p27_p0, %s26_s8), 0  ;;  %s14564_s9 = smov (!%p27_p0, %s29_s9), %s12101_s29 }
   0xa   : > { %p188_p3 = por %p187_p2, %p186_p1  ;;  %p31_p4 = scmp.ge.s32.totalorder %s14564_s9, 2 }
   0xb   : > { %s174_s10 = ssub.s32 %s12097_s28, %s14562_s8  ;;  %p6308_p6 = scmp.ge.s32.totalorder %s12105_s30, 6 }
   0xc   : > { %s14566_s9 = smov (%p31_p4, %s14564_s9), 0 }
   0xd   : > { %s175_s11 = ssub.s32 %s12101_s29, %s14566_s9  ;;  %247 = sbr.rel (%p6308_p6) target bundleno = 34 (0x22), region = 28 }
   0xe   : > { %s176_s12 = sor.u32 %s175_s11, %s174_s10 }
   0xf   : > { %p177_p5 = scmp.eq.s32.totalorder %s176_s12, 0 }
  0x11   : > { %s12201_s14 = scalar_select %p177_p5, %s12085_s25, %s179_s13  }
  0x14   : > { %274 = sbr.rel (!%p188_p3) target bundleno = 34 (0x22), region = 44  ;;  %s276_s15 = sand.u32 (%p188_p3), 1, %s12085_s25  }
  0x15   : > { %s6446_s16 = sshll.u32 (%p188_p3), %s12097_s28, 4  ;;  %s6309_s17 = sshll.u32 (%p188_p3), %s276_s15, 6 }
  0x16   : > { %s281_s18 = sadd.s32 (%p188_p3), %s12101_s29, %s6446_s16  ;;  %s14296_s6 = sld [smem:[#allocation48_spill]] (%p188_p3) }
  0x17   : > { %s6312_s19 = sshll.u32 (%p188_p3), %s281_s18, 3  ;;  %s278_s23 = scalar_lea.vmem (%p188_p3), [#allocation4], %s6309_s17 }
  0x1c   : > { %s283_s22 = scalar_lea.vmem %s14296_s6, %s6312_s19 }
  0x1d   : > { %v325_v0 = vld [vmem:[%s283_s22] sm:$0xff]  ;;  %v327_v1 = vld [vmem:[%s283_s22 + $0x10] sm:$0xff] }
  0x1e   : > { %v329_v2 = vld [vmem:[%s283_s22 + $0x20] sm:$0xff]  ;;  %326 = vst [vmem:[%s278_s23] sm:$0xff] %v325_v0  ;;  %328 = vst [vmem:[%s278_s23 + $0x8] sm:$0xff] %v327_v1  ;;  %v331_v3 = vld [vmem:[%s283_s22 + $0x30] sm:$0xff] }
  0x1f   : > { %330 = vst [vmem:[%s278_s23 + $0x10] sm:$0xff] %v329_v2  ;;  %v333_v4 = vld [vmem:[%s283_s22 + $0x40] sm:$0xff]  ;;  %v335_v5 = vld [vmem:[%s283_s22 + $0x50] sm:$0xff]  ;;  %332 = vst [vmem:[%s278_s23 + $0x18] sm:$0xff] %v331_v3 }
  0x20   : > { %334 = vst [vmem:[%s278_s23 + $0x20] sm:$0xff] %v333_v4  ;;  %336 = vst [vmem:[%s278_s23 + $0x28] sm:$0xff] %v335_v5  ;;  %v337_v6 = vld [vmem:[%s283_s22 + $0x60] sm:$0xff]  ;;  %v339_v7 = vld [vmem:[%s283_s22 + $0x70] sm:$0xff] }
  0x21   : > { %338 = vst [vmem:[%s278_s23 + $0x30] sm:$0xff] %v337_v6  ;;  %340 = vst [vmem:[%s278_s23 + $0x38] sm:$0xff] %v339_v7 }
  0x22 PF: > { %p6313_p7 = scmp.ge.s32.totalorder %s12105_s30, 1  ;;  %p345_p8 = scmp.lt.s32.totalorder %s12105_s30, 7 }
  0x24   : > { %p346_p9 = pnand %p6313_p7, %p345_p8 }
  0x26   : > { %349 = sbr.rel (%p346_p9) target bundleno = 4325 (0x10e5), region = 82 }
  0x2d   : > { %s352_s10 = sand.u32 1, %s12081_s24   ;;  %s6315_s11 = sshll.u32 %s12093_s27, 3 }
  0x2e   : > { %s6314_s12 = sshll.u32 %s352_s10, 6  ;;  %p397_p10 = scmp.lt.s32.totalorder %s6315_s11, 15 }
  0x2f   : > { %p403_p11 = scmp.lt.s32.totalorder %s12093_s27, 1  ;;  %p416_p12 = scmp.eq.s32.totalorder %s12089_s26, 0 }
  0x30   : > { %s14568_s11 = smov (!%p397_p10, %s6315_s11), 15  ;;  %s12236_s15 = scalar_lea.vmem [#allocation4], %s6314_s12 }
  0x31   : > { %s14570_s27 = smov (!%p403_p11, %s12093_s27), 1  ;;  %s6447_s13 = sshll.u32 %s14568_s11, 7 }
  0x32   : > { %s12220_s17 = scalar_lea.vmem %s14183_s0, %s6447_s13  ;;  %s12222_s18 = sshll.u32 %s14570_s27, 3 }
  0x33   : > { %s406_s24 = scalar_lea.vmem %s14185_s2, %s12222_s18  ;;  %s410_s23 = scalar_lea.vmem %s14186_s3, %s12222_s18 }
  0x34   : > { %s415_s6 = scalar_lea.vmem %s14190_s7, %s12222_s18  ;;  %p6321_p13 = scmp.ne.s32.totalorder %s12089_s26, 0 }
  0x35   : > { %v420_v8 = vld [vmem:[%s12236_s15] sm:$0xff] (!%p6321_p13)  ;;  %v421_v9 = vld [vmem:[%s406_s24] sm:$0xff] (!%p6321_p13) }
  0x36   : > { %419 = sbr.rel (%p6321_p13) target bundleno = 61 (0x3d), region = 90  ;;  %v6322_v10 = vld [vmem:[%s14187_s4] ss:$0 sm:$0xff] (!%p6321_p13)  ;;  %v422_v11 = vadd.f32 (!%p6321_p13), %v421_v9, %v420_v8 }
  0x37   : > { %v431_v12 = vadd.f32 (!%p6321_p13), %v6322_v10, %v420_v8 }
  0x38   : > { %423 = vst [vmem:[#allocation2] sm:$0xff] (!%p6321_p13), %v422_v11 }
  0x39   : > { %432 = vst [vmem:[#allocation3] sm:$0xff] (!%p6321_p13), %v431_v12 }
  0x3d PF: > { %v442_v14 = vld [vmem:[%s12220_s17] sm:$0xff]  ;;  %v443_v15 = vld [vmem:[%s12220_s17 + $0x8] sm:$0xff]  ;;  %v14249_v16 = vmov 0.0|0.0   ;;  %v444_v22 = vld [vmem:[%s12220_s17 + $0x10] sm:$0xff]  ;;  %vm12108_vm0 = vmmov 0   ;;  %v14192_v56 = vmov 0.0  }
  0x3e   : > { %10192 = vmatprep.subr.bf16.mxu0 %v14249_v16  ;;  %v12249_v17 = vpack.c.bf16 %v443_v15, %v442_v14  ;;  %v6323_v19 = vld [vmem:[%s12220_s17 + $0x80] sm:$0xff]  ;;  %v6324_v20 = vld [vmem:[%s12220_s17 + $0x88] sm:$0xff]  ;;  %10216 = vmatprep.subr.bf16.mxu1 %v14249_v16  ;;  %v445_v23 = vld [vmem:[%s12220_s17 + $0x18] sm:$0xff]  ;;  %vm1173_vm1 = vcmask 1040384   ;;  %vm1175_vm2 = vcmask 1041408   ;;  %vm1177_vm3 = vcmask 1042432  }
  0x3f   : > { %v12243_v13 = vld [vmem:[#allocation2] sm:$0xff]  ;;  %v12256_v21 = vpack.c.bf16 %v6324_v20, %v6323_v19  ;;  %v6325_v24 = vld [vmem:[%s12220_s17 + $0x90] sm:$0xff]  ;;  %v12262_v25 = vpack.c.bf16 %v445_v23, %v444_v22  ;;  %v6326_v26 = vld [vmem:[%s12220_s17 + $0x98] sm:$0xff]  ;;  %7704 = vmatprep.mubr.msk.f32.mxu0 %vm12108_vm0, %v14192_v56  ;;  %7739 = vmatprep.mubr.msk.f32.mxu1 %vm12108_vm0, %v14192_v56  ;;  %vm1179_vm4 = vcmask 1043456   ;;  %vm1181_vm5 = vcmask 1044480   ;;  %p6442_p0 = scmp.ne.s32.totalorder %s12089_s26, 2 }
  0x40   : > { %436 = vmax.xlane.f32.xlu0 %v12243_v13  ;;  %14297 = vst [vmem:[#allocation5_spill] sm:$0xff] %v12249_v17  ;;  %v12251_v18 = vld [vmem:[#allocation3] sm:$0xff]  ;;  %10194 = vmatpush3.bf16.msra.mxu0 %v12249_v17  ;;  %v12267_v27 = vpack.c.bf16 %v6326_v26, %v6325_v24  ;;  %v446_v28 = vld [vmem:[%s12220_s17 + $0x20] sm:$0xff]  ;;  %v448_v34 = vld [vmem:[%s12220_s17 + $0x30] sm:$0xff]  ;;  %vm1183_vm6 = vcmask 1045504   ;;  %vm1185_vm7 = vcmask 1046528  }
  0x41   : > { %14298 = vst [vmem:[#allocation6_spill] sm:$0xff] %v12256_v21  ;;  %14299 = vst [vmem:[#allocation7_spill] sm:$0xff] %v12262_v25  ;;  %10218 = vmatpush3.bf16.msra.mxu1 %v12256_v21  ;;  %10195 = vmatprep.subr.bf16.mxu0 %v14249_v16  ;;  %v447_v29 = vld [vmem:[%s12220_s17 + $0x28] sm:$0xff]  ;;  %v6327_v30 = vld [vmem:[%s12220_s17 + $0xa0] sm:$0xff]  ;;  %s1287_s10 = scalar_select %p416_p12, 1, 0 }
  0x42   : > { %14300 = vst [vmem:[#allocation8_spill] sm:$0xff] %v12267_v27  ;;  %10219 = vmatprep.subr.bf16.mxu1 %v14249_v16  ;;  %v6328_v31 = vld [vmem:[%s12220_s17 + $0xa8] sm:$0xff]  ;;  %v12276_v32 = vpack.c.bf16 %v447_v29, %v446_v28  ;;  %v449_v35 = vld [vmem:[%s12220_s17 + $0x38] sm:$0xff]  ;;  %v6329_v36 = vld [vmem:[%s12220_s17 + $0xb0] sm:$0xff] }
  0x43   : > { %v12280_v33 = vpack.c.bf16 %v6328_v31, %v6327_v30  ;;  %v6330_v37 = vld [vmem:[%s12220_s17 + $0xb8] sm:$0xff]  ;;  %v12288_v38 = vpack.c.bf16 %v449_v35, %v448_v34  ;;  %v450_v40 = vld [vmem:[%s12220_s17 + $0x40] sm:$0xff]  ;;  %v451_v41 = vld [vmem:[%s12220_s17 + $0x48] sm:$0xff] }
  0x44   : > { %1191 = vmax.xlane.f32.xlu0 %v12251_v18  ;;  %10197 = vmatpush3.bf16.msra.mxu0 %v12262_v25  ;;  %14301 = vst [vmem:[#allocation9_spill] sm:$0xff] %v12276_v32  ;;  %v12292_v39 = vpack.c.bf16 %v6330_v37, %v6329_v36  ;;  %v12298_v42 = vpack.c.bf16 %v451_v41, %v450_v40  ;;  %v6331_v43 = vld [vmem:[%s12220_s17 + $0xc0] sm:$0xff]  ;;  %v6332_v44 = vld [vmem:[%s12220_s17 + $0xc8] sm:$0xff]  ;;  %v452_v46 = vld [vmem:[%s12220_s17 + $0x50] sm:$0xff] }
  0x45   : > { %10221 = vmatpush3.bf16.msra.mxu1 %v12267_v27  ;;  %10198 = vmatprep.subr.bf16.mxu0 %v14249_v16  ;;  %14302 = vst [vmem:[#allocation10_spill] sm:$0xff] %v12280_v33  ;;  %14303 = vst [vmem:[#allocation11_spill] sm:$0xff] %v12288_v38  ;;  %v12304_v45 = vpack.c.bf16 %v6332_v44, %v6331_v43  ;;  %v453_v47 = vld [vmem:[%s12220_s17 + $0x58] sm:$0xff]  ;;  %v6333_v49 = vld [vmem:[%s12220_s17 + $0xd0] sm:$0xff] }
  0x46   : > { %10222 = vmatprep.subr.bf16.mxu1 %v14249_v16  ;;  %14304 = vst [vmem:[#allocation12_spill] sm:$0xff] %v12292_v39  ;;  %14305 = vst [vmem:[#allocation13_spill] sm:$0xff] %v12298_v42  ;;  %v12310_v48 = vpack.c.bf16 %v453_v47, %v452_v46  ;;  %v6334_v50 = vld [vmem:[%s12220_s17 + $0xd8] sm:$0xff]  ;;  %v454_v52 = vld [vmem:[%s12220_s17 + $0x60] sm:$0xff] }
  0x47   : > { %14306 = vst [vmem:[#allocation14_spill] sm:$0xff] %v12304_v45  ;;  %v12316_v51 = vpack.c.bf16 %v6334_v50, %v6333_v49  ;;  %v455_v53 = vld [vmem:[%s12220_s17 + $0x68] sm:$0xff]  ;;  %v6335_v54 = vld [vmem:[%s12220_s17 + $0xe0] sm:$0xff]  ;;  %v456_v59 = vld [vmem:[%s12220_s17 + $0x70] sm:$0xff] }
  0x48   : > { %10200 = vmatpush3.bf16.msra.mxu0 %v12276_v32  ;;  %14307 = vst [vmem:[#allocation15_spill] sm:$0xff] %v12310_v48  ;;  %v6336_v55 = vld [vmem:[%s12220_s17 + $0xe8] sm:$0xff]  ;;  %v12328_v57 = vpack.c.bf16 %v455_v53, %v454_v52  ;;  %v457_v60 = vld [vmem:[%s12220_s17 + $0x78] sm:$0xff]  ;;  %v6337_v61 = vld [vmem:[%s12220_s17 + $0xf0] sm:$0xff] }
  0x49   : > { %10224 = vmatpush3.bf16.msra.mxu1 %v12280_v33  ;;  %10201 = vmatprep.subr.bf16.mxu0 %v14249_v16  ;;  %14308 = vst [vmem:[#allocation16_spill] sm:$0xff] %v12316_v51  ;;  %v12332_v58 = vpack.c.bf16 %v6336_v55, %v6335_v54  ;;  %v6338_v62 = vld [vmem:[%s12220_s17 + $0xf8] sm:$0xff]  ;;  %v12340_v63 = vpack.c.bf16 %v457_v60, %v456_v59  ;;  %v6339_v5 = vld [vmem:[%s12220_s17 + $0x100] sm:$0xff]  ;;  %v6340_v6 = vld [vmem:[%s12220_s17 + $0x108] sm:$0xff] }
  0x4a   : > { %10225 = vmatprep.subr.bf16.mxu1 %v14249_v16  ;;  %14309 = vst [vmem:[#allocation17_spill] sm:$0xff] %v12328_v57  ;;  %v12344_v0 = vpack.c.bf16 %v6338_v62, %v6337_v61  ;;  %v6355_v7 = vld [vmem:[%s12220_s17 + $0x180] sm:$0xff]  ;;  %v6356_v8 = vld [vmem:[%s12220_s17 + $0x188] sm:$0xff]  ;;  %v12361_v9 = vpack.c.bf16 %v6340_v6, %v6339_v5  ;;  %v6341_v10 = vld [vmem:[%s12220_s17 + $0x110] sm:$0xff] }
  0x4b   : > { %14310 = vst [vmem:[#allocation18_spill] sm:$0xff] %v12332_v58  ;;  %14311 = vst [vmem:[#allocation19_spill] sm:$0xff] %v12340_v63  ;;  %v6342_v11 = vld [vmem:[%s12220_s17 + $0x118] sm:$0xff]  ;;  %v12367_v14 = vpack.c.bf16 %v6356_v8, %v6355_v7  ;;  %v6357_v19 = vld [vmem:[%s12220_s17 + $0x190] sm:$0xff] }
  0x4c   : > { %10203 = vmatpush3.bf16.msra.mxu0 %v12288_v38  ;;  %14312 = vst [vmem:[#allocation20_spill] sm:$0xff] %v12344_v0  ;;  %v6358_v20 = vld [vmem:[%s12220_s17 + $0x198] sm:$0xff]  ;;  %v12374_v22 = vpack.c.bf16 %v6342_v11, %v6341_v10  ;;  %v6343_v23 = vld [vmem:[%s12220_s17 + $0x120] sm:$0xff]  ;;  %v6344_v24 = vld [vmem:[%s12220_s17 + $0x128] sm:$0xff] }
  0x4d   : > { %10227 = vmatpush3.bf16.msra.mxu1 %v12292_v39  ;;  %10204 = vmatprep.subr.bf16.mxu0 %v14249_v16  ;;  %v12382_v26 = vpack.c.bf16 %v6358_v20, %v6357_v19  ;;  %v6359_v28 = vld [vmem:[%s12220_s17 + $0x1a0] sm:$0xff]  ;;  %v6360_v29 = vld [vmem:[%s12220_s17 + $0x1a8] sm:$0xff]  ;;  %v12390_v30 = vpack.c.bf16 %v6344_v24, %v6343_v23  ;;  %v6345_v31 = vld [vmem:[%s12220_s17 + $0x130] sm:$0xff] }
  0x4e   : > { %10228 = vmatprep.subr.bf16.mxu1 %v14249_v16  ;;  %v6346_v34 = vld [vmem:[%s12220_s17 + $0x138] sm:$0xff]  ;;  %v12396_v35 = vpack.c.bf16 %v6360_v29, %v6359_v28  ;;  %v6361_v36 = vld [vmem:[%s12220_s17 + $0x1b0] sm:$0xff]  ;;  %v6347_v41 = vld [vmem:[%s12220_s17 + $0x140] sm:$0xff] }
  0x4f   : > { %v6362_v37 = vld [vmem:[%s12220_s17 + $0x1b8] sm:$0xff]  ;;  %v12402_v40 = vpack.c.bf16 %v6346_v34, %v6345_v31  ;;  %v6348_v43 = vld [vmem:[%s12220_s17 + $0x148] sm:$0xff]  ;;  %v6363_v46 = vld [vmem:[%s12220_s17 + $0x1c0] sm:$0xff] }
  0x50   : > { %10206 = vmatpush3.bf16.msra.mxu0 %v12298_v42  ;;  %v12408_v44 = vpack.c.bf16 %v6362_v37, %v6361_v36  ;;  %v6364_v47 = vld [vmem:[%s12220_s17 + $0x1c8] sm:$0xff]  ;;  %v12414_v49 = vpack.c.bf16 %v6348_v43, %v6347_v41  ;;  %v6349_v50 = vld [vmem:[%s12220_s17 + $0x150] sm:$0xff]  ;;  %v6350_v52 = vld [vmem:[%s12220_s17 + $0x158] sm:$0xff] }
  0x51   : > { %10230 = vmatpush3.bf16.msra.mxu1 %v12304_v45  ;;  %10207 = vmatprep.subr.bf16.mxu0 %v14249_v16  ;;  %v12420_v53 = vpack.c.bf16 %v6364_v47, %v6363_v46  ;;  %v6365_v54 = vld [vmem:[%s12220_s17 + $0x1d0] sm:$0xff]  ;;  %v6366_v55 = vld [vmem:[%s12220_s17 + $0x1d8] sm:$0xff]  ;;  %v12426_v59 = vpack.c.bf16 %v6350_v52, %v6349_v50  ;;  %v6351_v60 = vld [vmem:[%s12220_s17 + $0x160] sm:$0xff] }
  0x52   : > { %10231 = vmatprep.subr.bf16.mxu1 %v14249_v16  ;;  %v6352_v61 = vld [vmem:[%s12220_s17 + $0x168] sm:$0xff]  ;;  %v12432_v62 = vpack.c.bf16 %v6366_v55, %v6365_v54  ;;  %v6353_v6 = vld [vmem:[%s12220_s17 + $0x170] sm:$0xff]  ;;  %v6354_v7 = vld [vmem:[%s12220_s17 + $0x178] sm:$0xff] }
  0x53   : > { %v12438_v5 = vpack.c.bf16 %v6352_v61, %v6351_v60  ;;  %v6369_v10 = vld [vmem:[%s12220_s17 + $0x1f0] sm:$0xff]  ;;  %v6370_v11 = vld [vmem:[%s12220_s17 + $0x1f8] sm:$0xff]  ;;  %v6371_v19 = vld [vmem:[%s12220_s17 + $0x200] sm:$0xff] }
  0x54   : > { %10209 = vmatpush3.bf16.msra.mxu0 %v12310_v48  ;;  %v6372_v20 = vld [vmem:[%s12220_s17 + $0x208] sm:$0xff]  ;;  %v12456_v23 = vpack.c.bf16 %v6370_v11, %v6369_v10  ;;  %v6387_v24 = vld [vmem:[%s12220_s17 + $0x280] sm:$0xff]  ;;  %v6373_v34 = vld [vmem:[%s12220_s17 + $0x210] sm:$0xff] }
  0x55   : > { %10233 = vmatpush3.bf16.msra.mxu1 %v12316_v51  ;;  %10210 = vmatprep.subr.bf16.mxu0 %v14249_v16  ;;  %v6388_v28 = vld [vmem:[%s12220_s17 + $0x288] sm:$0xff]  ;;  %v12462_v29 = vpack.c.bf16 %v6372_v20, %v6371_v19  ;;  %v6374_v36 = vld [vmem:[%s12220_s17 + $0x218] sm:$0xff]  ;;  %v6389_v43 = vld [vmem:[%s12220_s17 + $0x290] sm:$0xff] }
  0x56   : > { %10234 = vmatprep.subr.bf16.mxu1 %v14249_v16  ;;  %v12469_v37 = vpack.c.bf16 %v6388_v28, %v6387_v24  ;;  %v6390_v46 = vld [vmem:[%s12220_s17 + $0x298] sm:$0xff]  ;;  %v12476_v47 = vpack.c.bf16 %v6374_v36, %v6373_v34  ;;  %v6375_v50 = vld [vmem:[%s12220_s17 + $0x220] sm:$0xff]  ;;  %v6376_v52 = vld [vmem:[%s12220_s17 + $0x228] sm:$0xff] }
  0x57   : > { %v12484_v54 = vpack.c.bf16 %v6390_v46, %v6389_v43  ;;  %v6391_v55 = vld [vmem:[%s12220_s17 + $0x2a0] sm:$0xff]  ;;  %v6392_v60 = vld [vmem:[%s12220_s17 + $0x2a8] sm:$0xff]  ;;  %v12492_v61 = vpack.c.bf16 %v6376_v52, %v6375_v50  ;;  %v6394_v10 = vld [vmem:[%s12220_s17 + $0x2b8] sm:$0xff] }
  0x58   : > { %10212 = vmatpush3.bf16.msra.mxu0 %v12328_v57  ;;  %v6379_v19 = vld [vmem:[%s12220_s17 + $0x240] sm:$0xff]  ;;  %v6380_v20 = vld [vmem:[%s12220_s17 + $0x248] sm:$0xff]  ;;  %v6381_v36 = vld [vmem:[%s12220_s17 + $0x250] sm:$0xff] }
  0x59   : > { %10236 = vmatpush3.bf16.msra.mxu1 %v12332_v58  ;;  %10213 = vmatprep.subr.bf16.mxu0 %v14249_v16  ;;  %v6395_v28 = vld [vmem:[%s12220_s17 + $0x2c0] sm:$0xff]  ;;  %v12516_v34 = vpack.c.bf16 %v6380_v20, %v6379_v19  ;;  %v6397_v46 = vld [vmem:[%s12220_s17 + $0x2d0] sm:$0xff]  ;;  %v6398_v50 = vld [vmem:[%s12220_s17 + $0x2d8] sm:$0xff] }
  0x5a   : > { %10237 = vmatprep.subr.bf16.mxu1 %v14249_v16  ;;  %v6385_v19 = vld [vmem:[%s12220_s17 + $0x270] sm:$0xff]  ;;  %v6386_v20 = vld [vmem:[%s12220_s17 + $0x278] sm:$0xff] }
  0x5c   : > { %10215 = vmatpush3.bf16.msra.mxu0 %v12340_v63 }
  0x5d   : > { %10239 = vmatpush3.bf16.msra.mxu1 %v12344_v0  ;;  %10240 = vmatprep.subr.bf16.mxu0 %v14249_v16 }
  0x5e   : > { %10264 = vmatprep.subr.bf16.mxu1 %v14249_v16 }
  0xcd   : > { %v12351_v1 = vpop.xlane.xlu0 %436 }
  0xce   : > { %v14191_v2 = vmax.f32 %v12351_v1, -1e+30 }
  0xd0   : > { %v439_v3 = vsub.f32 %v12243_v13, %v14191_v2  ;;  %v6406_v2 = vld [vmem:[%s12220_s17 + $0x318] sm:$0xff] }
  0xd2   : > { %v440_v4 = vmul.f32 1.442695, %v439_v3  ;;  %v6367_v3 = vld [vmem:[%s12220_s17 + $0x1e0] sm:$0xff] }
  0xd4   : > { %11979 = vpow2.f32 %v440_v4  ;;  %v6368_v4 = vld [vmem:[%s12220_s17 + $0x1e8] sm:$0xff] }
  0xd5   : > { %v12444_v8 = vpack.c.bf16 %v6368_v4, %v6367_v3  ;;  %v6377_v3 = vld [vmem:[%s12220_s17 + $0x230] sm:$0xff]  ;;  %v6378_v4 = vld [vmem:[%s12220_s17 + $0x238] sm:$0xff] }
  0xd6   : > { %v12504_v11 = vpack.c.bf16 %v6378_v4, %v6377_v3  ;;  %v12534_v3 = vpack.c.bf16 %v6398_v50, %v6397_v46  ;;  %v6399_v4 = vld [vmem:[%s12220_s17 + $0x2e0] sm:$0xff]  ;;  %v6404_v50 = vld [vmem:[%s12220_s17 + $0x308] sm:$0xff] }
  0xd7   : > { %v6403_v46 = vld [vmem:[%s12220_s17 + $0x300] sm:$0xff] }
  0xde   : > { %v12365_v12 = vpop.eup %11979 }
  0xdf   : > { %7705 = vmatmul.mubr.f32.vlgmr.msra.gmra.mrb[0].mxu0 %v12365_v12  ;;  %v546_v15 = vrot.slane %v12365_v12, 1  ;;  %v635_v31 = vrot.slane %v12365_v12, 2  ;;  %v724_v41 = vrot.slane %v12365_v12, 3 }
  0xe0   : > { %10242 = vmatpush3.bf16.msra.mxu0 %v12361_v9  ;;  %7774 = vmatprep.mubr.msk.f32.mxu0 %vm12108_vm0, %v14192_v56 }
  0xe1   : > { %7740 = vmatmul.mubr.f32.vlgmr.msra.gmra.mrb[0].mxu1 %v546_v15  ;;  %10243 = vmatprep.subr.bf16.mxu0 %v14249_v16  ;;  %v12450_v15 = vpack.c.bf16 %v6354_v7, %v6353_v6  ;;  %v12498_v6 = vpack.c.bf16 %v6392_v60, %v6391_v55  ;;  %v6393_v7 = vld [vmem:[%s12220_s17 + $0x2b0] sm:$0xff]  ;;  %v6383_v55 = vld [vmem:[%s12220_s17 + $0x260] sm:$0xff]  ;;  %v6384_v60 = vld [vmem:[%s12220_s17 + $0x268] sm:$0xff] }
  0xe2   : > { %10266 = vmatpush3.bf16.msra.mxu1 %v12367_v14  ;;  %7809 = vmatprep.mubr.msk.f32.mxu1 %vm12108_vm0, %v14192_v56  ;;  %v12510_v24 = vpack.c.bf16 %v6394_v10, %v6393_v7  ;;  %v6400_v7 = vld [vmem:[%s12220_s17 + $0x2e8] sm:$0xff]  ;;  %v12540_v10 = vpack.c.bf16 %v6384_v60, %v6383_v55  ;;  %v6419_v60 = vld [vmem:[%s12220_s17 + $0x380] sm:$0xff] }
  0xe3   : > { %10267 = vmatprep.subr.bf16.mxu1 %v14249_v16 }
  0xe4   : > { %10245 = vmatpush3.bf16.msra.mxu0 %v12374_v22 }
  0xe5   : > { %10246 = vmatprep.subr.bf16.mxu0 %v14249_v16 }
  0xe6   : > { %10269 = vmatpush3.bf16.msra.mxu1 %v12382_v26 }
  0xe7   : > { %10270 = vmatprep.subr.bf16.mxu1 %v14249_v16 }
  0xe8   : > { %10248 = vmatpush3.bf16.msra.mxu0 %v12390_v30 }
  0xe9   : > { %10249 = vmatprep.subr.bf16.mxu0 %v14249_v16 }
  0xea   : > { %10272 = vmatpush3.bf16.msra.mxu1 %v12396_v35 }
  0xeb   : > { %10273 = vmatprep.subr.bf16.mxu1 %v14249_v16 }
  0xec   : > { %10251 = vmatpush3.bf16.msra.mxu0 %v12402_v40 }
  0xed   : > { %10252 = vmatprep.subr.bf16.mxu0 %v14249_v16 }
  0xee   : > { %10275 = vmatpush3.bf16.msra.mxu1 %v12408_v44 }
  0xef   : > { %10276 = vmatprep.subr.bf16.mxu1 %v14249_v16 }
  0xf0   : > { %10254 = vmatpush3.bf16.msra.mxu0 %v12414_v49 }
  0xf1   : > { %10255 = vmatprep.subr.bf16.mxu0 %v14249_v16 }
  0xf2   : > { %10278 = vmatpush3.bf16.msra.mxu1 %v12420_v53 }
  0xf3   : > { %10279 = vmatprep.subr.bf16.mxu1 %v14249_v16 }
  0xf4   : > { %10257 = vmatpush3.bf16.msra.mxu0 %v12426_v59 }
  0xf5   : > { %10258 = vmatprep.subr.bf16.mxu0 %v14249_v16 }
  0xf6   : > { %10281 = vmatpush3.bf16.msra.mxu1 %v12432_v62 }
  0xf7   : > { %10282 = vmatprep.subr.bf16.mxu1 %v14249_v16 }
  0xf8   : > { %10260 = vmatpush3.bf16.msra.mxu0 %v12438_v5 }
  0xf9   : > { %10261 = vmatprep.subr.bf16.mxu0 %v14249_v16 }
  0xfa   : > { %10284 = vmatpush3.bf16.msra.mxu1 %v12444_v8 }
  0xfb   : > { %10285 = vmatprep.subr.bf16.mxu1 %v14249_v16 }
  0xfc   : > { %10263 = vmatpush3.bf16.msra.mxu0 %v12450_v15 }
  0xfd   : > { %10288 = vmatprep.subr.bf16.mxu0 %v14249_v16 }
  0xfe   : > { %10287 = vmatpush3.bf16.msra.mxu1 %v12456_v23 }
  0xff   : > { %7775 = vmatmul.mubr.f32.vlgmr.msra.gmra.mrb[2].mxu0 %v635_v31  ;;  %10312 = vmatprep.subr.bf16.mxu1 %v14249_v16  ;;  %v6396_v31 = vld [vmem:[%s12220_s17 + $0x2c8] sm:$0xff] }
 0x100   : > { %10290 = vmatpush3.bf16.msra.mxu0 %v12462_v29  ;;  %7844 = vmatprep.mubr.msk.f32.mxu0 %vm12108_vm0, %v14192_v56  ;;  %v12522_v43 = vpack.c.bf16 %v6396_v31, %v6395_v28  ;;  %v12546_v28 = vpack.c.bf16 %v6400_v7, %v6399_v4  ;;  %v6401_v31 = vld [vmem:[%s12220_s17 + $0x2f0] sm:$0xff]  ;;  %v6420_v4 = vld [vmem:[%s12220_s17 + $0x388] sm:$0xff]  ;;  %v12564_v7 = vpack.c.bf16 %v6404_v50, %v6403_v46  ;;  %v6422_v50 = vld [vmem:[%s12220_s17 + $0x398] sm:$0xff] }
 0x101   : > { %7810 = vmatmul.mubr.f32.vlgmr.msra.gmra.mrb[2].mxu1 %v724_v41  ;;  %10291 = vmatprep.subr.bf16.mxu0 %v14249_v16  ;;  %v6382_v41 = vld [vmem:[%s12220_s17 + $0x258] sm:$0xff]  ;;  %v6421_v46 = vld [vmem:[%s12220_s17 + $0x390] sm:$0xff] }
 0x102   : > { %10314 = vmatpush3.bf16.msra.mxu1 %v12469_v37  ;;  %7879 = vmatprep.mubr.msk.f32.mxu1 %vm12108_vm0, %v14192_v56  ;;  %v12528_v52 = vpack.c.bf16 %v6382_v41, %v6381_v36  ;;  %14313 = vst [vmem:[#allocation21_spill] sm:$0xff] %v12546_v28  ;;  %v6402_v36 = vld [vmem:[%s12220_s17 + $0x2f8] sm:$0xff]  ;;  %v12552_v41 = vpack.c.bf16 %v6386_v20, %v6385_v19  ;;  %14316 = vst [vmem:[#allocation24_spill] sm:$0xff] %v12564_v7  ;;  %v813_v19 = vrot.slane %v12365_v12, 4  ;;  %v6405_v20 = vld [vmem:[%s12220_s17 + $0x310] sm:$0xff] }
 0x103   : > { %10315 = vmatprep.subr.bf16.mxu1 %v14249_v16  ;;  %v12558_v55 = vpack.c.bf16 %v6402_v36, %v6401_v31  ;;  %v12571_v31 = vpack.c.bf16 %v6420_v4, %v6419_v60  ;;  %v902_v36 = vrot.slane %v12365_v12, 5  ;;  %v12578_v56 = vpack.c.bf16 %v6406_v2, %v6405_v20  ;;  %v6407_v60 = vld [vmem:[%s12220_s17 + $0x320] sm:$0xff]  ;;  %v6408_v4 = vld [vmem:[%s12220_s17 + $0x328] sm:$0xff] }
 0x104   : > { %10293 = vmatpush3.bf16.msra.mxu0 %v12476_v47  ;;  %14314 = vst [vmem:[#allocation22_spill] sm:$0xff] %v12552_v41  ;;  %v6423_v2 = vld [vmem:[%s12220_s17 + $0x3a0] sm:$0xff]  ;;  %v6424_v20 = vld [vmem:[%s12220_s17 + $0x3a8] sm:$0xff] }
 0x105   : > { %10294 = vmatprep.subr.bf16.mxu0 %v14249_v16  ;;  %14315 = vst [vmem:[#allocation23_spill] sm:$0xff] %v12558_v55  ;;  %14317 = vst [vmem:[#allocation25_spill] sm:$0xff] %v12571_v31 }
 0x106   : > { %10317 = vmatpush3.bf16.msra.mxu1 %v12484_v54  ;;  %14318 = vst [vmem:[#allocation26_spill] sm:$0xff] %v12578_v56 }
 0x107   : > { %10318 = vmatprep.subr.bf16.mxu1 %v14249_v16 }
 0x108   : > { %10296 = vmatpush3.bf16.msra.mxu0 %v12492_v61 }
 0x109   : > { %10297 = vmatprep.subr.bf16.mxu0 %v14249_v16 }
 0x10a   : > { %10320 = vmatpush3.bf16.msra.mxu1 %v12498_v6 }
 0x10b   : > { %10321 = vmatprep.subr.bf16.mxu1 %v14249_v16 }
 0x10c   : > { %10299 = vmatpush3.bf16.msra.mxu0 %v12504_v11 }
 0x10d   : > { %10300 = vmatprep.subr.bf16.mxu0 %v14249_v16 }
 0x10e   : > { %10323 = vmatpush3.bf16.msra.mxu1 %v12510_v24 }
 0x10f   : > { %10324 = vmatprep.subr.bf16.mxu1 %v14249_v16 }
 0x110   : > { %10302 = vmatpush3.bf16.msra.mxu0 %v12516_v34 }
 0x111   : > { %10303 = vmatprep.subr.bf16.mxu0 %v14249_v16 }
 0x112   : > { %10326 = vmatpush3.bf16.msra.mxu1 %v12522_v43 }
 0x113   : > { %10327 = vmatprep.subr.bf16.mxu1 %v14249_v16 }
 0x114   : > { %10305 = vmatpush3.bf16.msra.mxu0 %v12528_v52 }
 0x115   : > { %10306 = vmatprep.subr.bf16.mxu0 %v14249_v16 }
 0x116   : > { %10329 = vmatpush3.bf16.msra.mxu1 %v12534_v3 }
 0x117   : > { %10330 = vmatprep.subr.bf16.mxu1 %v14249_v16 }
 0x118   : > { %10308 = vmatpush3.bf16.msra.mxu0 %v12540_v10 }
 0x119   : > { %10309 = vmatprep.subr.bf16.mxu0 %v14249_v16 }
 0x11a   : > { %10332 = vmatpush3.bf16.msra.mxu1 %v12546_v28 }
 0x11b   : > { %10333 = vmatprep.subr.bf16.mxu1 %v14249_v16 }
 0x11c   : > { %10311 = vmatpush3.bf16.msra.mxu0 %v12552_v41  ;;  %v14319_v41 = vmov 0.0  }
 0x11d   : > { %10336 = vmatprep.subr.bf16.mxu0 %v14249_v16 }
 0x11e   : > { %10335 = vmatpush3.bf16.msra.mxu1 %v12558_v55  ;;  %v6426_v55 = vld [vmem:[%s12220_s17 + $0x3b8] sm:$0xff] }
 0x11f   : > { %7845 = vmatmul.mubr.f32.vlgmr.msra.gmra.mrb[4].mxu0 %v813_v19  ;;  %10360 = vmatprep.subr.bf16.mxu1 %v14249_v16  ;;  %v12586_v19 = vpack.c.bf16 %v6422_v50, %v6421_v46  ;;  %v6410_v46 = vld [vmem:[%s12220_s17 + $0x338] sm:$0xff]  ;;  %v12600_v50 = vpack.c.bf16 %v6424_v20, %v6423_v2  ;;  %v6427_v20 = vld [vmem:[%s12220_s17 + $0x3c0] sm:$0xff] }
 0x120   : > { %10338 = vmatpush3.bf16.msra.mxu0 %v12564_v7  ;;  %7914 = vmatprep.mubr.msk.f32.mxu0 %vm12108_vm0, %v14319_v41  ;;  %v6409_v7 = vld [vmem:[%s12220_s17 + $0x330] sm:$0xff] }
 0x121   : > { %7880 = vmatmul.mubr.f32.vlgmr.msra.gmra.mrb[4].mxu1 %v902_v36  ;;  %10339 = vmatprep.subr.bf16.mxu0 %v14249_v16  ;;  %14320 = vst [vmem:[#allocation27_spill] sm:$0xff] %v12586_v19  ;;  %v12594_v36 = vpack.c.bf16 %v6408_v4, %v6407_v60  ;;  %14322 = vst [vmem:[#allocation29_spill] sm:$0xff] %v12600_v50  ;;  %v12606_v60 = vpack.c.bf16 %v6410_v46, %v6409_v7  ;;  %v6411_v4 = vld [vmem:[%s12220_s17 + $0x340] sm:$0xff]  ;;  %v6413_v46 = vld [vmem:[%s12220_s17 + $0x350] sm:$0xff] }
 0x122   : > { %10362 = vmatpush3.bf16.msra.mxu1 %v12571_v31  ;;  %7949 = vmatprep.mubr.msk.f32.mxu1 %vm12108_vm0, %v14319_v41  ;;  %v6425_v31 = vld [vmem:[%s12220_s17 + $0x3b0] sm:$0xff] }
 0x123   : > { %10363 = vmatprep.subr.bf16.mxu1 %v14249_v16  ;;  %14321 = vst [vmem:[#allocation28_spill] sm:$0xff] %v12594_v36  ;;  %14323 = vst [vmem:[#allocation30_spill] sm:$0xff] %v12606_v60  ;;  %v12612_v2 = vpack.c.bf16 %v6426_v55, %v6425_v31  ;;  %v6429_v31 = vld [vmem:[%s12220_s17 + $0x3d0] sm:$0xff] }
 0x124   : > { %10341 = vmatpush3.bf16.msra.mxu0 %v12578_v56  ;;  %v6412_v56 = vld [vmem:[%s12220_s17 + $0x348] sm:$0xff] }
 0x125   : > { %10342 = vmatprep.subr.bf16.mxu0 %v14249_v16  ;;  %14324 = vst [vmem:[#allocation31_spill] sm:$0xff] %v12612_v2  ;;  %v12618_v7 = vpack.c.bf16 %v6412_v56, %v6411_v4  ;;  %v6415_v4 = vld [vmem:[%s12220_s17 + $0x360] sm:$0xff] }
 0x126   : > { %10365 = vmatpush3.bf16.msra.mxu1 %v12586_v19  ;;  %v6428_v19 = vld [vmem:[%s12220_s17 + $0x3c8] sm:$0xff] }
 0x127   : > { %10366 = vmatprep.subr.bf16.mxu1 %v14249_v16  ;;  %14325 = vst [vmem:[#allocation32_spill] sm:$0xff] %v12618_v7  ;;  %v12624_v55 = vpack.c.bf16 %v6428_v19, %v6427_v20  ;;  %v6431_v20 = vld [vmem:[%s12220_s17 + $0x3e0] sm:$0xff] }
 0x128   : > { %10344 = vmatpush3.bf16.msra.mxu0 %v12594_v36  ;;  %v6414_v36 = vld [vmem:[%s12220_s17 + $0x358] sm:$0xff] }
 0x129   : > { %10345 = vmatprep.subr.bf16.mxu0 %v14249_v16  ;;  %14326 = vst [vmem:[#allocation33_spill] sm:$0xff] %v12624_v55  ;;  %v12630_v56 = vpack.c.bf16 %v6414_v36, %v6413_v46  ;;  %v6417_v36 = vld [vmem:[%s12220_s17 + $0x370] sm:$0xff]  ;;  %v6418_v46 = vld [vmem:[%s12220_s17 + $0x378] sm:$0xff] }
 0x12a   : > { %10368 = vmatpush3.bf16.msra.mxu1 %v12600_v50  ;;  %v6430_v50 = vld [vmem:[%s12220_s17 + $0x3d8] sm:$0xff] }
 0x12b   : > { %10369 = vmatprep.subr.bf16.mxu1 %v14249_v16  ;;  %14327 = vst [vmem:[#allocation34_spill] sm:$0xff] %v12630_v56  ;;  %v12636_v19 = vpack.c.bf16 %v6430_v50, %v6429_v31  ;;  %v6433_v50 = vld [vmem:[%s12220_s17 + $0x3f0] sm:$0xff]  ;;  %v6434_v31 = vld [vmem:[%s12220_s17 + $0x3f8] sm:$0xff] }
 0x12c   : > { %10347 = vmatpush3.bf16.msra.mxu0 %v12606_v60  ;;  %v6416_v60 = vld [vmem:[%s12220_s17 + $0x368] sm:$0xff] }
 0x12d   : > { %10348 = vmatprep.subr.bf16.mxu0 %v14249_v16  ;;  %14328 = vst [vmem:[#allocation35_spill] sm:$0xff] %v12636_v19  ;;  %v12642_v28 = vpack.c.bf16 %v6416_v60, %v6415_v4  ;;  %v1197_v60 = vld [vmem:[%s14184_s1] sm:$0xff]  ;;  %v1198_v4 = vld [vmem:[%s14184_s1 + $0x8] sm:$0xff] }
 0x12e   : > { %10371 = vmatpush3.bf16.msra.mxu1 %v12612_v2  ;;  %v6432_v2 = vld [vmem:[%s12220_s17 + $0x3e8] sm:$0xff] }
 0x12f   : > { %10372 = vmatprep.subr.bf16.mxu1 %v14249_v16  ;;  %14329 = vst [vmem:[#allocation36_spill] sm:$0xff] %v12642_v28 }
 0x130   : > { %10350 = vmatpush3.bf16.msra.mxu0 %v12618_v7  ;;  %v12648_v7 = vpack.c.bf16 %v6432_v2, %v6431_v20  ;;  %v12664_v2 = vpack.c.bf16 %v6434_v31, %v6433_v50  ;;  %v12668_v20 = vpack.c.bf16 %v1198_v4, %v1197_v60  ;;  %v1080_v50 = vrot.slane %v12365_v12, 7  ;;  %v1201_v60 = vld [vmem:[%s14184_s1 + $0x20] sm:$0xff] }
 0x131   : > { %10351 = vmatprep.subr.bf16.mxu0 %v14249_v16 }
 0x132   : > { %10374 = vmatpush3.bf16.msra.mxu1 %v12624_v55  ;;  %14330 = vst [vmem:[#allocation37_spill] sm:$0xff] %v12648_v7  ;;  %v12654_v55 = vpack.c.bf16 %v6418_v46, %v6417_v36  ;;  %14332 = vst [vmem:[#allocation39_spill] sm:$0xff] %v12664_v2  ;;  %v991_v36 = vrot.slane %v12365_v12, 6  ;;  %v1199_v46 = vld [vmem:[%s14184_s1 + $0x10] sm:$0xff]  ;;  %v1202_v12 = vld [vmem:[%s14184_s1 + $0x28] sm:$0xff] }
 0x133   : > { %10375 = vmatprep.subr.bf16.mxu1 %v14249_v16  ;;  %14333 = vst [vmem:[#allocation40_spill] sm:$0xff] %v12668_v20  ;;  %v12700_v4 = vpack.c.bf16 %v1202_v12, %v1201_v60  ;;  %v1205_v12 = vld [vmem:[%s14184_s1 + $0x40] sm:$0xff] }
 0x134   : > { %10353 = vmatpush3.bf16.msra.mxu0 %v12630_v56  ;;  %14331 = vst [vmem:[#allocation38_spill] sm:$0xff] %v12654_v55 }
 0x135   : > { %10354 = vmatprep.subr.bf16.mxu0 %v14249_v16  ;;  %14335 = vst [vmem:[#allocation42_spill] sm:$0xff] %v12700_v4 }
 0x136   : > { %10377 = vmatpush3.bf16.msra.mxu1 %v12636_v19 }
 0x137   : > { %10378 = vmatprep.subr.bf16.mxu1 %v14249_v16 }
 0x138   : > { %10356 = vmatpush3.bf16.msra.mxu0 %v12642_v28 }
 0x139   : > { %10357 = vmatprep.subr.bf16.mxu0 %v14249_v16 }
 0x13a   : > { %10380 = vmatpush3.bf16.msra.mxu1 %v12648_v7  ;;  %v1200_v7 = vld [vmem:[%s14184_s1 + $0x18] sm:$0xff] }
 0x13b   : > { %10381 = vmatprep.subr.bf16.mxu1 %v14249_v16  ;;  %v12682_v31 = vpack.c.bf16 %v1200_v7, %v1199_v46  ;;  %v12696_v7 = vpop.xlane.xlu0 %1191  ;;  %v1204_v46 = vld [vmem:[%s14184_s1 + $0x38] sm:$0xff] }
 0x13c   : > { %10359 = vmatpush3.bf16.msra.mxu0 %v12654_v55 }
 0x13d   : > { %10384 = vmatprep.subr.bf16.mxu0 %v14249_v16  ;;  %14334 = vst [vmem:[#allocation41_spill] sm:$0xff] %v12682_v31 }
 0x13e   : > { %10383 = vmatpush3.bf16.msra.mxu1 %v12664_v2 }
 0x13f   : > { %7915 = vmatmul.mubr.f32.vlgmr.msra.gmra.mrb[6].mxu0 %v991_v36  ;;  %10408 = vmatprep.subr.bf16.mxu1 %v14249_v16  ;;  %v1203_v36 = vld [vmem:[%s14184_s1 + $0x30] sm:$0xff] }
 0x140   : > { %10386 = vmatpush3.bf16.msra.mxu0 %v12668_v20  ;;  %7984 = vmatprep.mubr.msk.f32.mxu0 %vm12108_vm0, %v14319_v41  ;;  %v12713_v60 = vpack.c.bf16 %v1204_v46, %v1203_v36  ;;  %v1207_v46 = vld [vmem:[%s14184_s1 + $0x50] sm:$0xff] }
 0x141   : > { %7950 = vmatmul.mubr.f32.vlgmr.msra.gmra.mrb[6].mxu1 %v1080_v50  ;;  %10387 = vmatprep.subr.bf16.mxu0 %v14249_v16  ;;  %v14230_v50 = vmax.f32 %v12696_v7, -1e+30 }
 0x142   : > { %10410 = vmatpush3.bf16.msra.mxu1 %v12249_v17  ;;  %8019 = vmatprep.mubr.msk.f32.mxu1 %vm12108_vm0, %v14319_v41  ;;  %14336 = vst [vmem:[#allocation43_spill] sm:$0xff] %v12713_v60 }
 0x143   : > { %10411 = vmatprep.subr.bf16.mxu1 %v14249_v16 }
 0x144   : > { %10389 = vmatpush3.bf16.msra.mxu0 %v12682_v31  ;;  %v1206_v31 = vld [vmem:[%s14184_s1 + $0x48] sm:$0xff] }
 0x145   : > { %10390 = vmatprep.subr.bf16.mxu0 %v14249_v16  ;;  %v12728_v36 = vpack.c.bf16 %v1206_v31, %v1205_v12  ;;  %v1209_v31 = vld [vmem:[%s14184_s1 + $0x60] sm:$0xff]  ;;  %v1210_v12 = vld [vmem:[%s14184_s1 + $0x68] sm:$0xff] }
 0x146   : > { %10413 = vmatpush3.bf16.msra.mxu1 %v12262_v25  ;;  %v1194_v25 = vsub.f32 %v12251_v18, %v14230_v50 }
 0x147   : > { %10414 = vmatprep.subr.bf16.mxu1 %v14249_v16  ;;  %14337 = vst [vmem:[#allocation44_spill] sm:$0xff] %v12728_v36 }
 0x148   : > { %10392 = vmatpush3.bf16.msra.mxu0 %v12700_v4  ;;  %v1208_v4 = vld [vmem:[%s14184_s1 + $0x58] sm:$0xff]  ;;  %v1195_v17 = vmul.f32 1.442695, %v1194_v25  ;;  %v12752_v25 = vpack.c.bf16 %v1210_v12, %v1209_v31 }
 0x149   : > { %10393 = vmatprep.subr.bf16.mxu0 %v14249_v16  ;;  %v12740_v50 = vpack.c.bf16 %v1208_v4, %v1207_v46  ;;  %v1211_v4 = vld [vmem:[%s14184_s1 + $0x70] sm:$0xff]  ;;  %v1212_v46 = vld [vmem:[%s14184_s1 + $0x78] sm:$0xff] }
 0x14a   : > { %10416 = vmatpush3.bf16.msra.mxu1 %v12276_v32  ;;  %11981 = vpow2.f32 %v1195_v17  ;;  %14339 = vst [vmem:[#allocation46_spill] sm:$0xff] %v12752_v25  ;;  %v12764_v17 = vpack.c.bf16 %v1212_v46, %v1211_v4 }
 0x14b   : > { %10417 = vmatprep.subr.bf16.mxu1 %v14249_v16  ;;  %14338 = vst [vmem:[#allocation45_spill] sm:$0xff] %v12740_v50 }
 0x14c   : > { %10395 = vmatpush3.bf16.msra.mxu0 %v12713_v60  ;;  %14340 = vst [vmem:[#allocation47_spill] sm:$0xff] %v12764_v17 }
 0x14d   : > { %10396 = vmatprep.subr.bf16.mxu0 %v14249_v16 }
 0x14e   : > { %10419 = vmatpush3.bf16.msra.mxu1 %v12288_v38 }
 0x14f   : > { %10420 = vmatprep.subr.bf16.mxu1 %v14249_v16 }
 0x150   : > { %10398 = vmatpush3.bf16.msra.mxu0 %v12728_v36 }
 0x151   : > { %10399 = vmatprep.subr.bf16.mxu0 %v14249_v16 }
 0x152   : > { %10422 = vmatpush3.bf16.msra.mxu1 %v12298_v42 }
 0x153   : > { %10423 = vmatprep.subr.bf16.mxu1 %v14249_v16 }
 0x154   : > { %10401 = vmatpush3.bf16.msra.mxu0 %v12740_v50  ;;  %v11982_v31 = vpop.eup %11981 }
 0x155   : > { %10402 = vmatprep.subr.bf16.mxu0 %v14249_v16 }
 0x156   : > { %10425 = vmatpush3.bf16.msra.mxu1 %v12310_v48 }
 0x157   : > { %10426 = vmatprep.subr.bf16.mxu1 %v14249_v16 }
 0x158   : > { %10404 = vmatpush3.bf16.msra.mxu0 %v12752_v25 }
 0x159   : > { %10405 = vmatprep.subr.bf16.mxu0 %v14249_v16 }
 0x15a   : > { %10428 = vmatpush3.bf16.msra.mxu1 %v12328_v57 }
 0x15b   : > { %10429 = vmatprep.subr.bf16.mxu1 %v14249_v16 }
 0x15c   : > { %10407 = vmatpush3.bf16.msra.mxu0 %v12764_v17 }
 0x15d   : > { %10432 = vmatprep.subr.bf16.mxu0 %v14249_v16 }
 0x15e   : > { %10431 = vmatpush3.bf16.msra.mxu1 %v12340_v63 }
 0x15f   : > { %7985 = vmatmul.mubr.f32.vlgmr.msra.gmra.mrb[8].mxu0 %v11982_v31  ;;  %10456 = vmatprep.subr.bf16.mxu1 %v14249_v16 }
 0x160   : > { %10434 = vmatpush3.bf16.msra.mxu0 %v12256_v21  ;;  %8054 = vmatprep.mubr.msk.f32.mxu0 %vm12108_vm0, %v14319_v41 }
 0x161   : > { %10435 = vmatprep.subr.bf16.mxu0 %v14249_v16 }
 0x164   : > { %10437 = vmatpush3.bf16.msra.mxu0 %v12267_v27 }
 0x165   : > { %10438 = vmatprep.subr.bf16.mxu0 %v14249_v16 }
 0x168   : > { %10440 = vmatpush3.bf16.msra.mxu0 %v12280_v33 }
 0x169   : > { %10441 = vmatprep.subr.bf16.mxu0 %v14249_v16 }
 0x16c   : > { %10443 = vmatpush3.bf16.msra.mxu0 %v12292_v39 }
 0x16d   : > { %10444 = vmatprep.subr.bf16.mxu0 %v14249_v16 }
 0x170   : > { %10446 = vmatpush3.bf16.msra.mxu0 %v12304_v45 }
 0x171   : > { %10447 = vmatprep.subr.bf16.mxu0 %v14249_v16 }
 0x174   : > { %10449 = vmatpush3.bf16.msra.mxu0 %v12316_v51 }
 0x175   : > { %10450 = vmatprep.subr.bf16.mxu0 %v14249_v16 }
 0x178   : > { %10452 = vmatpush3.bf16.msra.mxu0 %v12332_v58 }
 0x179   : > { %10453 = vmatprep.subr.bf16.mxu0 %v14249_v16 }
 0x17c   : > { %10455 = vmatpush3.bf16.msra.mxu0 %v12344_v0 }
 0x17d   : > { %10480 = vmatprep.subr.bf16.mxu0 %v14249_v16 }
 0x1b2   : > { %v524_v12 = vpop.f32.mrb[0].mxu0 }
 0x1b3   : > { %v7706_v4 = vpop.f32.mrb[1].mxu0 }
 0x1b4   : > { %v614_v46 = vpop.f32.mrb[0].mxu1 }
 0x1b5   : > { %v1153_v31 = vrot.slane %v614_v46, 7  ;;  %v7741_v45 = vpop.f32.mrb[1].mxu1 }
 0x1b7   : > { %v1174_v39 = vsel %vm1173_vm1, %v524_v12, %v1153_v31 }
 0x1d2   : > { %v703_v33 = vpop.f32.mrb[2].mxu0 }
 0x1d3   : > { %v1156_v51 = vrot.slane %v703_v33, 6  ;;  %v7776_v27 = vpop.f32.mrb[3].mxu0 }
 0x1d4   : > { %v792_v21 = vpop.f32.mrb[2].mxu1 }
 0x1d5   : > { %v1176_v58 = vsel %vm1175_vm2, %v1174_v39, %v1156_v51  ;;  %v1159_v63 = vrot.slane %v792_v21, 5  ;;  %v7811_v0 = vpop.f32.mrb[3].mxu1 }
 0x1d7   : > { %v1178_v16 = vsel %vm1177_vm3, %v1176_v58, %v1159_v63 }
 0x1f2   : > { %v881_v17 = vpop.f32.mrb[4].mxu0 }
 0x1f3   : > { %v1162_v4 = vrot.slane %v881_v17, 4  ;;  %v7846_v57 = vpop.f32.mrb[5].mxu0 }
 0x1f4   : > { %v970_v46 = vpop.f32.mrb[4].mxu1 }
 0x1f5   : > { %v1180_v45 = vsel %vm1179_vm4, %v1178_v16, %v1162_v4  ;;  %v1165_v12 = vrot.slane %v970_v46, 3  ;;  %v7881_v33 = vpop.f32.mrb[5].mxu1  ;;  %v1288_v4 = vstv %s1287_s10  ;;  %v435_v46 = vld [vmem:[%s12236_s15] sm:$0xff] }
 0x1f6   : > { %vm1289_vm8 = vcmp.eq.s32.totalorder %v1288_v4, 1 }
 0x1f7   : > { %v1182_v27 = vsel %vm1181_vm5, %v1180_v45, %v1165_v12  ;;  %v14341_v45 = vmax.f32 %v12351_v1, -1e+30 }
 0x212   : > { %v1059_v31 = vpop.f32.mrb[6].mxu0 }
 0x213   : > { %v1168_v21 = vrot.slane %v1059_v31, 2  ;;  %v7916_v39 = vpop.f32.mrb[7].mxu0 }
 0x214   : > { %v1148_v51 = vpop.f32.mrb[6].mxu1 }
 0x215   : > { %v1184_v58 = vsel %vm1183_vm6, %v1182_v27, %v1168_v21  ;;  %v1171_v63 = vrot.slane %v1148_v51, 1  ;;  %v7951_v57 = vpop.f32.mrb[7].mxu1 }
 0x217   : > { %v1186_v0 = vsel %vm1185_vm7, %v1184_v58, %v1171_v63  ;;  %v14342_v58 = vmax.f32 %v12696_v7, -1e+30 }
 0x218   : > { %11983 = vlog2.f32 %v1186_v0 }
 0x222   : > { %v11984_v16 = vpop.eup %11983 }
 0x223   : > { %v1188_v17 = vmul.f32 0.6931472, %v11984_v16 }
 0x225   : > { %v1189_v12 = vadd.f32 %v1188_v17, %v14341_v45 }
 0x227   : > { %v1190_v33 = vadd.f32 %v1189_v12, %v435_v46  ;;  %v14344_v12 = vld [vmem:[#allocation21_spill] sm:$0xff] }
 0x229   : > { %v1290_v31 = vsel %vm1289_vm8, %v12243_v13, %v1190_v33  ;;  %v14345_v33 = vld [vmem:[#allocation22_spill] sm:$0xff] }
 0x22a   : > { %1294 = vmax.xlane.f32.xlu1 %v1290_v31 }
 0x232   : > { %v1279_v27 = vpop.f32.mrb[8].mxu0 }
 0x233   : > { %11985 = vlog2.f32 %v1279_v27  ;;  %v7986_v21 = vpop.f32.mrb[9].mxu0  ;;  %v14346_v27 = vld [vmem:[#allocation23_spill] sm:$0xff] }
 0x23d   : > { %v11986_v39 = vpop.eup %11985 }
 0x23e   : > { %v1284_v51 = vmul.f32 0.6931472, %v11986_v39  ;;  %v14347_v39 = vld [vmem:[#allocation24_spill] sm:$0xff] }
 0x240   : > { %v1285_v63 = vadd.f32 %v1284_v51, %v14342_v58  ;;  %v14348_v51 = vld [vmem:[#allocation25_spill] sm:$0xff]  ;;  %v14349_v58 = vld [vmem:[#allocation26_spill] sm:$0xff] }
 0x242   : > { %v1286_v57 = vadd.f32 %v1285_v63, %v435_v46  ;;  %v14350_v63 = vld [vmem:[#allocation27_spill] sm:$0xff] }
 0x244   : > { %v12807_v0 = vsel %vm1289_vm8, %v12251_v18, %v1286_v57  ;;  %v14343_v18 = vmov 0.0|0.0   ;;  %v14351_v57 = vld [vmem:[#allocation28_spill] sm:$0xff] }
 0x245   : > { %1907 = vmax.xlane.f32.xlu1 %v12807_v0 }
 0x2b7   : > { %v12810_v1 = vpop.xlane.xlu1 %1294 }
 0x2b8   : > { %v14255_v16 = vmax.f32 %v12810_v1, -1e+30 }
 0x2ba   : > { %v1297_v13 = vsub.f32 %v1290_v31, %v14255_v16 }
 0x2bc   : > { %v1298_v17 = vmul.f32 1.442695, %v1297_v13  ;;  %v14352_v13 = vld [vmem:[#allocation29_spill] sm:$0xff] }
 0x2be   : > { %11987 = vpow2.f32 %v1298_v17  ;;  %v14353_v17 = vld [vmem:[#allocation30_spill] sm:$0xff] }
 0x2c8   : > { %v12815_v4 = vpop.eup %11987 }
 0x2c9   : > { %8020 = vmatmul.mubr.f32.vlgmr.msra.gmra.mrb[8].mxu1 %v12815_v4  ;;  %v1371_v7 = vrot.slane %v12815_v4, 1  ;;  %v1443_v46 = vrot.slane %v12815_v4, 2  ;;  %v1515_v45 = vrot.slane %v12815_v4, 3  ;;  %v1587_v31 = vrot.slane %v12815_v4, 4 }
 0x2ca   : > { %10458 = vmatpush3.bf16.msra.mxu1 %v12361_v9  ;;  %8089 = vmatprep.mubr.msk.f32.mxu1 %vm12108_vm0, %v14319_v41  ;;  %v1659_v21 = vrot.slane %v12815_v4, 5  ;;  %v1803_v16 = vrot.slane %v12815_v4, 7 }
 0x2cb   : > { %8055 = vmatmul.mubr.f32.vlgmr.msra.gmra.mrb[10].mxu0 %v1371_v7  ;;  %10459 = vmatprep.subr.bf16.mxu1 %v14343_v18  ;;  %v14354_v7 = vld [vmem:[#allocation31_spill] sm:$0xff] }
 0x2cc   : > { %10482 = vmatpush3.bf16.msra.mxu0 %v12367_v14  ;;  %8124 = vmatprep.mubr.msk.f32.mxu0 %vm12108_vm0, %v14319_v41 }
 0x2cd   : > { %10483 = vmatprep.subr.bf16.mxu0 %v14343_v18 }
 0x2ce   : > { %10461 = vmatpush3.bf16.msra.mxu1 %v12374_v22 }
 0x2cf   : > { %10462 = vmatprep.subr.bf16.mxu1 %v14343_v18 }
 0x2d0   : > { %10485 = vmatpush3.bf16.msra.mxu0 %v12382_v26 }
 0x2d1   : > { %10486 = vmatprep.subr.bf16.mxu0 %v14343_v18 }
 0x2d2   : > { %10464 = vmatpush3.bf16.msra.mxu1 %v12390_v30 }
 0x2d3   : > { %10465 = vmatprep.subr.bf16.mxu1 %v14343_v18 }
 0x2d4   : > { %10488 = vmatpush3.bf16.msra.mxu0 %v12396_v35 }
 0x2d5   : > { %10489 = vmatprep.subr.bf16.mxu0 %v14343_v18 }
 0x2d6   : > { %10467 = vmatpush3.bf16.msra.mxu1 %v12402_v40 }
 0x2d7   : > { %10468 = vmatprep.subr.bf16.mxu1 %v14343_v18 }
 0x2d8   : > { %10491 = vmatpush3.bf16.msra.mxu0 %v12408_v44 }
 0x2d9   : > { %10492 = vmatprep.subr.bf16.mxu0 %v14343_v18 }
 0x2da   : > { %10470 = vmatpush3.bf16.msra.mxu1 %v12414_v49 }
 0x2db   : > { %10471 = vmatprep.subr.bf16.mxu1 %v14343_v18 }
 0x2dc   : > { %10494 = vmatpush3.bf16.msra.mxu0 %v12420_v53 }
 0x2dd   : > { %10495 = vmatprep.subr.bf16.mxu0 %v14343_v18 }
 0x2de   : > { %10473 = vmatpush3.bf16.msra.mxu1 %v12426_v59 }
 0x2df   : > { %10474 = vmatprep.subr.bf16.mxu1 %v14343_v18 }
 0x2e0   : > { %10497 = vmatpush3.bf16.msra.mxu0 %v12432_v62 }
 0x2e1   : > { %10498 = vmatprep.subr.bf16.mxu0 %v14343_v18 }
 0x2e2   : > { %10476 = vmatpush3.bf16.msra.mxu1 %v12438_v5 }
 0x2e3   : > { %10477 = vmatprep.subr.bf16.mxu1 %v14343_v18 }
 0x2e4   : > { %10500 = vmatpush3.bf16.msra.mxu0 %v12444_v8 }
 0x2e5   : > { %10501 = vmatprep.subr.bf16.mxu0 %v14343_v18 }
 0x2e6   : > { %10479 = vmatpush3.bf16.msra.mxu1 %v12450_v15 }
 0x2e7   : > { %10504 = vmatprep.subr.bf16.mxu1 %v14343_v18 }
 0x2e8   : > { %10503 = vmatpush3.bf16.msra.mxu0 %v12456_v23 }
 0x2e9   : > { %8090 = vmatmul.mubr.f32.vlgmr.msra.gmra.mrb[10].mxu1 %v1443_v46  ;;  %10528 = vmatprep.subr.bf16.mxu0 %v14343_v18  ;;  %v14355_v46 = vld [vmem:[#allocation32_spill] sm:$0xff] }
 0x2ea   : > { %10506 = vmatpush3.bf16.msra.mxu1 %v12462_v29  ;;  %8159 = vmatprep.mubr.msk.f32.mxu1 %vm12108_vm0, %v14319_v41 }
 0x2eb   : > { %8125 = vmatmul.mubr.f32.vlgmr.msra.gmra.mrb[12].mxu0 %v1515_v45  ;;  %10507 = vmatprep.subr.bf16.mxu1 %v14343_v18  ;;  %v14356_v45 = vld [vmem:[#allocation33_spill] sm:$0xff] }
 0x2ec   : > { %10530 = vmatpush3.bf16.msra.mxu0 %v12469_v37  ;;  %8194 = vmatprep.mubr.msk.f32.mxu0 %vm12108_vm0, %v14319_v41 }
 0x2ed   : > { %10531 = vmatprep.subr.bf16.mxu0 %v14343_v18 }
 0x2ee   : > { %10509 = vmatpush3.bf16.msra.mxu1 %v12476_v47 }
 0x2ef   : > { %10510 = vmatprep.subr.bf16.mxu1 %v14343_v18 }
 0x2f0   : > { %10533 = vmatpush3.bf16.msra.mxu0 %v12484_v54 }
 0x2f1   : > { %10534 = vmatprep.subr.bf16.mxu0 %v14343_v18 }
 0x2f2   : > { %10512 = vmatpush3.bf16.msra.mxu1 %v12492_v61 }
 0x2f3   : > { %10513 = vmatprep.subr.bf16.mxu1 %v14343_v18 }
 0x2f4   : > { %10536 = vmatpush3.bf16.msra.mxu0 %v12498_v6 }
 0x2f5   : > { %10537 = vmatprep.subr.bf16.mxu0 %v14343_v18 }
 0x2f6   : > { %10515 = vmatpush3.bf16.msra.mxu1 %v12504_v11 }
 0x2f7   : > { %10516 = vmatprep.subr.bf16.mxu1 %v14343_v18 }
 0x2f8   : > { %10539 = vmatpush3.bf16.msra.mxu0 %v12510_v24 }
 0x2f9   : > { %10540 = vmatprep.subr.bf16.mxu0 %v14343_v18 }
 0x2fa   : > { %10518 = vmatpush3.bf16.msra.mxu1 %v12516_v34 }
 0x2fb   : > { %10519 = vmatprep.subr.bf16.mxu1 %v14343_v18 }
 0x2fc   : > { %10542 = vmatpush3.bf16.msra.mxu0 %v12522_v43 }
 0x2fd   : > { %10543 = vmatprep.subr.bf16.mxu0 %v14343_v18 }
 0x2fe   : > { %10521 = vmatpush3.bf16.msra.mxu1 %v12528_v52 }
 0x2ff   : > { %10522 = vmatprep.subr.bf16.mxu1 %v14343_v18 }
 0x300   : > { %10545 = vmatpush3.bf16.msra.mxu0 %v12534_v3 }
 0x301   : > { %10546 = vmatprep.subr.bf16.mxu0 %v14343_v18 }
 0x302   : > { %10524 = vmatpush3.bf16.msra.mxu1 %v12540_v10 }
 0x303   : > { %10525 = vmatprep.subr.bf16.mxu1 %v14343_v18 }
 0x304   : > { %10548 = vmatpush3.bf16.msra.mxu0 %v14344_v12 }
 0x305   : > { %10549 = vmatprep.subr.bf16.mxu0 %v14343_v18 }
 0x306   : > { %10527 = vmatpush3.bf16.msra.mxu1 %v14345_v33 }
 0x307   : > { %10552 = vmatprep.subr.bf16.mxu1 %v14343_v18 }
 0x308   : > { %10551 = vmatpush3.bf16.msra.mxu0 %v14346_v27 }
 0x309   : > { %8160 = vmatmul.mubr.f32.vlgmr.msra.gmra.mrb[12].mxu1 %v1587_v31  ;;  %10576 = vmatprep.subr.bf16.mxu0 %v14343_v18  ;;  %v14357_v31 = vld [vmem:[#allocation37_spill] sm:$0xff] }
 0x30a   : > { %10554 = vmatpush3.bf16.msra.mxu1 %v14347_v39  ;;  %8229 = vmatprep.mubr.msk.f32.mxu1 %vm12108_vm0, %v14319_v41 }
 0x30b   : > { %8195 = vmatmul.mubr.f32.vlgmr.msra.gmra.mrb[14].mxu0 %v1659_v21  ;;  %10555 = vmatprep.subr.bf16.mxu1 %v14343_v18  ;;  %v1731_v21 = vrot.slane %v12815_v4, 6  ;;  %v12942_v4 = vpop.xlane.xlu1 %1907 }
 0x30c   : > { %10578 = vmatpush3.bf16.msra.mxu0 %v14348_v51  ;;  %8264 = vmatprep.mubr.msk.f32.mxu0 %vm12108_vm0, %v14319_v41 }
 0x30d   : > { %10579 = vmatprep.subr.bf16.mxu0 %v14343_v18 }
 0x30e   : > { %10557 = vmatpush3.bf16.msra.mxu1 %v14349_v58 }
 0x30f   : > { %10558 = vmatprep.subr.bf16.mxu1 %v14343_v18 }
 0x310   : > { %10581 = vmatpush3.bf16.msra.mxu0 %v14350_v63 }
 0x311   : > { %10582 = vmatprep.subr.bf16.mxu0 %v14343_v18 }
 0x312   : > { %10560 = vmatpush3.bf16.msra.mxu1 %v14351_v57 }
 0x313   : > { %10561 = vmatprep.subr.bf16.mxu1 %v14343_v18 }
 0x314   : > { %10584 = vmatpush3.bf16.msra.mxu0 %v14352_v13 }
 0x315   : > { %10585 = vmatprep.subr.bf16.mxu0 %v14343_v18 }
 0x316   : > { %10563 = vmatpush3.bf16.msra.mxu1 %v14353_v17 }
 0x317   : > { %10564 = vmatprep.subr.bf16.mxu1 %v14343_v18 }
 0x318   : > { %10587 = vmatpush3.bf16.msra.mxu0 %v14354_v7 }
 0x319   : > { %10588 = vmatprep.subr.bf16.mxu0 %v14343_v18 }
 0x31a   : > { %10566 = vmatpush3.bf16.msra.mxu1 %v14355_v46 }
 0x31b   : > { %10567 = vmatprep.subr.bf16.mxu1 %v14343_v18 }
 0x31c   : > { %10590 = vmatpush3.bf16.msra.mxu0 %v14356_v45 }
 0x31d   : > { %10591 = vmatprep.subr.bf16.mxu0 %v14343_v18 }
 0x31e   : > { %10569 = vmatpush3.bf16.msra.mxu1 %v12630_v56 }
 0x31f   : > { %10570 = vmatprep.subr.bf16.mxu1 %v14343_v18 }
 0x320   : > { %10593 = vmatpush3.bf16.msra.mxu0 %v12636_v19 }
 0x321   : > { %10594 = vmatprep.subr.bf16.mxu0 %v14343_v18 }
 0x322   : > { %10572 = vmatpush3.bf16.msra.mxu1 %v12642_v28 }
 0x323   : > { %10573 = vmatprep.subr.bf16.mxu1 %v14343_v18 }
 0x324   : > { %10596 = vmatpush3.bf16.msra.mxu0 %v14357_v31 }
 0x325   : > { %10597 = vmatprep.subr.bf16.mxu0 %v14343_v18 }
 0x326   : > { %10575 = vmatpush3.bf16.msra.mxu1 %v12654_v55  ;;  %v14358_v55 = vld [vmem:[#allocation5_spill] sm:$0xff] }
 0x327   : > { %10600 = vmatprep.subr.bf16.mxu1 %v14343_v18 }
 0x328   : > { %10599 = vmatpush3.bf16.msra.mxu0 %v12664_v2  ;;  %v14361_v2 = vld [vmem:[#allocation42_spill] sm:$0xff] }
 0x329   : > { %8230 = vmatmul.mubr.f32.vlgmr.msra.gmra.mrb[14].mxu1 %v1731_v21  ;;  %10624 = vmatprep.subr.bf16.mxu0 %v14343_v18  ;;  %v14359_v21 = vld [vmem:[#allocation41_spill] sm:$0xff] }
 0x32a   : > { %10602 = vmatpush3.bf16.msra.mxu1 %v12668_v20  ;;  %8299 = vmatprep.mubr.msk.f32.mxu1 %vm12108_vm0, %v14319_v41  ;;  %v14360_v20 = vld [vmem:[#allocation7_spill] sm:$0xff] }
 0x32b   : > { %8265 = vmatmul.mubr.f32.vlgmr.msra.gmra.mrb[16].mxu0 %v1803_v16  ;;  %10603 = vmatprep.subr.bf16.mxu1 %v14343_v18  ;;  %v14262_v16 = vmax.f32 %v12942_v4, -1e+30 }
 0x32c   : > { %10626 = vmatpush3.bf16.msra.mxu0 %v14358_v55  ;;  %8334 = vmatprep.mubr.msk.f32.mxu0 %vm12108_vm0, %v14319_v41 }
 0x32d   : > { %10627 = vmatprep.subr.bf16.mxu0 %v14343_v18 }
 0x32e   : > { %10605 = vmatpush3.bf16.msra.mxu1 %v14359_v21  ;;  %v1910_v21 = vsub.f32 %v12807_v0, %v14262_v16  ;;  %v14362_v0 = vld [vmem:[#allocation17_spill] sm:$0xff]  ;;  %v14364_v16 = vld [vmem:[#allocation19_spill] sm:$0xff] }
 0x32f   : > { %10606 = vmatprep.subr.bf16.mxu1 %v14343_v18 }
 0x330   : > { %10629 = vmatpush3.bf16.msra.mxu0 %v14360_v20  ;;  %v1911_v20 = vmul.f32 1.442695, %v1910_v21  ;;  %v14363_v21 = vld [vmem:[#allocation47_spill] sm:$0xff] }
 0x331   : > { %10630 = vmatprep.subr.bf16.mxu0 %v14343_v18 }
 0x332   : > { %10608 = vmatpush3.bf16.msra.mxu1 %v14361_v2  ;;  %11989 = vpow2.f32 %v1911_v20 }
 0x333   : > { %10609 = vmatprep.subr.bf16.mxu1 %v14343_v18 }
 0x334   : > { %10632 = vmatpush3.bf16.msra.mxu0 %v12276_v32 }
 0x335   : > { %10633 = vmatprep.subr.bf16.mxu0 %v14343_v18 }
 0x336   : > { %10611 = vmatpush3.bf16.msra.mxu1 %v12713_v60 }
 0x337   : > { %10612 = vmatprep.subr.bf16.mxu1 %v14343_v18 }
 0x338   : > { %10635 = vmatpush3.bf16.msra.mxu0 %v12288_v38 }
 0x339   : > { %10636 = vmatprep.subr.bf16.mxu0 %v14343_v18 }
 0x33a   : > { %10614 = vmatpush3.bf16.msra.mxu1 %v12728_v36 }
 0x33b   : > { %10615 = vmatprep.subr.bf16.mxu1 %v14343_v18 }
 0x33c   : > { %10638 = vmatpush3.bf16.msra.mxu0 %v12298_v42  ;;  %v11990_v20 = vpop.eup %11989 }
 0x33d   : > { %10639 = vmatprep.subr.bf16.mxu0 %v14343_v18 }
 0x33e   : > { %10617 = vmatpush3.bf16.msra.mxu1 %v12740_v50 }
 0x33f   : > { %10618 = vmatprep.subr.bf16.mxu1 %v14343_v18 }
 0x340   : > { %10641 = vmatpush3.bf16.msra.mxu0 %v12310_v48  ;;  %v14365_v48 = vld [vmem:[#allocation6_spill] sm:$0xff] }
 0x341   : > { %10642 = vmatprep.subr.bf16.mxu0 %v14343_v18 }
 0x342   : > { %10620 = vmatpush3.bf16.msra.mxu1 %v12752_v25  ;;  %v14368_v25 = vld [vmem:[#allocation12_spill] sm:$0xff] }
 0x343   : > { %10621 = vmatprep.subr.bf16.mxu1 %v14343_v18 }
 0x344   : > { %10644 = vmatpush3.bf16.msra.mxu0 %v14362_v0  ;;  %v14366_v0 = vld [vmem:[#allocation8_spill] sm:$0xff] }
 0x345   : > { %10645 = vmatprep.subr.bf16.mxu0 %v14343_v18 }
 0x346   : > { %10623 = vmatpush3.bf16.msra.mxu1 %v14363_v21  ;;  %v14367_v21 = vld [vmem:[#allocation10_spill] sm:$0xff] }
 0x347   : > { %10648 = vmatprep.subr.bf16.mxu1 %v14343_v18 }
 0x348   : > { %10647 = vmatpush3.bf16.msra.mxu0 %v14364_v16  ;;  %v14371_v16 = vld [vmem:[#allocation18_spill] sm:$0xff] }
 0x349   : > { %8300 = vmatmul.mubr.f32.vlgmr.msra.gmra.mrb[16].mxu1 %v11990_v20  ;;  %10672 = vmatprep.subr.bf16.mxu0 %v14343_v18  ;;  %v14369_v20 = vld [vmem:[#allocation14_spill] sm:$0xff] }
 0x34a   : > { %10650 = vmatpush3.bf16.msra.mxu1 %v14365_v48  ;;  %8369 = vmatprep.mubr.msk.f32.mxu1 %vm12108_vm0, %v14319_v41  ;;  %v14370_v48 = vld [vmem:[#allocation16_spill] sm:$0xff] }
 0x34b   : > { %10651 = vmatprep.subr.bf16.mxu1 %v14343_v18 }
 0x34e   : > { %10653 = vmatpush3.bf16.msra.mxu1 %v14366_v0  ;;  %v14372_v0 = vld [vmem:[#allocation20_spill] sm:$0xff] }
 0x34f   : > { %10654 = vmatprep.subr.bf16.mxu1 %v14343_v18 }
 0x352   : > { %10656 = vmatpush3.bf16.msra.mxu1 %v14367_v21 }
 0x353   : > { %10657 = vmatprep.subr.bf16.mxu1 %v14343_v18 }
 0x356   : > { %10659 = vmatpush3.bf16.msra.mxu1 %v14368_v25 }
 0x357   : > { %10660 = vmatprep.subr.bf16.mxu1 %v14343_v18 }
 0x35a   : > { %10662 = vmatpush3.bf16.msra.mxu1 %v14369_v20 }
 0x35b   : > { %10663 = vmatprep.subr.bf16.mxu1 %v14343_v18 }
 0x35e   : > { %10665 = vmatpush3.bf16.msra.mxu1 %v14370_v48 }
 0x35f   : > { %10666 = vmatprep.subr.bf16.mxu1 %v14343_v18 }
 0x362   : > { %10668 = vmatpush3.bf16.msra.mxu1 %v14371_v16 }
 0x363   : > { %10669 = vmatprep.subr.bf16.mxu1 %v14343_v18 }
 0x366   : > { %10671 = vmatpush3.bf16.msra.mxu1 %v14372_v0 }
 0x367   : > { %10696 = vmatprep.subr.bf16.mxu1 %v14343_v18 }
 0x39c   : > { %v1366_v21 = vpop.f32.mrb[8].mxu1 }
 0x39d   : > { %v8021_v25 = vpop.f32.mrb[9].mxu1 }
 0x39e   : > { %v1439_v50 = vpop.f32.mrb[10].mxu0 }
 0x39f   : > { %v1876_v42 = vrot.slane %v1439_v50, 7  ;;  %v8056_v36 = vpop.f32.mrb[11].mxu0 }
 0x3a1   : > { %v1896_v20 = vsel %vm1173_vm1, %v1366_v21, %v1876_v42 }
 0x3bc   : > { %v1511_v38 = vpop.f32.mrb[10].mxu1 }
 0x3bd   : > { %v1879_v60 = vrot.slane %v1511_v38, 6  ;;  %v8091_v48 = vpop.f32.mrb[11].mxu1 }
 0x3be   : > { %v1583_v32 = vpop.f32.mrb[12].mxu0 }
 0x3bf   : > { %v1897_v2 = vsel %vm1175_vm2, %v1896_v20, %v1879_v60  ;;  %v1882_v16 = vrot.slane %v1583_v32, 5  ;;  %v8126_v55 = vpop.f32.mrb[13].mxu0 }
 0x3c1   : > { %v1898_v31 = vsel %vm1177_vm3, %v1897_v2, %v1882_v16 }
 0x3dc   : > { %v1655_v0 = vpop.f32.mrb[12].mxu1 }
 0x3dd   : > { %v1885_v28 = vrot.slane %v1655_v0, 4  ;;  %v8161_v19 = vpop.f32.mrb[13].mxu1  ;;  %v6435_v0 = vld [vmem:[%s12236_s15 + $0x8] sm:$0xff] }
 0x3de   : > { %v1727_v56 = vpop.f32.mrb[14].mxu0 }
 0x3df   : > { %v1899_v50 = vsel %vm1179_vm4, %v1898_v31, %v1885_v28  ;;  %v1888_v36 = vrot.slane %v1727_v56, 3  ;;  %v8196_v25 = vpop.f32.mrb[15].mxu0  ;;  %v14373_v28 = vmax.f32 %v12810_v1, -1e+30 }
 0x3e1   : > { %v1900_v42 = vsel %vm1181_vm5, %v1899_v50, %v1888_v36 }
 0x3fc   : > { %v1799_v38 = vpop.f32.mrb[14].mxu1 }
 0x3fd   : > { %v1891_v48 = vrot.slane %v1799_v38, 2  ;;  %v8231_v21 = vpop.f32.mrb[15].mxu1 }
 0x3fe   : > { %v1871_v45 = vpop.f32.mrb[16].mxu0 }
 0x3ff   : > { %v1901_v32 = vsel %vm1183_vm6, %v1900_v42, %v1891_v48  ;;  %v1894_v55 = vrot.slane %v1871_v45, 1  ;;  %v8266_v60 = vpop.f32.mrb[17].mxu0  ;;  %v14374_v42 = vmax.f32 %v12942_v4, -1e+30 }
 0x401   : > { %v1902_v2 = vsel %vm1185_vm7, %v1901_v32, %v1894_v55 }
 0x402   : > { %11991 = vlog2.f32 %v1902_v2 }
 0x40c   : > { %v11992_v19 = vpop.eup %11991 }
 0x40d   : > { %v1904_v16 = vmul.f32 0.6931472, %v11992_v19 }
 0x40f   : > { %v1905_v56 = vadd.f32 %v1904_v16, %v14373_v28  ;;  %v14376_v28 = vld [vmem:[#allocation34_spill] sm:$0xff] }
 0x411   : > { %v1906_v31 = vadd.f32 %v6435_v0, %v1905_v56  ;;  %v14377_v56 = vld [vmem:[#allocation35_spill] sm:$0xff] }
 0x413   : > { %1989 = vmax.xlane.f32.xlu0 %v1906_v31 }
 0x41c   : > { %v1979_v20 = vpop.f32.mrb[16].mxu1 }
 0x41d   : > { %11993 = vlog2.f32 %v1979_v20  ;;  %v8301_v50 = vpop.f32.mrb[17].mxu1  ;;  %v14379_v20 = vld [vmem:[#allocation37_spill] sm:$0xff] }
 0x41e   : > { %v14380_v50 = vld [vmem:[#allocation38_spill] sm:$0xff] }
 0x427   : > { %v11994_v36 = vpop.eup %11993 }
 0x428   : > { %v1984_v25 = vmul.f32 0.6931472, %v11994_v36 }
 0x42a   : > { %v1985_v45 = vadd.f32 %v1984_v25, %v14374_v42  ;;  %v14381_v25 = vld [vmem:[#allocation39_spill] sm:$0xff] }
 0x42c   : > { %v13005_v38 = vadd.f32 %v6435_v0, %v1985_v45  ;;  %v14375_v0 = vld [vmem:[#allocation33_spill] sm:$0xff]  ;;  %v14382_v45 = vld [vmem:[#allocation40_spill] sm:$0xff] }
 0x42e   : > { %2602 = vmax.xlane.f32.xlu1 %v13005_v38 }
 0x4a0   : > { %v13008_v48 = vpop.xlane.xlu0 %1989 }
 0x4a1   : > { %v14285_v21 = vmax.f32 %v13008_v48, -1e+30 }
 0x4a3   : > { %v1992_v1 = vsub.f32 %v1906_v31, %v14285_v21  ;;  %v14378_v31 = vld [vmem:[#allocation36_spill] sm:$0xff] }
 0x4a5   : > { %v1993_v32 = vmul.f32 1.442695, %v1992_v1  ;;  %v14383_v1 = vld [vmem:[#allocation5_spill] sm:$0xff] }
 0x4a7   : > { %11995 = vpow2.f32 %v1993_v32  ;;  %v14384_v32 = vld [vmem:[#allocation41_spill] sm:$0xff] }
 0x4b1   : > { %v13013_v55 = vpop.eup %11995 }
 0x4b2   : > { %8335 = vmatmul.mubr.f32.vlgmr.msra.gmra.mrb[18].mxu0 %v13013_v55  ;;  %v2066_v4 = vrot.slane %v13013_v55, 1  ;;  %v2138_v60 = vrot.slane %v13013_v55, 2  ;;  %v2210_v2 = vrot.slane %v13013_v55, 3  ;;  %v2282_v19 = vrot.slane %v13013_v55, 4 }
 0x4b3   : > { %10674 = vmatpush3.bf16.msra.mxu0 %v12361_v9  ;;  %8404 = vmatprep.mubr.msk.f32.mxu0 %vm12108_vm0, %v14319_v41  ;;  %v2354_v16 = vrot.slane %v13013_v55, 5  ;;  %v2426_v36 = vrot.slane %v13013_v55, 6  ;;  %v2498_v42 = vrot.slane %v13013_v55, 7 }
 0x4b4   : > { %8370 = vmatmul.mubr.f32.vlgmr.msra.gmra.mrb[18].mxu1 %v2066_v4  ;;  %10675 = vmatprep.subr.bf16.mxu0 %v14343_v18  ;;  %v14385_v4 = vld [vmem:[#allocation7_spill] sm:$0xff] }
 0x4b5   : > { %10698 = vmatpush3.bf16.msra.mxu1 %v12367_v14  ;;  %8439 = vmatprep.mubr.msk.f32.mxu1 %vm12108_vm0, %v14319_v41 }
 0x4b6   : > { %10699 = vmatprep.subr.bf16.mxu1 %v14343_v18 }
 0x4b7   : > { %10677 = vmatpush3.bf16.msra.mxu0 %v12374_v22 }
 0x4b8   : > { %10678 = vmatprep.subr.bf16.mxu0 %v14343_v18 }
 0x4b9   : > { %10701 = vmatpush3.bf16.msra.mxu1 %v12382_v26 }
 0x4ba   : > { %10702 = vmatprep.subr.bf16.mxu1 %v14343_v18 }
 0x4bb   : > { %10680 = vmatpush3.bf16.msra.mxu0 %v12390_v30  ;;  %v13140_v55 = vpop.xlane.xlu1 %2602 }
 0x4bc   : > { %10681 = vmatprep.subr.bf16.mxu0 %v14343_v18 }
 0x4bd   : > { %10704 = vmatpush3.bf16.msra.mxu1 %v12396_v35 }
 0x4be   : > { %10705 = vmatprep.subr.bf16.mxu1 %v14343_v18 }
 0x4bf   : > { %10683 = vmatpush3.bf16.msra.mxu0 %v12402_v40 }
 0x4c0   : > { %10684 = vmatprep.subr.bf16.mxu0 %v14343_v18 }
 0x4c1   : > { %10707 = vmatpush3.bf16.msra.mxu1 %v12408_v44 }
 0x4c2   : > { %10708 = vmatprep.subr.bf16.mxu1 %v14343_v18 }
 0x4c3   : > { %10686 = vmatpush3.bf16.msra.mxu0 %v12414_v49 }
 0x4c4   : > { %10687 = vmatprep.subr.bf16.mxu0 %v14343_v18 }
 0x4c5   : > { %10710 = vmatpush3.bf16.msra.mxu1 %v12420_v53 }
 0x4c6   : > { %10711 = vmatprep.subr.bf16.mxu1 %v14343_v18 }
 0x4c7   : > { %10689 = vmatpush3.bf16.msra.mxu0 %v12426_v59 }
 0x4c8   : > { %10690 = vmatprep.subr.bf16.mxu0 %v14343_v18 }
 0x4c9   : > { %10713 = vmatpush3.bf16.msra.mxu1 %v12432_v62 }
 0x4ca   : > { %10714 = vmatprep.subr.bf16.mxu1 %v14343_v18 }
 0x4cb   : > { %10692 = vmatpush3.bf16.msra.mxu0 %v12438_v5 }
 0x4cc   : > { %10693 = vmatprep.subr.bf16.mxu0 %v14343_v18 }
 0x4cd   : > { %10716 = vmatpush3.bf16.msra.mxu1 %v12444_v8 }
 0x4ce   : > { %10717 = vmatprep.subr.bf16.mxu1 %v14343_v18 }
 0x4cf   : > { %10695 = vmatpush3.bf16.msra.mxu0 %v12450_v15 }
 0x4d0   : > { %10720 = vmatprep.subr.bf16.mxu0 %v14343_v18 }
 0x4d1   : > { %10719 = vmatpush3.bf16.msra.mxu1 %v12456_v23 }
 0x4d2   : > { %8405 = vmatmul.mubr.f32.vlgmr.msra.gmra.mrb[20].mxu0 %v2138_v60  ;;  %10744 = vmatprep.subr.bf16.mxu1 %v14343_v18  ;;  %v14286_v60 = vmax.f32 %v13140_v55, -1e+30 }
 0x4d3   : > { %10722 = vmatpush3.bf16.msra.mxu0 %v12462_v29  ;;  %8474 = vmatprep.mubr.msk.f32.mxu0 %vm12108_vm0, %v14319_v41 }
 0x4d4   : > { %8440 = vmatmul.mubr.f32.vlgmr.msra.gmra.mrb[20].mxu1 %v2210_v2  ;;  %10723 = vmatprep.subr.bf16.mxu0 %v14343_v18  ;;  %v14386_v2 = vld [vmem:[#allocation42_spill] sm:$0xff] }
 0x4d5   : > { %10746 = vmatpush3.bf16.msra.mxu1 %v12469_v37  ;;  %8509 = vmatprep.mubr.msk.f32.mxu1 %vm12108_vm0, %v14319_v41 }
 0x4d6   : > { %10747 = vmatprep.subr.bf16.mxu1 %v14343_v18 }
 0x4d7   : > { %10725 = vmatpush3.bf16.msra.mxu0 %v12476_v47 }
 0x4d8   : > { %10726 = vmatprep.subr.bf16.mxu0 %v14343_v18 }
 0x4d9   : > { %10749 = vmatpush3.bf16.msra.mxu1 %v12484_v54 }
 0x4da   : > { %10750 = vmatprep.subr.bf16.mxu1 %v14343_v18 }
 0x4db   : > { %10728 = vmatpush3.bf16.msra.mxu0 %v12492_v61 }
 0x4dc   : > { %10729 = vmatprep.subr.bf16.mxu0 %v14343_v18 }
 0x4dd   : > { %10752 = vmatpush3.bf16.msra.mxu1 %v12498_v6 }
 0x4de   : > { %10753 = vmatprep.subr.bf16.mxu1 %v14343_v18 }
 0x4df   : > { %10731 = vmatpush3.bf16.msra.mxu0 %v12504_v11 }
 0x4e0   : > { %10732 = vmatprep.subr.bf16.mxu0 %v14343_v18 }
 0x4e1   : > { %10755 = vmatpush3.bf16.msra.mxu1 %v12510_v24 }
 0x4e2   : > { %10756 = vmatprep.subr.bf16.mxu1 %v14343_v18 }
 0x4e3   : > { %10734 = vmatpush3.bf16.msra.mxu0 %v12516_v34 }
 0x4e4   : > { %10735 = vmatprep.subr.bf16.mxu0 %v14343_v18 }
 0x4e5   : > { %10758 = vmatpush3.bf16.msra.mxu1 %v12522_v43 }
 0x4e6   : > { %10759 = vmatprep.subr.bf16.mxu1 %v14343_v18 }
 0x4e7   : > { %10737 = vmatpush3.bf16.msra.mxu0 %v12528_v52 }
 0x4e8   : > { %10738 = vmatprep.subr.bf16.mxu0 %v14343_v18 }
 0x4e9   : > { %10761 = vmatpush3.bf16.msra.mxu1 %v12534_v3 }
 0x4ea   : > { %10762 = vmatprep.subr.bf16.mxu1 %v14343_v18 }
 0x4eb   : > { %10740 = vmatpush3.bf16.msra.mxu0 %v12540_v10 }
 0x4ec   : > { %10741 = vmatprep.subr.bf16.mxu0 %v14343_v18 }
 0x4ed   : > { %10764 = vmatpush3.bf16.msra.mxu1 %v14344_v12 }
 0x4ee   : > { %10765 = vmatprep.subr.bf16.mxu1 %v14343_v18 }
 0x4ef   : > { %10743 = vmatpush3.bf16.msra.mxu0 %v14345_v33 }
 0x4f0   : > { %10768 = vmatprep.subr.bf16.mxu0 %v14343_v18 }
 0x4f1   : > { %10767 = vmatpush3.bf16.msra.mxu1 %v14346_v27 }
 0x4f2   : > { %8475 = vmatmul.mubr.f32.vlgmr.msra.gmra.mrb[22].mxu0 %v2282_v19  ;;  %10792 = vmatprep.subr.bf16.mxu1 %v14343_v18  ;;  %v14387_v19 = vld [vmem:[#allocation9_spill] sm:$0xff] }
 0x4f3   : > { %10770 = vmatpush3.bf16.msra.mxu0 %v14347_v39  ;;  %8544 = vmatprep.mubr.msk.f32.mxu0 %vm12108_vm0, %v14319_v41 }
 0x4f4   : > { %8510 = vmatmul.mubr.f32.vlgmr.msra.gmra.mrb[22].mxu1 %v2354_v16  ;;  %10771 = vmatprep.subr.bf16.mxu0 %v14343_v18  ;;  %v2605_v16 = vsub.f32 %v13005_v38, %v14286_v60  ;;  %v14393_v38 = vld [vmem:[#allocation15_spill] sm:$0xff]  ;;  %v14394_v60 = vld [vmem:[#allocation46_spill] sm:$0xff] }
 0x4f5   : > { %10794 = vmatpush3.bf16.msra.mxu1 %v14348_v51  ;;  %8579 = vmatprep.mubr.msk.f32.mxu1 %vm12108_vm0, %v14319_v41 }
 0x4f6   : > { %10795 = vmatprep.subr.bf16.mxu1 %v14343_v18  ;;  %v2606_v21 = vmul.f32 1.442695, %v2605_v16  ;;  %v14395_v16 = vld [vmem:[#allocation17_spill] sm:$0xff] }
 0x4f7   : > { %10773 = vmatpush3.bf16.msra.mxu0 %v14349_v58 }
 0x4f8   : > { %10774 = vmatprep.subr.bf16.mxu0 %v14343_v18  ;;  %11997 = vpow2.f32 %v2606_v21 }
 0x4f9   : > { %10797 = vmatpush3.bf16.msra.mxu1 %v14350_v63 }
 0x4fa   : > { %10798 = vmatprep.subr.bf16.mxu1 %v14343_v18 }
 0x4fb   : > { %10776 = vmatpush3.bf16.msra.mxu0 %v14351_v57 }
 0x4fc   : > { %10777 = vmatprep.subr.bf16.mxu0 %v14343_v18 }
 0x4fd   : > { %10800 = vmatpush3.bf16.msra.mxu1 %v14352_v13 }
 0x4fe   : > { %10801 = vmatprep.subr.bf16.mxu1 %v14343_v18 }
 0x4ff   : > { %10779 = vmatpush3.bf16.msra.mxu0 %v14353_v17 }
 0x500   : > { %10780 = vmatprep.subr.bf16.mxu0 %v14343_v18 }
 0x501   : > { %10803 = vmatpush3.bf16.msra.mxu1 %v14354_v7 }
 0x502   : > { %10804 = vmatprep.subr.bf16.mxu1 %v14343_v18  ;;  %v11998_v21 = vpop.eup %11997 }
 0x503   : > { %10782 = vmatpush3.bf16.msra.mxu0 %v14355_v46 }
 0x504   : > { %10783 = vmatprep.subr.bf16.mxu0 %v14343_v18 }
 0x505   : > { %10806 = vmatpush3.bf16.msra.mxu1 %v14375_v0 }
 0x506   : > { %10807 = vmatprep.subr.bf16.mxu1 %v14343_v18 }
 0x507   : > { %10785 = vmatpush3.bf16.msra.mxu0 %v14376_v28 }
 0x508   : > { %10786 = vmatprep.subr.bf16.mxu0 %v14343_v18 }
 0x509   : > { %10809 = vmatpush3.bf16.msra.mxu1 %v14377_v56 }
 0x50a   : > { %10810 = vmatprep.subr.bf16.mxu1 %v14343_v18 }
 0x50b   : > { %10788 = vmatpush3.bf16.msra.mxu0 %v14378_v31 }
 0x50c   : > { %10789 = vmatprep.subr.bf16.mxu0 %v14343_v18 }
 0x50d   : > { %10812 = vmatpush3.bf16.msra.mxu1 %v14379_v20 }
 0x50e   : > { %10813 = vmatprep.subr.bf16.mxu1 %v14343_v18 }
 0x50f   : > { %10791 = vmatpush3.bf16.msra.mxu0 %v14380_v50 }
 0x510   : > { %10816 = vmatprep.subr.bf16.mxu0 %v14343_v18 }
 0x511   : > { %10815 = vmatpush3.bf16.msra.mxu1 %v14381_v25 }
 0x512   : > { %8545 = vmatmul.mubr.f32.vlgmr.msra.gmra.mrb[24].mxu0 %v2426_v36  ;;  %10840 = vmatprep.subr.bf16.mxu1 %v14343_v18  ;;  %v14388_v36 = vld [vmem:[#allocation43_spill] sm:$0xff] }
 0x513   : > { %10818 = vmatpush3.bf16.msra.mxu0 %v14382_v45  ;;  %8614 = vmatprep.mubr.msk.f32.mxu0 %vm12108_vm0, %v14319_v41 }
 0x514   : > { %8580 = vmatmul.mubr.f32.vlgmr.msra.gmra.mrb[24].mxu1 %v2498_v42  ;;  %10819 = vmatprep.subr.bf16.mxu0 %v14343_v18  ;;  %v14389_v42 = vld [vmem:[#allocation11_spill] sm:$0xff] }
 0x515   : > { %10842 = vmatpush3.bf16.msra.mxu1 %v14383_v1  ;;  %8649 = vmatprep.mubr.msk.f32.mxu1 %vm12108_vm0, %v14319_v41 }
 0x516   : > { %10843 = vmatprep.subr.bf16.mxu1 %v14343_v18 }
 0x517   : > { %10821 = vmatpush3.bf16.msra.mxu0 %v14384_v32 }
 0x518   : > { %10822 = vmatprep.subr.bf16.mxu0 %v14343_v18 }
 0x519   : > { %10845 = vmatpush3.bf16.msra.mxu1 %v14385_v4  ;;  %v14392_v4 = vld [vmem:[#allocation45_spill] sm:$0xff] }
 0x51a   : > { %10846 = vmatprep.subr.bf16.mxu1 %v14343_v18 }
 0x51b   : > { %10824 = vmatpush3.bf16.msra.mxu0 %v14386_v2  ;;  %v14390_v2 = vld [vmem:[#allocation44_spill] sm:$0xff] }
 0x51c   : > { %10825 = vmatprep.subr.bf16.mxu0 %v14343_v18 }
 0x51d   : > { %10848 = vmatpush3.bf16.msra.mxu1 %v14387_v19  ;;  %v14391_v19 = vld [vmem:[#allocation13_spill] sm:$0xff] }
 0x51e   : > { %10849 = vmatprep.subr.bf16.mxu1 %v14343_v18 }
 0x51f   : > { %10827 = vmatpush3.bf16.msra.mxu0 %v14388_v36 }
 0x520   : > { %10828 = vmatprep.subr.bf16.mxu0 %v14343_v18 }
 0x521   : > { %10851 = vmatpush3.bf16.msra.mxu1 %v14389_v42 }
 0x522   : > { %10852 = vmatprep.subr.bf16.mxu1 %v14343_v18 }
 0x523   : > { %10830 = vmatpush3.bf16.msra.mxu0 %v14390_v2 }
 0x524   : > { %10831 = vmatprep.subr.bf16.mxu0 %v14343_v18 }
 0x525   : > { %10854 = vmatpush3.bf16.msra.mxu1 %v14391_v19  ;;  %v14396_v19 = vld [vmem:[#allocation47_spill] sm:$0xff] }
 0x526   : > { %10855 = vmatprep.subr.bf16.mxu1 %v14343_v18 }
 0x527   : > { %10833 = vmatpush3.bf16.msra.mxu0 %v14392_v4  ;;  %v14397_v4 = vld [vmem:[#allocation19_spill] sm:$0xff] }
 0x528   : > { %10834 = vmatprep.subr.bf16.mxu0 %v14343_v18 }
 0x529   : > { %10857 = vmatpush3.bf16.msra.mxu1 %v14393_v38  ;;  %v14398_v38 = vld [vmem:[#allocation6_spill] sm:$0xff] }
 0x52a   : > { %10858 = vmatprep.subr.bf16.mxu1 %v14343_v18 }
 0x52b   : > { %10836 = vmatpush3.bf16.msra.mxu0 %v14394_v60  ;;  %v14401_v60 = vld [vmem:[#allocation12_spill] sm:$0xff] }
 0x52c   : > { %10837 = vmatprep.subr.bf16.mxu0 %v14343_v18 }
 0x52d   : > { %10860 = vmatpush3.bf16.msra.mxu1 %v14395_v16  ;;  %v14399_v16 = vld [vmem:[#allocation8_spill] sm:$0xff] }
 0x52e   : > { %10861 = vmatprep.subr.bf16.mxu1 %v14343_v18 }
 0x52f   : > { %10839 = vmatpush3.bf16.msra.mxu0 %v14396_v19  ;;  %v14400_v19 = vld [vmem:[#allocation10_spill] sm:$0xff] }
 0x530   : > { %10864 = vmatprep.subr.bf16.mxu0 %v14343_v18 }
 0x531   : > { %10863 = vmatpush3.bf16.msra.mxu1 %v14397_v4  ;;  %v14404_v4 = vld [vmem:[#allocation18_spill] sm:$0xff] }
 0x532   : > { %8615 = vmatmul.mubr.f32.vlgmr.msra.gmra.mrb[26].mxu0 %v11998_v21  ;;  %10888 = vmatprep.subr.bf16.mxu1 %v14343_v18  ;;  %v14402_v21 = vld [vmem:[#allocation14_spill] sm:$0xff] }
 0x533   : > { %10866 = vmatpush3.bf16.msra.mxu0 %v14398_v38  ;;  %8684 = vmatprep.mubr.msk.f32.mxu0 %vm12108_vm0, %v14319_v41  ;;  %v14403_v38 = vld [vmem:[#allocation16_spill] sm:$0xff] }
 0x534   : > { %10867 = vmatprep.subr.bf16.mxu0 %v14343_v18 }
 0x537   : > { %10869 = vmatpush3.bf16.msra.mxu0 %v14399_v16  ;;  %v14405_v16 = vld [vmem:[#allocation20_spill] sm:$0xff] }
 0x538   : > { %10870 = vmatprep.subr.bf16.mxu0 %v14343_v18 }
 0x53b   : > { %10872 = vmatpush3.bf16.msra.mxu0 %v14400_v19 }
 0x53c   : > { %10873 = vmatprep.subr.bf16.mxu0 %v14343_v18 }
 0x53f   : > { %10875 = vmatpush3.bf16.msra.mxu0 %v14401_v60 }
 0x540   : > { %10876 = vmatprep.subr.bf16.mxu0 %v14343_v18 }
 0x543   : > { %10878 = vmatpush3.bf16.msra.mxu0 %v14402_v21 }
 0x544   : > { %10879 = vmatprep.subr.bf16.mxu0 %v14343_v18 }
 0x547   : > { %10881 = vmatpush3.bf16.msra.mxu0 %v14403_v38 }
 0x548   : > { %10882 = vmatprep.subr.bf16.mxu0 %v14343_v18 }
 0x54b   : > { %10884 = vmatpush3.bf16.msra.mxu0 %v14404_v4 }
 0x54c   : > { %10885 = vmatprep.subr.bf16.mxu0 %v14343_v18 }
 0x54f   : > { %10887 = vmatpush3.bf16.msra.mxu0 %v14405_v16 }
 0x550   : > { %10912 = vmatprep.subr.bf16.mxu0 %v14343_v18 }
 0x585   : > { %v2061_v19 = vpop.f32.mrb[18].mxu0 }
 0x586   : > { %v8336_v60 = vpop.f32.mrb[19].mxu0 }
 0x587   : > { %v2134_v2 = vpop.f32.mrb[18].mxu1 }
 0x588   : > { %v2571_v42 = vrot.slane %v2134_v2, 7  ;;  %v8371_v36 = vpop.f32.mrb[19].mxu1 }
 0x58a   : > { %v2591_v21 = vsel %vm1173_vm1, %v2061_v19, %v2571_v42 }
 0x5a5   : > { %v2206_v32 = vpop.f32.mrb[20].mxu0 }
 0x5a6   : > { %v2574_v1 = vrot.slane %v2206_v32, 6  ;;  %v8406_v38 = vpop.f32.mrb[21].mxu0 }
 0x5a7   : > { %v2278_v45 = vpop.f32.mrb[20].mxu1 }
 0x5a8   : > { %v2592_v25 = vsel %vm1175_vm2, %v2591_v21, %v2574_v1  ;;  %v2577_v4 = vrot.slane %v2278_v45, 5  ;;  %v8441_v50 = vpop.f32.mrb[21].mxu1 }
 0x5aa   : > { %v2593_v20 = vsel %vm1177_vm3, %v2592_v25, %v2577_v4 }
 0x5c5   : > { %v2350_v16 = vpop.f32.mrb[22].mxu0 }
 0x5c6   : > { %v2580_v31 = vrot.slane %v2350_v16, 4  ;;  %v8476_v56 = vpop.f32.mrb[23].mxu0  ;;  %v6436_v16 = vld [vmem:[%s12236_s15 + $0x10] sm:$0xff] }
 0x5c7   : > { %v2422_v28 = vpop.f32.mrb[22].mxu1 }
 0x5c8   : > { %v2594_v60 = vsel %vm1179_vm4, %v2593_v20, %v2580_v31  ;;  %v2583_v2 = vrot.slane %v2422_v28, 3  ;;  %v8511_v36 = vpop.f32.mrb[23].mxu1  ;;  %v14406_v31 = vmax.f32 %v13008_v48, -1e+30 }
 0x5ca   : > { %v2595_v19 = vsel %vm1181_vm5, %v2594_v60, %v2583_v2 }
 0x5e5   : > { %v2494_v32 = vpop.f32.mrb[24].mxu0 }
 0x5e6   : > { %v2586_v42 = vrot.slane %v2494_v32, 2  ;;  %v8546_v38 = vpop.f32.mrb[25].mxu0 }
 0x5e7   : > { %v2566_v0 = vpop.f32.mrb[24].mxu1 }
 0x5e8   : > { %v2596_v45 = vsel %vm1183_vm6, %v2595_v19, %v2586_v42  ;;  %v2589_v50 = vrot.slane %v2566_v0, 1  ;;  %v8581_v1 = vpop.f32.mrb[25].mxu1  ;;  %v14407_v19 = vmax.f32 %v13140_v55, -1e+30 }
 0x5ea   : > { %v2597_v25 = vsel %vm1185_vm7, %v2596_v45, %v2589_v50 }
 0x5eb   : > { %11999 = vlog2.f32 %v2597_v25 }
 0x5f5   : > { %v12000_v56 = vpop.eup %11999 }
 0x5f6   : > { %v2599_v4 = vmul.f32 0.6931472, %v12000_v56 }
 0x5f8   : > { %v2600_v28 = vadd.f32 %v2599_v4, %v14406_v31  ;;  %v14409_v31 = vld [vmem:[#allocation34_spill] sm:$0xff] }
 0x5fa   : > { %v2601_v20 = vadd.f32 %v6436_v16, %v2600_v28  ;;  %v14410_v28 = vld [vmem:[#allocation35_spill] sm:$0xff] }
 0x5fc   : > { %2684 = vmax.xlane.f32.xlu0 %v2601_v20 }
 0x605   : > { %v2674_v21 = vpop.f32.mrb[26].mxu0 }
 0x606   : > { %12001 = vlog2.f32 %v2674_v21  ;;  %v8616_v60 = vpop.f32.mrb[27].mxu0  ;;  %v14412_v21 = vld [vmem:[#allocation37_spill] sm:$0xff] }
 0x607   : > { %v14413_v60 = vld [vmem:[#allocation38_spill] sm:$0xff] }
 0x610   : > { %v12002_v2 = vpop.eup %12001 }
 0x611   : > { %v2679_v36 = vmul.f32 0.6931472, %v12002_v2 }
 0x613   : > { %v2680_v0 = vadd.f32 %v2679_v36, %v14407_v19  ;;  %v14414_v36 = vld [vmem:[#allocation39_spill] sm:$0xff] }
 0x615   : > { %v13203_v32 = vadd.f32 %v6436_v16, %v2680_v0  ;;  %v14408_v16 = vld [vmem:[#allocation33_spill] sm:$0xff]  ;;  %v14415_v0 = vld [vmem:[#allocation40_spill] sm:$0xff] }
 0x617   : > { %3297 = vmax.xlane.f32.xlu1 %v13203_v32 }
 0x689   : > { %v13206_v42 = vpop.xlane.xlu0 %2684 }
 0x68a   : > { %v14287_v38 = vmax.f32 %v13206_v42, -1e+30 }
 0x68c   : > { %v2687_v48 = vsub.f32 %v2601_v20, %v14287_v38  ;;  %v14411_v20 = vld [vmem:[#allocation36_spill] sm:$0xff] }
 0x68e   : > { %v2688_v45 = vmul.f32 1.442695, %v2687_v48  ;;  %v14416_v48 = vld [vmem:[#allocation5_spill] sm:$0xff] }
 0x690   : > { %12003 = vpow2.f32 %v2688_v45  ;;  %v14417_v45 = vld [vmem:[#allocation41_spill] sm:$0xff] }
 0x69a   : > { %v13211_v50 = vpop.eup %12003 }
 0x69b   : > { %8650 = vmatmul.mubr.f32.vlgmr.msra.gmra.mrb[26].mxu1 %v13211_v50  ;;  %v2761_v55 = vrot.slane %v13211_v50, 1  ;;  %v2833_v1 = vrot.slane %v13211_v50, 2  ;;  %v2905_v25 = vrot.slane %v13211_v50, 3  ;;  %v2977_v56 = vrot.slane %v13211_v50, 4 }
 0x69c   : > { %10890 = vmatpush3.bf16.msra.mxu1 %v12361_v9  ;;  %8719 = vmatprep.mubr.msk.f32.mxu1 %vm12108_vm0, %v14319_v41  ;;  %v3049_v4 = vrot.slane %v13211_v50, 5  ;;  %v3121_v2 = vrot.slane %v13211_v50, 6  ;;  %v3193_v19 = vrot.slane %v13211_v50, 7 }
 0x69d   : > { %8685 = vmatmul.mubr.f32.vlgmr.msra.gmra.mrb[28].mxu0 %v2761_v55  ;;  %10891 = vmatprep.subr.bf16.mxu1 %v14343_v18  ;;  %v14418_v55 = vld [vmem:[#allocation7_spill] sm:$0xff] }
 0x69e   : > { %10914 = vmatpush3.bf16.msra.mxu0 %v12367_v14  ;;  %8754 = vmatprep.mubr.msk.f32.mxu0 %vm12108_vm0, %v14319_v41 }
 0x69f   : > { %10915 = vmatprep.subr.bf16.mxu0 %v14343_v18 }
 0x6a0   : > { %10893 = vmatpush3.bf16.msra.mxu1 %v12374_v22 }
 0x6a1   : > { %10894 = vmatprep.subr.bf16.mxu1 %v14343_v18 }
 0x6a2   : > { %10917 = vmatpush3.bf16.msra.mxu0 %v12382_v26 }
 0x6a3   : > { %10918 = vmatprep.subr.bf16.mxu0 %v14343_v18 }
 0x6a4   : > { %10896 = vmatpush3.bf16.msra.mxu1 %v12390_v30  ;;  %v13338_v50 = vpop.xlane.xlu1 %3297 }
 0x6a5   : > { %10897 = vmatprep.subr.bf16.mxu1 %v14343_v18 }
 0x6a6   : > { %10920 = vmatpush3.bf16.msra.mxu0 %v12396_v35 }
 0x6a7   : > { %10921 = vmatprep.subr.bf16.mxu0 %v14343_v18 }
 0x6a8   : > { %10899 = vmatpush3.bf16.msra.mxu1 %v12402_v40 }
 0x6a9   : > { %10900 = vmatprep.subr.bf16.mxu1 %v14343_v18 }
 0x6aa   : > { %10923 = vmatpush3.bf16.msra.mxu0 %v12408_v44 }
 0x6ab   : > { %10924 = vmatprep.subr.bf16.mxu0 %v14343_v18 }
 0x6ac   : > { %10902 = vmatpush3.bf16.msra.mxu1 %v12414_v49 }
 0x6ad   : > { %10903 = vmatprep.subr.bf16.mxu1 %v14343_v18 }
 0x6ae   : > { %10926 = vmatpush3.bf16.msra.mxu0 %v12420_v53 }
 0x6af   : > { %10927 = vmatprep.subr.bf16.mxu0 %v14343_v18 }
 0x6b0   : > { %10905 = vmatpush3.bf16.msra.mxu1 %v12426_v59 }
 0x6b1   : > { %10906 = vmatprep.subr.bf16.mxu1 %v14343_v18 }
 0x6b2   : > { %10929 = vmatpush3.bf16.msra.mxu0 %v12432_v62 }
 0x6b3   : > { %10930 = vmatprep.subr.bf16.mxu0 %v14343_v18 }
 0x6b4   : > { %10908 = vmatpush3.bf16.msra.mxu1 %v12438_v5 }
 0x6b5   : > { %10909 = vmatprep.subr.bf16.mxu1 %v14343_v18 }
 0x6b6   : > { %10932 = vmatpush3.bf16.msra.mxu0 %v12444_v8 }
 0x6b7   : > { %10933 = vmatprep.subr.bf16.mxu0 %v14343_v18 }
 0x6b8   : > { %10911 = vmatpush3.bf16.msra.mxu1 %v12450_v15 }
 0x6b9   : > { %10936 = vmatprep.subr.bf16.mxu1 %v14343_v18 }
 0x6ba   : > { %10935 = vmatpush3.bf16.msra.mxu0 %v12456_v23 }
 0x6bb   : > { %8720 = vmatmul.mubr.f32.vlgmr.msra.gmra.mrb[28].mxu1 %v2833_v1  ;;  %10960 = vmatprep.subr.bf16.mxu0 %v14343_v18  ;;  %v14288_v1 = vmax.f32 %v13338_v50, -1e+30 }
 0x6bc   : > { %10938 = vmatpush3.bf16.msra.mxu1 %v12462_v29  ;;  %8789 = vmatprep.mubr.msk.f32.mxu1 %vm12108_vm0, %v14319_v41 }
 0x6bd   : > { %8755 = vmatmul.mubr.f32.vlgmr.msra.gmra.mrb[30].mxu0 %v2905_v25  ;;  %10939 = vmatprep.subr.bf16.mxu1 %v14343_v18  ;;  %v14419_v25 = vld [vmem:[#allocation42_spill] sm:$0xff] }
 0x6be   : > { %10962 = vmatpush3.bf16.msra.mxu0 %v12469_v37  ;;  %8824 = vmatprep.mubr.msk.f32.mxu0 %vm12108_vm0, %v14319_v41 }
 0x6bf   : > { %10963 = vmatprep.subr.bf16.mxu0 %v14343_v18 }
 0x6c0   : > { %10941 = vmatpush3.bf16.msra.mxu1 %v12476_v47 }
 0x6c1   : > { %10942 = vmatprep.subr.bf16.mxu1 %v14343_v18 }
 0x6c2   : > { %10965 = vmatpush3.bf16.msra.mxu0 %v12484_v54 }
 0x6c3   : > { %10966 = vmatprep.subr.bf16.mxu0 %v14343_v18 }
 0x6c4   : > { %10944 = vmatpush3.bf16.msra.mxu1 %v12492_v61 }
 0x6c5   : > { %10945 = vmatprep.subr.bf16.mxu1 %v14343_v18 }
 0x6c6   : > { %10968 = vmatpush3.bf16.msra.mxu0 %v12498_v6 }
 0x6c7   : > { %10969 = vmatprep.subr.bf16.mxu0 %v14343_v18 }
 0x6c8   : > { %10947 = vmatpush3.bf16.msra.mxu1 %v12504_v11 }
 0x6c9   : > { %10948 = vmatprep.subr.bf16.mxu1 %v14343_v18 }
 0x6ca   : > { %10971 = vmatpush3.bf16.msra.mxu0 %v12510_v24 }
 0x6cb   : > { %10972 = vmatprep.subr.bf16.mxu0 %v14343_v18 }
 0x6cc   : > { %10950 = vmatpush3.bf16.msra.mxu1 %v12516_v34 }
 0x6cd   : > { %10951 = vmatprep.subr.bf16.mxu1 %v14343_v18 }
 0x6ce   : > { %10974 = vmatpush3.bf16.msra.mxu0 %v12522_v43 }
 0x6cf   : > { %10975 = vmatprep.subr.bf16.mxu0 %v14343_v18 }
 0x6d0   : > { %10953 = vmatpush3.bf16.msra.mxu1 %v12528_v52 }
 0x6d1   : > { %10954 = vmatprep.subr.bf16.mxu1 %v14343_v18 }
 0x6d2   : > { %10977 = vmatpush3.bf16.msra.mxu0 %v12534_v3 }
 0x6d3   : > { %10978 = vmatprep.subr.bf16.mxu0 %v14343_v18 }
 0x6d4   : > { %10956 = vmatpush3.bf16.msra.mxu1 %v12540_v10 }
 0x6d5   : > { %10957 = vmatprep.subr.bf16.mxu1 %v14343_v18 }
 0x6d6   : > { %10980 = vmatpush3.bf16.msra.mxu0 %v14344_v12 }
 0x6d7   : > { %10981 = vmatprep.subr.bf16.mxu0 %v14343_v18 }
 0x6d8   : > { %10959 = vmatpush3.bf16.msra.mxu1 %v14345_v33 }
 0x6d9   : > { %10984 = vmatprep.subr.bf16.mxu1 %v14343_v18 }
 0x6da   : > { %10983 = vmatpush3.bf16.msra.mxu0 %v14346_v27 }
 0x6db   : > { %8790 = vmatmul.mubr.f32.vlgmr.msra.gmra.mrb[30].mxu1 %v2977_v56  ;;  %11008 = vmatprep.subr.bf16.mxu0 %v14343_v18  ;;  %v14420_v56 = vld [vmem:[#allocation9_spill] sm:$0xff] }
 0x6dc   : > { %10986 = vmatpush3.bf16.msra.mxu1 %v14347_v39  ;;  %8859 = vmatprep.mubr.msk.f32.mxu1 %vm12108_vm0, %v14319_v41 }
 0x6dd   : > { %8825 = vmatmul.mubr.f32.vlgmr.msra.gmra.mrb[32].mxu0 %v3049_v4  ;;  %10987 = vmatprep.subr.bf16.mxu1 %v14343_v18  ;;  %v3300_v4 = vsub.f32 %v13203_v32, %v14288_v1  ;;  %v14426_v32 = vld [vmem:[#allocation15_spill] sm:$0xff]  ;;  %v14427_v1 = vld [vmem:[#allocation46_spill] sm:$0xff] }
 0x6de   : > { %11010 = vmatpush3.bf16.msra.mxu0 %v14348_v51  ;;  %8894 = vmatprep.mubr.msk.f32.mxu0 %vm12108_vm0, %v14319_v41 }
 0x6df   : > { %11011 = vmatprep.subr.bf16.mxu0 %v14343_v18  ;;  %v3301_v38 = vmul.f32 1.442695, %v3300_v4  ;;  %v14428_v4 = vld [vmem:[#allocation17_spill] sm:$0xff] }
 0x6e0   : > { %10989 = vmatpush3.bf16.msra.mxu1 %v14349_v58 }
 0x6e1   : > { %10990 = vmatprep.subr.bf16.mxu1 %v14343_v18  ;;  %12005 = vpow2.f32 %v3301_v38 }
 0x6e2   : > { %11013 = vmatpush3.bf16.msra.mxu0 %v14350_v63 }
 0x6e3   : > { %11014 = vmatprep.subr.bf16.mxu0 %v14343_v18 }
 0x6e4   : > { %10992 = vmatpush3.bf16.msra.mxu1 %v14351_v57 }
 0x6e5   : > { %10993 = vmatprep.subr.bf16.mxu1 %v14343_v18 }
 0x6e6   : > { %11016 = vmatpush3.bf16.msra.mxu0 %v14352_v13 }
 0x6e7   : > { %11017 = vmatprep.subr.bf16.mxu0 %v14343_v18 }
 0x6e8   : > { %10995 = vmatpush3.bf16.msra.mxu1 %v14353_v17 }
 0x6e9   : > { %10996 = vmatprep.subr.bf16.mxu1 %v14343_v18 }
 0x6ea   : > { %11019 = vmatpush3.bf16.msra.mxu0 %v14354_v7 }
 0x6eb   : > { %11020 = vmatprep.subr.bf16.mxu0 %v14343_v18  ;;  %v12006_v38 = vpop.eup %12005 }
 0x6ec   : > { %10998 = vmatpush3.bf16.msra.mxu1 %v14355_v46 }
 0x6ed   : > { %10999 = vmatprep.subr.bf16.mxu1 %v14343_v18 }
 0x6ee   : > { %11022 = vmatpush3.bf16.msra.mxu0 %v14408_v16 }
 0x6ef   : > { %11023 = vmatprep.subr.bf16.mxu0 %v14343_v18 }
 0x6f0   : > { %11001 = vmatpush3.bf16.msra.mxu1 %v14409_v31 }
 0x6f1   : > { %11002 = vmatprep.subr.bf16.mxu1 %v14343_v18 }
 0x6f2   : > { %11025 = vmatpush3.bf16.msra.mxu0 %v14410_v28 }
 0x6f3   : > { %11026 = vmatprep.subr.bf16.mxu0 %v14343_v18 }
 0x6f4   : > { %11004 = vmatpush3.bf16.msra.mxu1 %v14411_v20 }
 0x6f5   : > { %11005 = vmatprep.subr.bf16.mxu1 %v14343_v18 }
 0x6f6   : > { %11028 = vmatpush3.bf16.msra.mxu0 %v14412_v21 }
 0x6f7   : > { %11029 = vmatprep.subr.bf16.mxu0 %v14343_v18 }
 0x6f8   : > { %11007 = vmatpush3.bf16.msra.mxu1 %v14413_v60 }
 0x6f9   : > { %11032 = vmatprep.subr.bf16.mxu1 %v14343_v18 }
 0x6fa   : > { %11031 = vmatpush3.bf16.msra.mxu0 %v14414_v36 }
 0x6fb   : > { %8860 = vmatmul.mubr.f32.vlgmr.msra.gmra.mrb[32].mxu1 %v3121_v2  ;;  %11056 = vmatprep.subr.bf16.mxu0 %v14343_v18  ;;  %v14421_v2 = vld [vmem:[#allocation43_spill] sm:$0xff] }
 0x6fc   : > { %11034 = vmatpush3.bf16.msra.mxu1 %v14415_v0  ;;  %8929 = vmatprep.mubr.msk.f32.mxu1 %vm12108_vm0, %v14319_v41 }
 0x6fd   : > { %8895 = vmatmul.mubr.f32.vlgmr.msra.gmra.mrb[34].mxu0 %v3193_v19  ;;  %11035 = vmatprep.subr.bf16.mxu1 %v14343_v18  ;;  %v14422_v19 = vld [vmem:[#allocation11_spill] sm:$0xff] }
 0x6fe   : > { %11058 = vmatpush3.bf16.msra.mxu0 %v14416_v48  ;;  %8964 = vmatprep.mubr.msk.f32.mxu0 %vm12108_vm0, %v14319_v41 }
 0x6ff   : > { %11059 = vmatprep.subr.bf16.mxu0 %v14343_v18 }
 0x700   : > { %11037 = vmatpush3.bf16.msra.mxu1 %v14417_v45 }
 0x701   : > { %11038 = vmatprep.subr.bf16.mxu1 %v14343_v18 }
 0x702   : > { %11061 = vmatpush3.bf16.msra.mxu0 %v14418_v55  ;;  %v14425_v55 = vld [vmem:[#allocation45_spill] sm:$0xff] }
 0x703   : > { %11062 = vmatprep.subr.bf16.mxu0 %v14343_v18 }
 0x704   : > { %11040 = vmatpush3.bf16.msra.mxu1 %v14419_v25  ;;  %v14423_v25 = vld [vmem:[#allocation44_spill] sm:$0xff] }
 0x705   : > { %11041 = vmatprep.subr.bf16.mxu1 %v14343_v18 }
 0x706   : > { %11064 = vmatpush3.bf16.msra.mxu0 %v14420_v56  ;;  %v14424_v56 = vld [vmem:[#allocation13_spill] sm:$0xff] }
 0x707   : > { %11065 = vmatprep.subr.bf16.mxu0 %v14343_v18 }
 0x708   : > { %11043 = vmatpush3.bf16.msra.mxu1 %v14421_v2 }
 0x709   : > { %11044 = vmatprep.subr.bf16.mxu1 %v14343_v18 }
 0x70a   : > { %11067 = vmatpush3.bf16.msra.mxu0 %v14422_v19 }
 0x70b   : > { %11068 = vmatprep.subr.bf16.mxu0 %v14343_v18 }
 0x70c   : > { %11046 = vmatpush3.bf16.msra.mxu1 %v14423_v25 }
 0x70d   : > { %11047 = vmatprep.subr.bf16.mxu1 %v14343_v18 }
 0x70e   : > { %11070 = vmatpush3.bf16.msra.mxu0 %v14424_v56  ;;  %v14429_v56 = vld [vmem:[#allocation47_spill] sm:$0xff] }
 0x70f   : > { %11071 = vmatprep.subr.bf16.mxu0 %v14343_v18 }
 0x710   : > { %11049 = vmatpush3.bf16.msra.mxu1 %v14425_v55  ;;  %v14430_v55 = vld [vmem:[#allocation19_spill] sm:$0xff] }
 0x711   : > { %11050 = vmatprep.subr.bf16.mxu1 %v14343_v18 }
 0x712   : > { %11073 = vmatpush3.bf16.msra.mxu0 %v14426_v32  ;;  %v14431_v32 = vld [vmem:[#allocation6_spill] sm:$0xff] }
 0x713   : > { %11074 = vmatprep.subr.bf16.mxu0 %v14343_v18 }
 0x714   : > { %11052 = vmatpush3.bf16.msra.mxu1 %v14427_v1  ;;  %v14434_v1 = vld [vmem:[#allocation12_spill] sm:$0xff] }
 0x715   : > { %11053 = vmatprep.subr.bf16.mxu1 %v14343_v18 }
 0x716   : > { %11076 = vmatpush3.bf16.msra.mxu0 %v14428_v4  ;;  %v14432_v4 = vld [vmem:[#allocation8_spill] sm:$0xff] }
 0x717   : > { %11077 = vmatprep.subr.bf16.mxu0 %v14343_v18 }
 0x718   : > { %11055 = vmatpush3.bf16.msra.mxu1 %v14429_v56  ;;  %v14433_v56 = vld [vmem:[#allocation10_spill] sm:$0xff] }
 0x719   : > { %11080 = vmatprep.subr.bf16.mxu1 %v14343_v18 }
 0x71a   : > { %11079 = vmatpush3.bf16.msra.mxu0 %v14430_v55  ;;  %v14437_v55 = vld [vmem:[#allocation18_spill] sm:$0xff] }
 0x71b   : > { %8930 = vmatmul.mubr.f32.vlgmr.msra.gmra.mrb[34].mxu1 %v12006_v38  ;;  %11104 = vmatprep.subr.bf16.mxu0 %v14343_v18  ;;  %v14435_v38 = vld [vmem:[#allocation14_spill] sm:$0xff] }
 0x71c   : > { %11082 = vmatpush3.bf16.msra.mxu1 %v14431_v32  ;;  %8999 = vmatprep.mubr.msk.f32.mxu1 %vm12108_vm0, %v14319_v41  ;;  %v14436_v32 = vld [vmem:[#allocation16_spill] sm:$0xff] }
 0x71d   : > { %11083 = vmatprep.subr.bf16.mxu1 %v14343_v18 }
 0x720   : > { %11085 = vmatpush3.bf16.msra.mxu1 %v14432_v4  ;;  %v14438_v4 = vld [vmem:[#allocation20_spill] sm:$0xff] }
 0x721   : > { %11086 = vmatprep.subr.bf16.mxu1 %v14343_v18 }
 0x724   : > { %11088 = vmatpush3.bf16.msra.mxu1 %v14433_v56 }
 0x725   : > { %11089 = vmatprep.subr.bf16.mxu1 %v14343_v18 }
 0x728   : > { %11091 = vmatpush3.bf16.msra.mxu1 %v14434_v1 }
 0x729   : > { %11092 = vmatprep.subr.bf16.mxu1 %v14343_v18 }
 0x72c   : > { %11094 = vmatpush3.bf16.msra.mxu1 %v14435_v38 }
 0x72d   : > { %11095 = vmatprep.subr.bf16.mxu1 %v14343_v18 }
 0x730   : > { %11097 = vmatpush3.bf16.msra.mxu1 %v14436_v32 }
 0x731   : > { %11098 = vmatprep.subr.bf16.mxu1 %v14343_v18 }
 0x734   : > { %11100 = vmatpush3.bf16.msra.mxu1 %v14437_v55 }
 0x735   : > { %11101 = vmatprep.subr.bf16.mxu1 %v14343_v18 }
 0x738   : > { %11103 = vmatpush3.bf16.msra.mxu1 %v14438_v4 }
 0x739   : > { %11128 = vmatprep.subr.bf16.mxu1 %v14343_v18 }
 0x76e   : > { %v2756_v56 = vpop.f32.mrb[26].mxu1 }
 0x76f   : > { %v8651_v1 = vpop.f32.mrb[27].mxu1 }
 0x770   : > { %v2829_v25 = vpop.f32.mrb[28].mxu0 }
 0x771   : > { %v3266_v19 = vrot.slane %v2829_v25, 7  ;;  %v8686_v2 = vpop.f32.mrb[29].mxu0 }
 0x773   : > { %v3286_v38 = vsel %vm1173_vm1, %v2756_v56, %v3266_v19 }
 0x78e   : > { %v2901_v45 = vpop.f32.mrb[28].mxu1 }
 0x78f   : > { %v3269_v48 = vrot.slane %v2901_v45, 6  ;;  %v8721_v32 = vpop.f32.mrb[29].mxu1 }
 0x790   : > { %v2973_v0 = vpop.f32.mrb[30].mxu0 }
 0x791   : > { %v3287_v36 = vsel %vm1175_vm2, %v3286_v38, %v3269_v48  ;;  %v3272_v55 = vrot.slane %v2973_v0, 5  ;;  %v8756_v60 = vpop.f32.mrb[31].mxu0 }
 0x793   : > { %v3288_v21 = vsel %vm1177_vm3, %v3287_v36, %v3272_v55 }
 0x7ae   : > { %v3045_v4 = vpop.f32.mrb[30].mxu1 }
 0x7af   : > { %v3275_v20 = vrot.slane %v3045_v4, 4  ;;  %v8791_v28 = vpop.f32.mrb[31].mxu1  ;;  %v6437_v4 = vld [vmem:[%s12236_s15 + $0x18] sm:$0xff] }
 0x7b0   : > { %v3117_v31 = vpop.f32.mrb[32].mxu0 }
 0x7b1   : > { %v3289_v1 = vsel %vm1179_vm4, %v3288_v21, %v3275_v20  ;;  %v3278_v25 = vrot.slane %v3117_v31, 3  ;;  %v8826_v2 = vpop.f32.mrb[33].mxu0  ;;  %v14439_v20 = vmax.f32 %v13206_v42, -1e+30 }
 0x7b3   : > { %v3290_v56 = vsel %vm1181_vm5, %v3289_v1, %v3278_v25 }
 0x7ce   : > { %v3189_v45 = vpop.f32.mrb[32].mxu1 }
 0x7cf   : > { %v3281_v19 = vrot.slane %v3189_v45, 2  ;;  %v8861_v32 = vpop.f32.mrb[33].mxu1 }
 0x7d0   : > { %v3261_v16 = vpop.f32.mrb[34].mxu0 }
 0x7d1   : > { %v3291_v0 = vsel %vm1183_vm6, %v3290_v56, %v3281_v19  ;;  %v3284_v60 = vrot.slane %v3261_v16, 1  ;;  %v8896_v48 = vpop.f32.mrb[35].mxu0  ;;  %v14440_v56 = vmax.f32 %v13338_v50, -1e+30 }
 0x7d3   : > { %v3292_v36 = vsel %vm1185_vm7, %v3291_v0, %v3284_v60 }
 0x7d4   : > { %12007 = vlog2.f32 %v3292_v36 }
 0x7de   : > { %v12008_v28 = vpop.eup %12007 }
 0x7df   : > { %v3294_v55 = vmul.f32 0.6931472, %v12008_v28 }
 0x7e1   : > { %v3295_v31 = vadd.f32 %v3294_v55, %v14439_v20  ;;  %v14442_v20 = vld [vmem:[#allocation34_spill] sm:$0xff] }
 0x7e3   : > { %v3296_v21 = vadd.f32 %v6437_v4, %v3295_v31  ;;  %v14443_v31 = vld [vmem:[#allocation35_spill] sm:$0xff] }
 0x7e5   : > { %3379 = vmax.xlane.f32.xlu0 %v3296_v21 }
 0x7ee   : > { %v3369_v38 = vpop.f32.mrb[34].mxu1 }
 0x7ef   : > { %12009 = vlog2.f32 %v3369_v38  ;;  %v8931_v1 = vpop.f32.mrb[35].mxu1  ;;  %v14445_v38 = vld [vmem:[#allocation37_spill] sm:$0xff] }
 0x7f0   : > { %v14446_v1 = vld [vmem:[#allocation38_spill] sm:$0xff] }
 0x7f9   : > { %v12010_v25 = vpop.eup %12009 }
 0x7fa   : > { %v3374_v2 = vmul.f32 0.6931472, %v12010_v25 }
 0x7fc   : > { %v3375_v16 = vadd.f32 %v3374_v2, %v14440_v56  ;;  %v14447_v2 = vld [vmem:[#allocation39_spill] sm:$0xff] }
 0x7fe   : > { %v13401_v45 = vadd.f32 %v6437_v4, %v3375_v16  ;;  %v14441_v4 = vld [vmem:[#allocation33_spill] sm:$0xff]  ;;  %v14448_v16 = vld [vmem:[#allocation40_spill] sm:$0xff] }
 0x800   : > { %3992 = vmax.xlane.f32.xlu1 %v13401_v45 }
 0x872   : > { %v13404_v19 = vpop.xlane.xlu0 %3379 }
 0x873   : > { %v14289_v32 = vmax.f32 %v13404_v19, -1e+30 }
 0x875   : > { %v3382_v42 = vsub.f32 %v3296_v21, %v14289_v32  ;;  %v14444_v21 = vld [vmem:[#allocation36_spill] sm:$0xff] }
 0x877   : > { %v3383_v0 = vmul.f32 1.442695, %v3382_v42  ;;  %v14449_v42 = vld [vmem:[#allocation5_spill] sm:$0xff] }
 0x879   : > { %12011 = vpow2.f32 %v3383_v0  ;;  %v14450_v0 = vld [vmem:[#allocation41_spill] sm:$0xff] }
 0x883   : > { %v13409_v60 = vpop.eup %12011 }
 0x884   : > { %8965 = vmatmul.mubr.f32.vlgmr.msra.gmra.mrb[36].mxu0 %v13409_v60  ;;  %v3456_v50 = vrot.slane %v13409_v60, 1  ;;  %v3528_v48 = vrot.slane %v13409_v60, 2  ;;  %v3600_v36 = vrot.slane %v13409_v60, 3  ;;  %v3672_v28 = vrot.slane %v13409_v60, 4 }
 0x885   : > { %11106 = vmatpush3.bf16.msra.mxu0 %v12361_v9  ;;  %9034 = vmatprep.mubr.msk.f32.mxu0 %vm12108_vm0, %v14319_v41  ;;  %v3744_v55 = vrot.slane %v13409_v60, 5  ;;  %v3816_v25 = vrot.slane %v13409_v60, 6  ;;  %v3888_v56 = vrot.slane %v13409_v60, 7 }
 0x886   : > { %9000 = vmatmul.mubr.f32.vlgmr.msra.gmra.mrb[36].mxu1 %v3456_v50  ;;  %11107 = vmatprep.subr.bf16.mxu0 %v14343_v18  ;;  %v14451_v50 = vld [vmem:[#allocation7_spill] sm:$0xff] }
 0x887   : > { %11130 = vmatpush3.bf16.msra.mxu1 %v12367_v14  ;;  %9069 = vmatprep.mubr.msk.f32.mxu1 %vm12108_vm0, %v14319_v41 }
 0x888   : > { %11131 = vmatprep.subr.bf16.mxu1 %v14343_v18 }
 0x889   : > { %11109 = vmatpush3.bf16.msra.mxu0 %v12374_v22 }
 0x88a   : > { %11110 = vmatprep.subr.bf16.mxu0 %v14343_v18 }
 0x88b   : > { %11133 = vmatpush3.bf16.msra.mxu1 %v12382_v26 }
 0x88c   : > { %11134 = vmatprep.subr.bf16.mxu1 %v14343_v18 }
 0x88d   : > { %11112 = vmatpush3.bf16.msra.mxu0 %v12390_v30  ;;  %v13536_v60 = vpop.xlane.xlu1 %3992 }
 0x88e   : > { %11113 = vmatprep.subr.bf16.mxu0 %v14343_v18 }
 0x88f   : > { %11136 = vmatpush3.bf16.msra.mxu1 %v12396_v35 }
 0x890   : > { %11137 = vmatprep.subr.bf16.mxu1 %v14343_v18 }
 0x891   : > { %11115 = vmatpush3.bf16.msra.mxu0 %v12402_v40 }
 0x892   : > { %11116 = vmatprep.subr.bf16.mxu0 %v14343_v18 }
 0x893   : > { %11139 = vmatpush3.bf16.msra.mxu1 %v12408_v44 }
 0x894   : > { %11140 = vmatprep.subr.bf16.mxu1 %v14343_v18 }
 0x895   : > { %11118 = vmatpush3.bf16.msra.mxu0 %v12414_v49 }
 0x896   : > { %11119 = vmatprep.subr.bf16.mxu0 %v14343_v18 }
 0x897   : > { %11142 = vmatpush3.bf16.msra.mxu1 %v12420_v53 }
 0x898   : > { %11143 = vmatprep.subr.bf16.mxu1 %v14343_v18 }
 0x899   : > { %11121 = vmatpush3.bf16.msra.mxu0 %v12426_v59 }
 0x89a   : > { %11122 = vmatprep.subr.bf16.mxu0 %v14343_v18 }
 0x89b   : > { %11145 = vmatpush3.bf16.msra.mxu1 %v12432_v62 }
 0x89c   : > { %11146 = vmatprep.subr.bf16.mxu1 %v14343_v18 }
 0x89d   : > { %11124 = vmatpush3.bf16.msra.mxu0 %v12438_v5 }
 0x89e   : > { %11125 = vmatprep.subr.bf16.mxu0 %v14343_v18 }
 0x89f   : > { %11148 = vmatpush3.bf16.msra.mxu1 %v12444_v8 }
 0x8a0   : > { %11149 = vmatprep.subr.bf16.mxu1 %v14343_v18 }
 0x8a1   : > { %11127 = vmatpush3.bf16.msra.mxu0 %v12450_v15 }
 0x8a2   : > { %11152 = vmatprep.subr.bf16.mxu0 %v14343_v18 }
 0x8a3   : > { %11151 = vmatpush3.bf16.msra.mxu1 %v12456_v23 }
 0x8a4   : > { %9035 = vmatmul.mubr.f32.vlgmr.msra.gmra.mrb[38].mxu0 %v3528_v48  ;;  %11176 = vmatprep.subr.bf16.mxu1 %v14343_v18  ;;  %v14290_v48 = vmax.f32 %v13536_v60, -1e+30 }
 0x8a5   : > { %11154 = vmatpush3.bf16.msra.mxu0 %v12462_v29  ;;  %9104 = vmatprep.mubr.msk.f32.mxu0 %vm12108_vm0, %v14319_v41 }
 0x8a6   : > { %9070 = vmatmul.mubr.f32.vlgmr.msra.gmra.mrb[38].mxu1 %v3600_v36  ;;  %11155 = vmatprep.subr.bf16.mxu0 %v14343_v18  ;;  %v14452_v36 = vld [vmem:[#allocation42_spill] sm:$0xff] }
 0x8a7   : > { %11178 = vmatpush3.bf16.msra.mxu1 %v12469_v37  ;;  %9139 = vmatprep.mubr.msk.f32.mxu1 %vm12108_vm0, %v14319_v41 }
 0x8a8   : > { %11179 = vmatprep.subr.bf16.mxu1 %v14343_v18 }
 0x8a9   : > { %11157 = vmatpush3.bf16.msra.mxu0 %v12476_v47 }
 0x8aa   : > { %11158 = vmatprep.subr.bf16.mxu0 %v14343_v18 }
 0x8ab   : > { %11181 = vmatpush3.bf16.msra.mxu1 %v12484_v54 }
 0x8ac   : > { %11182 = vmatprep.subr.bf16.mxu1 %v14343_v18 }
 0x8ad   : > { %11160 = vmatpush3.bf16.msra.mxu0 %v12492_v61 }
 0x8ae   : > { %11161 = vmatprep.subr.bf16.mxu0 %v14343_v18 }
 0x8af   : > { %11184 = vmatpush3.bf16.msra.mxu1 %v12498_v6 }
 0x8b0   : > { %11185 = vmatprep.subr.bf16.mxu1 %v14343_v18 }
 0x8b1   : > { %11163 = vmatpush3.bf16.msra.mxu0 %v12504_v11 }
 0x8b2   : > { %11164 = vmatprep.subr.bf16.mxu0 %v14343_v18 }
 0x8b3   : > { %11187 = vmatpush3.bf16.msra.mxu1 %v12510_v24 }
 0x8b4   : > { %11188 = vmatprep.subr.bf16.mxu1 %v14343_v18 }
 0x8b5   : > { %11166 = vmatpush3.bf16.msra.mxu0 %v12516_v34 }
 0x8b6   : > { %11167 = vmatprep.subr.bf16.mxu0 %v14343_v18 }
 0x8b7   : > { %11190 = vmatpush3.bf16.msra.mxu1 %v12522_v43 }
 0x8b8   : > { %11191 = vmatprep.subr.bf16.mxu1 %v14343_v18 }
 0x8b9   : > { %11169 = vmatpush3.bf16.msra.mxu0 %v12528_v52 }
 0x8ba   : > { %11170 = vmatprep.subr.bf16.mxu0 %v14343_v18 }
 0x8bb   : > { %11193 = vmatpush3.bf16.msra.mxu1 %v12534_v3 }
 0x8bc   : > { %11194 = vmatprep.subr.bf16.mxu1 %v14343_v18 }
 0x8bd   : > { %11172 = vmatpush3.bf16.msra.mxu0 %v12540_v10 }
 0x8be   : > { %11173 = vmatprep.subr.bf16.mxu0 %v14343_v18 }
 0x8bf   : > { %11196 = vmatpush3.bf16.msra.mxu1 %v14344_v12 }
 0x8c0   : > { %11197 = vmatprep.subr.bf16.mxu1 %v14343_v18 }
 0x8c1   : > { %11175 = vmatpush3.bf16.msra.mxu0 %v14345_v33 }
 0x8c2   : > { %11200 = vmatprep.subr.bf16.mxu0 %v14343_v18 }
 0x8c3   : > { %11199 = vmatpush3.bf16.msra.mxu1 %v14346_v27 }
 0x8c4   : > { %9105 = vmatmul.mubr.f32.vlgmr.msra.gmra.mrb[40].mxu0 %v3672_v28  ;;  %11224 = vmatprep.subr.bf16.mxu1 %v14343_v18  ;;  %v14453_v28 = vld [vmem:[#allocation9_spill] sm:$0xff] }
 0x8c5   : > { %11202 = vmatpush3.bf16.msra.mxu0 %v14347_v39  ;;  %9174 = vmatprep.mubr.msk.f32.mxu0 %vm12108_vm0, %v14319_v41 }
 0x8c6   : > { %9140 = vmatmul.mubr.f32.vlgmr.msra.gmra.mrb[40].mxu1 %v3744_v55  ;;  %11203 = vmatprep.subr.bf16.mxu0 %v14343_v18  ;;  %v3995_v55 = vsub.f32 %v13401_v45, %v14290_v48  ;;  %v14459_v45 = vld [vmem:[#allocation15_spill] sm:$0xff]  ;;  %v14460_v48 = vld [vmem:[#allocation46_spill] sm:$0xff] }
 0x8c7   : > { %11226 = vmatpush3.bf16.msra.mxu1 %v14348_v51  ;;  %9209 = vmatprep.mubr.msk.f32.mxu1 %vm12108_vm0, %v14319_v41 }
 0x8c8   : > { %11227 = vmatprep.subr.bf16.mxu1 %v14343_v18  ;;  %v3996_v32 = vmul.f32 1.442695, %v3995_v55  ;;  %v14461_v55 = vld [vmem:[#allocation17_spill] sm:$0xff] }
 0x8c9   : > { %11205 = vmatpush3.bf16.msra.mxu0 %v14349_v58 }
 0x8ca   : > { %11206 = vmatprep.subr.bf16.mxu0 %v14343_v18  ;;  %12013 = vpow2.f32 %v3996_v32 }
 0x8cb   : > { %11229 = vmatpush3.bf16.msra.mxu1 %v14350_v63 }
 0x8cc   : > { %11230 = vmatprep.subr.bf16.mxu1 %v14343_v18 }
 0x8cd   : > { %11208 = vmatpush3.bf16.msra.mxu0 %v14351_v57 }
 0x8ce   : > { %11209 = vmatprep.subr.bf16.mxu0 %v14343_v18 }
 0x8cf   : > { %11232 = vmatpush3.bf16.msra.mxu1 %v14352_v13 }
 0x8d0   : > { %11233 = vmatprep.subr.bf16.mxu1 %v14343_v18 }
 0x8d1   : > { %11211 = vmatpush3.bf16.msra.mxu0 %v14353_v17 }
 0x8d2   : > { %11212 = vmatprep.subr.bf16.mxu0 %v14343_v18 }
 0x8d3   : > { %11235 = vmatpush3.bf16.msra.mxu1 %v14354_v7 }
 0x8d4   : > { %11236 = vmatprep.subr.bf16.mxu1 %v14343_v18  ;;  %v12014_v32 = vpop.eup %12013 }
 0x8d5   : > { %11214 = vmatpush3.bf16.msra.mxu0 %v14355_v46 }
 0x8d6   : > { %11215 = vmatprep.subr.bf16.mxu0 %v14343_v18 }
 0x8d7   : > { %11238 = vmatpush3.bf16.msra.mxu1 %v14441_v4 }
 0x8d8   : > { %11239 = vmatprep.subr.bf16.mxu1 %v14343_v18 }
 0x8d9   : > { %11217 = vmatpush3.bf16.msra.mxu0 %v14442_v20 }
 0x8da   : > { %11218 = vmatprep.subr.bf16.mxu0 %v14343_v18 }
 0x8db   : > { %11241 = vmatpush3.bf16.msra.mxu1 %v14443_v31 }
 0x8dc   : > { %11242 = vmatprep.subr.bf16.mxu1 %v14343_v18 }
 0x8dd   : > { %11220 = vmatpush3.bf16.msra.mxu0 %v14444_v21 }
 0x8de   : > { %11221 = vmatprep.subr.bf16.mxu0 %v14343_v18 }
 0x8df   : > { %11244 = vmatpush3.bf16.msra.mxu1 %v14445_v38 }
 0x8e0   : > { %11245 = vmatprep.subr.bf16.mxu1 %v14343_v18 }
 0x8e1   : > { %11223 = vmatpush3.bf16.msra.mxu0 %v14446_v1 }
 0x8e2   : > { %11248 = vmatprep.subr.bf16.mxu0 %v14343_v18 }
 0x8e3   : > { %11247 = vmatpush3.bf16.msra.mxu1 %v14447_v2 }
 0x8e4   : > { %9175 = vmatmul.mubr.f32.vlgmr.msra.gmra.mrb[42].mxu0 %v3816_v25  ;;  %11272 = vmatprep.subr.bf16.mxu1 %v14343_v18  ;;  %v14454_v25 = vld [vmem:[#allocation43_spill] sm:$0xff] }
 0x8e5   : > { %11250 = vmatpush3.bf16.msra.mxu0 %v14448_v16  ;;  %9244 = vmatprep.mubr.msk.f32.mxu0 %vm12108_vm0, %v14319_v41 }
 0x8e6   : > { %9210 = vmatmul.mubr.f32.vlgmr.msra.gmra.mrb[42].mxu1 %v3888_v56  ;;  %11251 = vmatprep.subr.bf16.mxu0 %v14343_v18  ;;  %v14455_v56 = vld [vmem:[#allocation11_spill] sm:$0xff] }
 0x8e7   : > { %11274 = vmatpush3.bf16.msra.mxu1 %v14449_v42  ;;  %9279 = vmatprep.mubr.msk.f32.mxu1 %vm12108_vm0, %v14319_v41 }
 0x8e8   : > { %11275 = vmatprep.subr.bf16.mxu1 %v14343_v18 }
 0x8e9   : > { %11253 = vmatpush3.bf16.msra.mxu0 %v14450_v0 }
 0x8ea   : > { %11254 = vmatprep.subr.bf16.mxu0 %v14343_v18 }
 0x8eb   : > { %11277 = vmatpush3.bf16.msra.mxu1 %v14451_v50  ;;  %v14458_v50 = vld [vmem:[#allocation45_spill] sm:$0xff] }
 0x8ec   : > { %11278 = vmatprep.subr.bf16.mxu1 %v14343_v18 }
 0x8ed   : > { %11256 = vmatpush3.bf16.msra.mxu0 %v14452_v36  ;;  %v14456_v36 = vld [vmem:[#allocation44_spill] sm:$0xff] }
 0x8ee   : > { %11257 = vmatprep.subr.bf16.mxu0 %v14343_v18 }
 0x8ef   : > { %11280 = vmatpush3.bf16.msra.mxu1 %v14453_v28  ;;  %v14457_v28 = vld [vmem:[#allocation13_spill] sm:$0xff] }
 0x8f0   : > { %11281 = vmatprep.subr.bf16.mxu1 %v14343_v18 }
 0x8f1   : > { %11259 = vmatpush3.bf16.msra.mxu0 %v14454_v25 }
 0x8f2   : > { %11260 = vmatprep.subr.bf16.mxu0 %v14343_v18 }
 0x8f3   : > { %11283 = vmatpush3.bf16.msra.mxu1 %v14455_v56 }
 0x8f4   : > { %11284 = vmatprep.subr.bf16.mxu1 %v14343_v18 }
 0x8f5   : > { %11262 = vmatpush3.bf16.msra.mxu0 %v14456_v36 }
 0x8f6   : > { %11263 = vmatprep.subr.bf16.mxu0 %v14343_v18 }
 0x8f7   : > { %11286 = vmatpush3.bf16.msra.mxu1 %v14457_v28  ;;  %v14462_v28 = vld [vmem:[#allocation47_spill] sm:$0xff] }
 0x8f8   : > { %11287 = vmatprep.subr.bf16.mxu1 %v14343_v18 }
 0x8f9   : > { %11265 = vmatpush3.bf16.msra.mxu0 %v14458_v50  ;;  %v14463_v50 = vld [vmem:[#allocation19_spill] sm:$0xff] }
 0x8fa   : > { %11266 = vmatprep.subr.bf16.mxu0 %v14343_v18 }
 0x8fb   : > { %11289 = vmatpush3.bf16.msra.mxu1 %v14459_v45  ;;  %v14464_v45 = vld [vmem:[#allocation6_spill] sm:$0xff] }
 0x8fc   : > { %11290 = vmatprep.subr.bf16.mxu1 %v14343_v18 }
 0x8fd   : > { %11268 = vmatpush3.bf16.msra.mxu0 %v14460_v48  ;;  %v14467_v48 = vld [vmem:[#allocation12_spill] sm:$0xff] }
 0x8fe   : > { %11269 = vmatprep.subr.bf16.mxu0 %v14343_v18 }
 0x8ff   : > { %11292 = vmatpush3.bf16.msra.mxu1 %v14461_v55  ;;  %v14465_v55 = vld [vmem:[#allocation8_spill] sm:$0xff] }
 0x900   : > { %11293 = vmatprep.subr.bf16.mxu1 %v14343_v18 }
 0x901   : > { %11271 = vmatpush3.bf16.msra.mxu0 %v14462_v28  ;;  %v14466_v28 = vld [vmem:[#allocation10_spill] sm:$0xff] }
 0x902   : > { %11296 = vmatprep.subr.bf16.mxu0 %v14343_v18 }
 0x903   : > { %11295 = vmatpush3.bf16.msra.mxu1 %v14463_v50  ;;  %v14470_v50 = vld [vmem:[#allocation18_spill] sm:$0xff] }
 0x904   : > { %9245 = vmatmul.mubr.f32.vlgmr.msra.gmra.mrb[44].mxu0 %v12014_v32  ;;  %11320 = vmatprep.subr.bf16.mxu1 %v14343_v18  ;;  %v14468_v32 = vld [vmem:[#allocation14_spill] sm:$0xff] }
 0x905   : > { %11298 = vmatpush3.bf16.msra.mxu0 %v14464_v45  ;;  %9314 = vmatprep.mubr.msk.f32.mxu0 %vm12108_vm0, %v14319_v41  ;;  %v14469_v45 = vld [vmem:[#allocation16_spill] sm:$0xff] }
 0x906   : > { %11299 = vmatprep.subr.bf16.mxu0 %v14343_v18 }
 0x909   : > { %11301 = vmatpush3.bf16.msra.mxu0 %v14465_v55  ;;  %v14471_v55 = vld [vmem:[#allocation20_spill] sm:$0xff] }
 0x90a   : > { %11302 = vmatprep.subr.bf16.mxu0 %v14343_v18 }
 0x90d   : > { %11304 = vmatpush3.bf16.msra.mxu0 %v14466_v28 }
 0x90e   : > { %11305 = vmatprep.subr.bf16.mxu0 %v14343_v18 }
 0x911   : > { %11307 = vmatpush3.bf16.msra.mxu0 %v14467_v48 }
 0x912   : > { %11308 = vmatprep.subr.bf16.mxu0 %v14343_v18 }
 0x915   : > { %11310 = vmatpush3.bf16.msra.mxu0 %v14468_v32 }
 0x916   : > { %11311 = vmatprep.subr.bf16.mxu0 %v14343_v18 }
 0x919   : > { %11313 = vmatpush3.bf16.msra.mxu0 %v14469_v45 }
 0x91a   : > { %11314 = vmatprep.subr.bf16.mxu0 %v14343_v18 }
 0x91d   : > { %11316 = vmatpush3.bf16.msra.mxu0 %v14470_v50 }
 0x91e   : > { %11317 = vmatprep.subr.bf16.mxu0 %v14343_v18 }
 0x921   : > { %11319 = vmatpush3.bf16.msra.mxu0 %v14471_v55 }
 0x922   : > { %11344 = vmatprep.subr.bf16.mxu0 %v14343_v18 }
 0x957   : > { %v3451_v28 = vpop.f32.mrb[36].mxu0 }
 0x958   : > { %v8966_v48 = vpop.f32.mrb[37].mxu0 }
 0x959   : > { %v3524_v36 = vpop.f32.mrb[36].mxu1 }
 0x95a   : > { %v3961_v56 = vrot.slane %v3524_v36, 7  ;;  %v9001_v25 = vpop.f32.mrb[37].mxu1 }
 0x95c   : > { %v3981_v32 = vsel %vm1173_vm1, %v3451_v28, %v3961_v56 }
 0x977   : > { %v3596_v0 = vpop.f32.mrb[38].mxu0 }
 0x978   : > { %v3964_v42 = vrot.slane %v3596_v0, 6  ;;  %v9036_v45 = vpop.f32.mrb[39].mxu0 }
 0x979   : > { %v3668_v16 = vpop.f32.mrb[38].mxu1 }
 0x97a   : > { %v3982_v2 = vsel %vm1175_vm2, %v3981_v32, %v3964_v42  ;;  %v3967_v50 = vrot.slane %v3668_v16, 5  ;;  %v9071_v1 = vpop.f32.mrb[39].mxu1 }
 0x97c   : > { %v3983_v38 = vsel %vm1177_vm3, %v3982_v2, %v3967_v50 }
 0x997   : > { %v3740_v55 = vpop.f32.mrb[40].mxu0 }
 0x998   : > { %v3970_v21 = vrot.slane %v3740_v55, 4  ;;  %v9106_v31 = vpop.f32.mrb[41].mxu0  ;;  %v6438_v55 = vld [vmem:[%s12236_s15 + $0x20] sm:$0xff] }
 0x999   : > { %v3812_v20 = vpop.f32.mrb[40].mxu1 }
 0x99a   : > { %v3984_v48 = vsel %vm1179_vm4, %v3983_v38, %v3970_v21  ;;  %v3973_v36 = vrot.slane %v3812_v20, 3  ;;  %v9141_v25 = vpop.f32.mrb[41].mxu1  ;;  %v14472_v21 = vmax.f32 %v13404_v19, -1e+30 }
 0x99c   : > { %v3985_v28 = vsel %vm1181_vm5, %v3984_v48, %v3973_v36 }
 0x9b7   : > { %v3884_v0 = vpop.f32.mrb[42].mxu0 }
 0x9b8   : > { %v3976_v56 = vrot.slane %v3884_v0, 2  ;;  %v9176_v45 = vpop.f32.mrb[43].mxu0 }
 0x9b9   : > { %v3956_v4 = vpop.f32.mrb[42].mxu1 }
 0x9ba   : > { %v3986_v16 = vsel %vm1183_vm6, %v3985_v28, %v3976_v56  ;;  %v3979_v1 = vrot.slane %v3956_v4, 1  ;;  %v9211_v42 = vpop.f32.mrb[43].mxu1  ;;  %v14473_v28 = vmax.f32 %v13536_v60, -1e+30 }
 0x9bc   : > { %v3987_v2 = vsel %vm1185_vm7, %v3986_v16, %v3979_v1 }
 0x9bd   : > { %12015 = vlog2.f32 %v3987_v2 }
 0x9c7   : > { %v12016_v31 = vpop.eup %12015 }
 0x9c8   : > { %v3989_v50 = vmul.f32 0.6931472, %v12016_v31 }
 0x9ca   : > { %v3990_v20 = vadd.f32 %v3989_v50, %v14472_v21  ;;  %v14475_v21 = vld [vmem:[#allocation34_spill] sm:$0xff] }
 0x9cc   : > { %v3991_v38 = vadd.f32 %v6438_v55, %v3990_v20  ;;  %v14476_v20 = vld [vmem:[#allocation35_spill] sm:$0xff] }
 0x9ce   : > { %4074 = vmax.xlane.f32.xlu0 %v3991_v38 }
 0x9d7   : > { %v4064_v32 = vpop.f32.mrb[44].mxu0 }
 0x9d8   : > { %12017 = vlog2.f32 %v4064_v32  ;;  %v9246_v48 = vpop.f32.mrb[45].mxu0  ;;  %v14478_v32 = vld [vmem:[#allocation37_spill] sm:$0xff] }
 0x9d9   : > { %v14479_v48 = vld [vmem:[#allocation38_spill] sm:$0xff] }
 0x9e2   : > { %v12018_v36 = vpop.eup %12017 }
 0x9e3   : > { %v4069_v25 = vmul.f32 0.6931472, %v12018_v36 }
 0x9e5   : > { %v4070_v4 = vadd.f32 %v4069_v25, %v14473_v28  ;;  %v14480_v25 = vld [vmem:[#allocation39_spill] sm:$0xff] }
 0x9e7   : > { %v13599_v0 = vadd.f32 %v6438_v55, %v4070_v4  ;;  %v14474_v55 = vld [vmem:[#allocation33_spill] sm:$0xff]  ;;  %v14481_v4 = vld [vmem:[#allocation40_spill] sm:$0xff] }
 0x9e9   : > { %4687 = vmax.xlane.f32.xlu1 %v13599_v0 }
 0xa5b   : > { %v13602_v56 = vpop.xlane.xlu0 %4074 }
 0xa5c   : > { %v14291_v45 = vmax.f32 %v13602_v56, -1e+30 }
 0xa5e   : > { %v4077_v19 = vsub.f32 %v3991_v38, %v14291_v45  ;;  %v14477_v38 = vld [vmem:[#allocation36_spill] sm:$0xff] }
 0xa60   : > { %v4078_v16 = vmul.f32 1.442695, %v4077_v19  ;;  %v14482_v19 = vld [vmem:[#allocation5_spill] sm:$0xff] }
 0xa62   : > { %12019 = vpow2.f32 %v4078_v16  ;;  %v14483_v16 = vld [vmem:[#allocation41_spill] sm:$0xff] }
 0xa6c   : > { %v13607_v1 = vpop.eup %12019 }
 0xa6d   : > { %9280 = vmatmul.mubr.f32.vlgmr.msra.gmra.mrb[44].mxu1 %v13607_v1  ;;  %v4151_v60 = vrot.slane %v13607_v1, 1  ;;  %v4223_v42 = vrot.slane %v13607_v1, 2  ;;  %v4295_v2 = vrot.slane %v13607_v1, 3  ;;  %v4367_v31 = vrot.slane %v13607_v1, 4 }
 0xa6e   : > { %11322 = vmatpush3.bf16.msra.mxu1 %v12361_v9  ;;  %9349 = vmatprep.mubr.msk.f32.mxu1 %vm12108_vm0, %v14319_v41  ;;  %v4439_v50 = vrot.slane %v13607_v1, 5  ;;  %v4511_v36 = vrot.slane %v13607_v1, 6  ;;  %v4583_v28 = vrot.slane %v13607_v1, 7 }
 0xa6f   : > { %9315 = vmatmul.mubr.f32.vlgmr.msra.gmra.mrb[46].mxu0 %v4151_v60  ;;  %11323 = vmatprep.subr.bf16.mxu1 %v14343_v18  ;;  %v14484_v60 = vld [vmem:[#allocation7_spill] sm:$0xff] }
 0xa70   : > { %11346 = vmatpush3.bf16.msra.mxu0 %v12367_v14  ;;  %9384 = vmatprep.mubr.msk.f32.mxu0 %vm12108_vm0, %v14319_v41 }
 0xa71   : > { %11347 = vmatprep.subr.bf16.mxu0 %v14343_v18 }
 0xa72   : > { %11325 = vmatpush3.bf16.msra.mxu1 %v12374_v22 }
 0xa73   : > { %11326 = vmatprep.subr.bf16.mxu1 %v14343_v18 }
 0xa74   : > { %11349 = vmatpush3.bf16.msra.mxu0 %v12382_v26 }
 0xa75   : > { %11350 = vmatprep.subr.bf16.mxu0 %v14343_v18 }
 0xa76   : > { %11328 = vmatpush3.bf16.msra.mxu1 %v12390_v30  ;;  %v13734_v1 = vpop.xlane.xlu1 %4687 }
 0xa77   : > { %11329 = vmatprep.subr.bf16.mxu1 %v14343_v18 }
 0xa78   : > { %11352 = vmatpush3.bf16.msra.mxu0 %v12396_v35 }
 0xa79   : > { %11353 = vmatprep.subr.bf16.mxu0 %v14343_v18 }
 0xa7a   : > { %11331 = vmatpush3.bf16.msra.mxu1 %v12402_v40 }
 0xa7b   : > { %11332 = vmatprep.subr.bf16.mxu1 %v14343_v18 }
 0xa7c   : > { %11355 = vmatpush3.bf16.msra.mxu0 %v12408_v44 }
 0xa7d   : > { %11356 = vmatprep.subr.bf16.mxu0 %v14343_v18 }
 0xa7e   : > { %11334 = vmatpush3.bf16.msra.mxu1 %v12414_v49 }
 0xa7f   : > { %11335 = vmatprep.subr.bf16.mxu1 %v14343_v18 }
 0xa80   : > { %11358 = vmatpush3.bf16.msra.mxu0 %v12420_v53 }
 0xa81   : > { %11359 = vmatprep.subr.bf16.mxu0 %v14343_v18 }
 0xa82   : > { %11337 = vmatpush3.bf16.msra.mxu1 %v12426_v59 }
 0xa83   : > { %11338 = vmatprep.subr.bf16.mxu1 %v14343_v18 }
 0xa84   : > { %11361 = vmatpush3.bf16.msra.mxu0 %v12432_v62 }
 0xa85   : > { %11362 = vmatprep.subr.bf16.mxu0 %v14343_v18 }
 0xa86   : > { %11340 = vmatpush3.bf16.msra.mxu1 %v12438_v5 }
 0xa87   : > { %11341 = vmatprep.subr.bf16.mxu1 %v14343_v18 }
 0xa88   : > { %11364 = vmatpush3.bf16.msra.mxu0 %v12444_v8 }
 0xa89   : > { %11365 = vmatprep.subr.bf16.mxu0 %v14343_v18 }
 0xa8a   : > { %11343 = vmatpush3.bf16.msra.mxu1 %v12450_v15 }
 0xa8b   : > { %11368 = vmatprep.subr.bf16.mxu1 %v14343_v18 }
 0xa8c   : > { %11367 = vmatpush3.bf16.msra.mxu0 %v12456_v23 }
 0xa8d   : > { %9350 = vmatmul.mubr.f32.vlgmr.msra.gmra.mrb[46].mxu1 %v4223_v42  ;;  %11392 = vmatprep.subr.bf16.mxu0 %v14343_v18  ;;  %v14292_v42 = vmax.f32 %v13734_v1, -1e+30 }
 0xa8e   : > { %11370 = vmatpush3.bf16.msra.mxu1 %v12462_v29  ;;  %9419 = vmatprep.mubr.msk.f32.mxu1 %vm12108_vm0, %v14319_v41 }
 0xa8f   : > { %9385 = vmatmul.mubr.f32.vlgmr.msra.gmra.mrb[48].mxu0 %v4295_v2  ;;  %11371 = vmatprep.subr.bf16.mxu1 %v14343_v18  ;;  %v14485_v2 = vld [vmem:[#allocation42_spill] sm:$0xff] }
 0xa90   : > { %11394 = vmatpush3.bf16.msra.mxu0 %v12469_v37  ;;  %9454 = vmatprep.mubr.msk.f32.mxu0 %vm12108_vm0, %v14319_v41 }
 0xa91   : > { %11395 = vmatprep.subr.bf16.mxu0 %v14343_v18 }
 0xa92   : > { %11373 = vmatpush3.bf16.msra.mxu1 %v12476_v47 }
 0xa93   : > { %11374 = vmatprep.subr.bf16.mxu1 %v14343_v18 }
 0xa94   : > { %11397 = vmatpush3.bf16.msra.mxu0 %v12484_v54 }
 0xa95   : > { %11398 = vmatprep.subr.bf16.mxu0 %v14343_v18 }
 0xa96   : > { %11376 = vmatpush3.bf16.msra.mxu1 %v12492_v61 }
 0xa97   : > { %11377 = vmatprep.subr.bf16.mxu1 %v14343_v18 }
 0xa98   : > { %11400 = vmatpush3.bf16.msra.mxu0 %v12498_v6 }
 0xa99   : > { %11401 = vmatprep.subr.bf16.mxu0 %v14343_v18 }
 0xa9a   : > { %11379 = vmatpush3.bf16.msra.mxu1 %v12504_v11 }
 0xa9b   : > { %11380 = vmatprep.subr.bf16.mxu1 %v14343_v18 }
 0xa9c   : > { %11403 = vmatpush3.bf16.msra.mxu0 %v12510_v24 }
 0xa9d   : > { %11404 = vmatprep.subr.bf16.mxu0 %v14343_v18 }
 0xa9e   : > { %11382 = vmatpush3.bf16.msra.mxu1 %v12516_v34 }
 0xa9f   : > { %11383 = vmatprep.subr.bf16.mxu1 %v14343_v18 }
 0xaa0   : > { %11406 = vmatpush3.bf16.msra.mxu0 %v12522_v43 }
 0xaa1   : > { %11407 = vmatprep.subr.bf16.mxu0 %v14343_v18 }
 0xaa2   : > { %11385 = vmatpush3.bf16.msra.mxu1 %v12528_v52 }
 0xaa3   : > { %11386 = vmatprep.subr.bf16.mxu1 %v14343_v18 }
 0xaa4   : > { %11409 = vmatpush3.bf16.msra.mxu0 %v12534_v3 }
 0xaa5   : > { %11410 = vmatprep.subr.bf16.mxu0 %v14343_v18 }
 0xaa6   : > { %11388 = vmatpush3.bf16.msra.mxu1 %v12540_v10 }
 0xaa7   : > { %11389 = vmatprep.subr.bf16.mxu1 %v14343_v18 }
 0xaa8   : > { %11412 = vmatpush3.bf16.msra.mxu0 %v14344_v12 }
 0xaa9   : > { %11413 = vmatprep.subr.bf16.mxu0 %v14343_v18 }
 0xaaa   : > { %11391 = vmatpush3.bf16.msra.mxu1 %v14345_v33 }
 0xaab   : > { %11416 = vmatprep.subr.bf16.mxu1 %v14343_v18 }
 0xaac   : > { %11415 = vmatpush3.bf16.msra.mxu0 %v14346_v27 }
 0xaad   : > { %9420 = vmatmul.mubr.f32.vlgmr.msra.gmra.mrb[48].mxu1 %v4367_v31  ;;  %11440 = vmatprep.subr.bf16.mxu0 %v14343_v18  ;;  %v14486_v31 = vld [vmem:[#allocation9_spill] sm:$0xff] }
 0xaae   : > { %11418 = vmatpush3.bf16.msra.mxu1 %v14347_v39  ;;  %9489 = vmatprep.mubr.msk.f32.mxu1 %vm12108_vm0, %v14319_v41 }
 0xaaf   : > { %9455 = vmatmul.mubr.f32.vlgmr.msra.gmra.mrb[50].mxu0 %v4439_v50  ;;  %11419 = vmatprep.subr.bf16.mxu1 %v14343_v18  ;;  %v4690_v50 = vsub.f32 %v13599_v0, %v14292_v42  ;;  %v14492_v0 = vld [vmem:[#allocation15_spill] sm:$0xff]  ;;  %v14493_v42 = vld [vmem:[#allocation46_spill] sm:$0xff] }
 0xab0   : > { %11442 = vmatpush3.bf16.msra.mxu0 %v14348_v51  ;;  %9524 = vmatprep.mubr.msk.f32.mxu0 %vm12108_vm0, %v14319_v41 }
 0xab1   : > { %11443 = vmatprep.subr.bf16.mxu0 %v14343_v18  ;;  %v4691_v45 = vmul.f32 1.442695, %v4690_v50  ;;  %v14494_v50 = vld [vmem:[#allocation17_spill] sm:$0xff] }
 0xab2   : > { %11421 = vmatpush3.bf16.msra.mxu1 %v14349_v58 }
 0xab3   : > { %11422 = vmatprep.subr.bf16.mxu1 %v14343_v18  ;;  %12021 = vpow2.f32 %v4691_v45 }
 0xab4   : > { %11445 = vmatpush3.bf16.msra.mxu0 %v14350_v63 }
 0xab5   : > { %11446 = vmatprep.subr.bf16.mxu0 %v14343_v18 }
 0xab6   : > { %11424 = vmatpush3.bf16.msra.mxu1 %v14351_v57 }
 0xab7   : > { %11425 = vmatprep.subr.bf16.mxu1 %v14343_v18 }
 0xab8   : > { %11448 = vmatpush3.bf16.msra.mxu0 %v14352_v13 }
 0xab9   : > { %11449 = vmatprep.subr.bf16.mxu0 %v14343_v18 }
 0xaba   : > { %11427 = vmatpush3.bf16.msra.mxu1 %v14353_v17 }
 0xabb   : > { %11428 = vmatprep.subr.bf16.mxu1 %v14343_v18 }
 0xabc   : > { %11451 = vmatpush3.bf16.msra.mxu0 %v14354_v7 }
 0xabd   : > { %11452 = vmatprep.subr.bf16.mxu0 %v14343_v18  ;;  %v12022_v45 = vpop.eup %12021 }
 0xabe   : > { %11430 = vmatpush3.bf16.msra.mxu1 %v14355_v46 }
 0xabf   : > { %11431 = vmatprep.subr.bf16.mxu1 %v14343_v18 }
 0xac0   : > { %11454 = vmatpush3.bf16.msra.mxu0 %v14474_v55 }
 0xac1   : > { %11455 = vmatprep.subr.bf16.mxu0 %v14343_v18 }
 0xac2   : > { %11433 = vmatpush3.bf16.msra.mxu1 %v14475_v21 }
 0xac3   : > { %11434 = vmatprep.subr.bf16.mxu1 %v14343_v18 }
 0xac4   : > { %11457 = vmatpush3.bf16.msra.mxu0 %v14476_v20 }
 0xac5   : > { %11458 = vmatprep.subr.bf16.mxu0 %v14343_v18 }
 0xac6   : > { %11436 = vmatpush3.bf16.msra.mxu1 %v14477_v38 }
 0xac7   : > { %11437 = vmatprep.subr.bf16.mxu1 %v14343_v18 }
 0xac8   : > { %11460 = vmatpush3.bf16.msra.mxu0 %v14478_v32 }
 0xac9   : > { %11461 = vmatprep.subr.bf16.mxu0 %v14343_v18 }
 0xaca   : > { %11439 = vmatpush3.bf16.msra.mxu1 %v14479_v48 }
 0xacb   : > { %11464 = vmatprep.subr.bf16.mxu1 %v14343_v18 }
 0xacc   : > { %11463 = vmatpush3.bf16.msra.mxu0 %v14480_v25 }
 0xacd   : > { %9490 = vmatmul.mubr.f32.vlgmr.msra.gmra.mrb[50].mxu1 %v4511_v36  ;;  %11488 = vmatprep.subr.bf16.mxu0 %v14343_v18  ;;  %v14487_v36 = vld [vmem:[#allocation43_spill] sm:$0xff] }
 0xace   : > { %11466 = vmatpush3.bf16.msra.mxu1 %v14481_v4  ;;  %9559 = vmatprep.mubr.msk.f32.mxu1 %vm12108_vm0, %v14319_v41 }
 0xacf   : > { %9525 = vmatmul.mubr.f32.vlgmr.msra.gmra.mrb[52].mxu0 %v4583_v28  ;;  %11467 = vmatprep.subr.bf16.mxu1 %v14343_v18  ;;  %v14488_v28 = vld [vmem:[#allocation11_spill] sm:$0xff] }
 0xad0   : > { %11490 = vmatpush3.bf16.msra.mxu0 %v14482_v19  ;;  %9594 = vmatprep.mubr.msk.f32.mxu0 %vm12108_vm0, %v14319_v41 }
 0xad1   : > { %11491 = vmatprep.subr.bf16.mxu0 %v14343_v18 }
 0xad2   : > { %11469 = vmatpush3.bf16.msra.mxu1 %v14483_v16 }
 0xad3   : > { %11470 = vmatprep.subr.bf16.mxu1 %v14343_v18 }
 0xad4   : > { %11493 = vmatpush3.bf16.msra.mxu0 %v14484_v60  ;;  %v14491_v60 = vld [vmem:[#allocation45_spill] sm:$0xff] }
 0xad5   : > { %11494 = vmatprep.subr.bf16.mxu0 %v14343_v18 }
 0xad6   : > { %11472 = vmatpush3.bf16.msra.mxu1 %v14485_v2  ;;  %v14489_v2 = vld [vmem:[#allocation44_spill] sm:$0xff] }
 0xad7   : > { %11473 = vmatprep.subr.bf16.mxu1 %v14343_v18 }
 0xad8   : > { %11496 = vmatpush3.bf16.msra.mxu0 %v14486_v31  ;;  %v14490_v31 = vld [vmem:[#allocation13_spill] sm:$0xff] }
 0xad9   : > { %11497 = vmatprep.subr.bf16.mxu0 %v14343_v18 }
 0xada   : > { %11475 = vmatpush3.bf16.msra.mxu1 %v14487_v36 }
 0xadb   : > { %11476 = vmatprep.subr.bf16.mxu1 %v14343_v18 }
 0xadc   : > { %11499 = vmatpush3.bf16.msra.mxu0 %v14488_v28 }
 0xadd   : > { %11500 = vmatprep.subr.bf16.mxu0 %v14343_v18 }
 0xade   : > { %11478 = vmatpush3.bf16.msra.mxu1 %v14489_v2 }
 0xadf   : > { %11479 = vmatprep.subr.bf16.mxu1 %v14343_v18 }
 0xae0   : > { %11502 = vmatpush3.bf16.msra.mxu0 %v14490_v31  ;;  %v14495_v31 = vld [vmem:[#allocation47_spill] sm:$0xff] }
 0xae1   : > { %11503 = vmatprep.subr.bf16.mxu0 %v14343_v18 }
 0xae2   : > { %11481 = vmatpush3.bf16.msra.mxu1 %v14491_v60  ;;  %v14496_v60 = vld [vmem:[#allocation19_spill] sm:$0xff] }
 0xae3   : > { %11482 = vmatprep.subr.bf16.mxu1 %v14343_v18 }
 0xae4   : > { %11505 = vmatpush3.bf16.msra.mxu0 %v14492_v0  ;;  %v14497_v0 = vld [vmem:[#allocation6_spill] sm:$0xff] }
 0xae5   : > { %11506 = vmatprep.subr.bf16.mxu0 %v14343_v18 }
 0xae6   : > { %11484 = vmatpush3.bf16.msra.mxu1 %v14493_v42  ;;  %v14500_v42 = vld [vmem:[#allocation12_spill] sm:$0xff] }
 0xae7   : > { %11485 = vmatprep.subr.bf16.mxu1 %v14343_v18 }
 0xae8   : > { %11508 = vmatpush3.bf16.msra.mxu0 %v14494_v50  ;;  %v14498_v50 = vld [vmem:[#allocation8_spill] sm:$0xff] }
 0xae9   : > { %11509 = vmatprep.subr.bf16.mxu0 %v14343_v18 }
 0xaea   : > { %11487 = vmatpush3.bf16.msra.mxu1 %v14495_v31  ;;  %v14499_v31 = vld [vmem:[#allocation10_spill] sm:$0xff] }
 0xaeb   : > { %11512 = vmatprep.subr.bf16.mxu1 %v14343_v18 }
 0xaec   : > { %11511 = vmatpush3.bf16.msra.mxu0 %v14496_v60  ;;  %v14503_v60 = vld [vmem:[#allocation18_spill] sm:$0xff] }
 0xaed   : > { %9560 = vmatmul.mubr.f32.vlgmr.msra.gmra.mrb[52].mxu1 %v12022_v45  ;;  %11536 = vmatprep.subr.bf16.mxu0 %v14343_v18  ;;  %v14501_v45 = vld [vmem:[#allocation14_spill] sm:$0xff] }
 0xaee   : > { %11514 = vmatpush3.bf16.msra.mxu1 %v14497_v0  ;;  %9629 = vmatprep.mubr.msk.f32.mxu1 %vm12108_vm0, %v14319_v41  ;;  %v14502_v0 = vld [vmem:[#allocation16_spill] sm:$0xff] }
 0xaef   : > { %11515 = vmatprep.subr.bf16.mxu1 %v14343_v18 }
 0xaf2   : > { %11517 = vmatpush3.bf16.msra.mxu1 %v14498_v50  ;;  %v14504_v50 = vld [vmem:[#allocation20_spill] sm:$0xff] }
 0xaf3   : > { %11518 = vmatprep.subr.bf16.mxu1 %v14343_v18 }
 0xaf6   : > { %11520 = vmatpush3.bf16.msra.mxu1 %v14499_v31 }
 0xaf7   : > { %11521 = vmatprep.subr.bf16.mxu1 %v14343_v18 }
 0xafa   : > { %11523 = vmatpush3.bf16.msra.mxu1 %v14500_v42 }
 0xafb   : > { %11524 = vmatprep.subr.bf16.mxu1 %v14343_v18 }
 0xafe   : > { %11526 = vmatpush3.bf16.msra.mxu1 %v14501_v45 }
 0xaff   : > { %11527 = vmatprep.subr.bf16.mxu1 %v14343_v18 }
 0xb02   : > { %11529 = vmatpush3.bf16.msra.mxu1 %v14502_v0 }
 0xb03   : > { %11530 = vmatprep.subr.bf16.mxu1 %v14343_v18 }
 0xb06   : > { %11532 = vmatpush3.bf16.msra.mxu1 %v14503_v60 }
 0xb07   : > { %11533 = vmatprep.subr.bf16.mxu1 %v14343_v18 }
 0xb0a   : > { %11535 = vmatpush3.bf16.msra.mxu1 %v14504_v50 }
 0xb0b   : > { %11560 = vmatprep.subr.bf16.mxu1 %v14343_v18 }
 0xb40   : > { %v4146_v31 = vpop.f32.mrb[44].mxu1 }
 0xb41   : > { %v9281_v42 = vpop.f32.mrb[45].mxu1 }
 0xb42   : > { %v4219_v2 = vpop.f32.mrb[46].mxu0 }
 0xb43   : > { %v4656_v28 = vrot.slane %v4219_v2, 7  ;;  %v9316_v36 = vpop.f32.mrb[47].mxu0 }
 0xb45   : > { %v4676_v45 = vsel %vm1173_vm1, %v4146_v31, %v4656_v28 }
 0xb60   : > { %v4291_v16 = vpop.f32.mrb[46].mxu1 }
 0xb61   : > { %v4659_v19 = vrot.slane %v4291_v16, 6  ;;  %v9351_v0 = vpop.f32.mrb[47].mxu1 }
 0xb62   : > { %v4363_v4 = vpop.f32.mrb[48].mxu0 }
 0xb63   : > { %v4677_v25 = vsel %vm1175_vm2, %v4676_v45, %v4659_v19  ;;  %v4662_v60 = vrot.slane %v4363_v4, 5  ;;  %v9386_v48 = vpop.f32.mrb[49].mxu0 }
 0xb65   : > { %v4678_v32 = vsel %vm1177_vm3, %v4677_v25, %v4662_v60 }
 0xb80   : > { %v4435_v50 = vpop.f32.mrb[48].mxu1 }
 0xb81   : > { %v4665_v38 = vrot.slane %v4435_v50, 4  ;;  %v9421_v20 = vpop.f32.mrb[49].mxu1  ;;  %v6439_v50 = vld [vmem:[%s12236_s15 + $0x28] sm:$0xff] }
 0xb82   : > { %v4507_v21 = vpop.f32.mrb[50].mxu0 }
 0xb83   : > { %v4679_v42 = vsel %vm1179_vm4, %v4678_v32, %v4665_v38  ;;  %v4668_v2 = vrot.slane %v4507_v21, 3  ;;  %v9456_v36 = vpop.f32.mrb[51].mxu0  ;;  %v14505_v38 = vmax.f32 %v13602_v56, -1e+30 }
 0xb85   : > { %v4680_v31 = vsel %vm1181_vm5, %v4679_v42, %v4668_v2 }
 0xba0   : > { %v4579_v16 = vpop.f32.mrb[50].mxu1 }
 0xba1   : > { %v4671_v28 = vrot.slane %v4579_v16, 2  ;;  %v9491_v0 = vpop.f32.mrb[51].mxu1 }
 0xba2   : > { %v4651_v55 = vpop.f32.mrb[52].mxu0 }
 0xba3   : > { %v4681_v4 = vsel %vm1183_vm6, %v4680_v31, %v4671_v28  ;;  %v4674_v48 = vrot.slane %v4651_v55, 1  ;;  %v9526_v19 = vpop.f32.mrb[53].mxu0  ;;  %v14506_v31 = vmax.f32 %v13734_v1, -1e+30 }
 0xba5   : > { %v4682_v25 = vsel %vm1185_vm7, %v4681_v4, %v4674_v48 }
 0xba6   : > { %12023 = vlog2.f32 %v4682_v25 }
 0xbb0   : > { %v12024_v20 = vpop.eup %12023 }
 0xbb1   : > { %v4684_v60 = vmul.f32 0.6931472, %v12024_v20 }
 0xbb3   : > { %v4685_v21 = vadd.f32 %v4684_v60, %v14505_v38  ;;  %v14508_v38 = vld [vmem:[#allocation34_spill] sm:$0xff] }
 0xbb5   : > { %v4686_v32 = vadd.f32 %v6439_v50, %v4685_v21  ;;  %v14509_v21 = vld [vmem:[#allocation35_spill] sm:$0xff] }
 0xbb7   : > { %4769 = vmax.xlane.f32.xlu0 %v4686_v32 }
 0xbc0   : > { %v4759_v45 = vpop.f32.mrb[52].mxu1 }
 0xbc1   : > { %12025 = vlog2.f32 %v4759_v45  ;;  %v9561_v42 = vpop.f32.mrb[53].mxu1  ;;  %v14511_v45 = vld [vmem:[#allocation37_spill] sm:$0xff] }
 0xbc2   : > { %v14512_v42 = vld [vmem:[#allocation38_spill] sm:$0xff] }
 0xbcb   : > { %v12026_v2 = vpop.eup %12025 }
 0xbcc   : > { %v4764_v36 = vmul.f32 0.6931472, %v12026_v2 }
 0xbce   : > { %v4765_v55 = vadd.f32 %v4764_v36, %v14506_v31  ;;  %v14513_v36 = vld [vmem:[#allocation39_spill] sm:$0xff] }
 0xbd0   : > { %v13797_v16 = vadd.f32 %v6439_v50, %v4765_v55  ;;  %v14507_v50 = vld [vmem:[#allocation33_spill] sm:$0xff]  ;;  %v14514_v55 = vld [vmem:[#allocation40_spill] sm:$0xff] }
 0xbd2   : > { %5382 = vmax.xlane.f32.xlu1 %v13797_v16 }
 0xc44   : > { %v13800_v28 = vpop.xlane.xlu0 %4769 }
 0xc45   : > { %v14293_v0 = vmax.f32 %v13800_v28, -1e+30 }
 0xc47   : > { %v4772_v56 = vsub.f32 %v4686_v32, %v14293_v0  ;;  %v14510_v32 = vld [vmem:[#allocation36_spill] sm:$0xff]  ;;  %v14524_v0 = vld [vmem:[#allocation45_spill] sm:$0xff] }
 0xc49   : > { %v4773_v4 = vmul.f32 1.442695, %v4772_v56  ;;  %v14515_v56 = vld [vmem:[#allocation5_spill] sm:$0xff] }
 0xc4b   : > { %12027 = vpow2.f32 %v4773_v4  ;;  %v14516_v4 = vld [vmem:[#allocation41_spill] sm:$0xff] }
 0xc55   : > { %v13805_v48 = vpop.eup %12027 }
 0xc56   : > { %9595 = vmatmul.mubr.f32.vlgmr.msra.gmra.mrb[54].mxu0 %v13805_v48  ;;  %v4846_v1 = vrot.slane %v13805_v48, 1  ;;  %v4918_v19 = vrot.slane %v13805_v48, 2  ;;  %v4990_v25 = vrot.slane %v13805_v48, 3  ;;  %v5062_v20 = vrot.slane %v13805_v48, 4 }
 0xc57   : > { %11538 = vmatpush3.bf16.msra.mxu0 %v12361_v9  ;;  %9664 = vmatprep.mubr.msk.f32.mxu0 %vm12108_vm0, %v14319_v41  ;;  %v5134_v60 = vrot.slane %v13805_v48, 5  ;;  %v5206_v2 = vrot.slane %v13805_v48, 6  ;;  %v5278_v31 = vrot.slane %v13805_v48, 7 }
 0xc58   : > { %9630 = vmatmul.mubr.f32.vlgmr.msra.gmra.mrb[54].mxu1 %v4846_v1  ;;  %11539 = vmatprep.subr.bf16.mxu0 %v14343_v18  ;;  %v14517_v1 = vld [vmem:[#allocation7_spill] sm:$0xff] }
 0xc59   : > { %11562 = vmatpush3.bf16.msra.mxu1 %v12367_v14  ;;  %9699 = vmatprep.mubr.msk.f32.mxu1 %vm12108_vm0, %v14319_v41 }
 0xc5a   : > { %11563 = vmatprep.subr.bf16.mxu1 %v14343_v18 }
 0xc5b   : > { %11541 = vmatpush3.bf16.msra.mxu0 %v12374_v22 }
 0xc5c   : > { %11542 = vmatprep.subr.bf16.mxu0 %v14343_v18 }
 0xc5d   : > { %11565 = vmatpush3.bf16.msra.mxu1 %v12382_v26 }
 0xc5e   : > { %11566 = vmatprep.subr.bf16.mxu1 %v14343_v18 }
 0xc5f   : > { %11544 = vmatpush3.bf16.msra.mxu0 %v12390_v30  ;;  %v13932_v48 = vpop.xlane.xlu1 %5382 }
 0xc60   : > { %11545 = vmatprep.subr.bf16.mxu0 %v14343_v18 }
 0xc61   : > { %11568 = vmatpush3.bf16.msra.mxu1 %v12396_v35 }
 0xc62   : > { %11569 = vmatprep.subr.bf16.mxu1 %v14343_v18 }
 0xc63   : > { %11547 = vmatpush3.bf16.msra.mxu0 %v12402_v40 }
 0xc64   : > { %11548 = vmatprep.subr.bf16.mxu0 %v14343_v18 }
 0xc65   : > { %11571 = vmatpush3.bf16.msra.mxu1 %v12408_v44 }
 0xc66   : > { %11572 = vmatprep.subr.bf16.mxu1 %v14343_v18 }
 0xc67   : > { %11550 = vmatpush3.bf16.msra.mxu0 %v12414_v49 }
 0xc68   : > { %11551 = vmatprep.subr.bf16.mxu0 %v14343_v18 }
 0xc69   : > { %11574 = vmatpush3.bf16.msra.mxu1 %v12420_v53 }
 0xc6a   : > { %11575 = vmatprep.subr.bf16.mxu1 %v14343_v18 }
 0xc6b   : > { %11553 = vmatpush3.bf16.msra.mxu0 %v12426_v59 }
 0xc6c   : > { %11554 = vmatprep.subr.bf16.mxu0 %v14343_v18 }
 0xc6d   : > { %11577 = vmatpush3.bf16.msra.mxu1 %v12432_v62 }
 0xc6e   : > { %11578 = vmatprep.subr.bf16.mxu1 %v14343_v18 }
 0xc6f   : > { %11556 = vmatpush3.bf16.msra.mxu0 %v12438_v5 }
 0xc70   : > { %11557 = vmatprep.subr.bf16.mxu0 %v14343_v18 }
 0xc71   : > { %11580 = vmatpush3.bf16.msra.mxu1 %v12444_v8 }
 0xc72   : > { %11581 = vmatprep.subr.bf16.mxu1 %v14343_v18 }
 0xc73   : > { %11559 = vmatpush3.bf16.msra.mxu0 %v12450_v15 }
 0xc74   : > { %11584 = vmatprep.subr.bf16.mxu0 %v14343_v18 }
 0xc75   : > { %11583 = vmatpush3.bf16.msra.mxu1 %v12456_v23 }
 0xc76   : > { %9665 = vmatmul.mubr.f32.vlgmr.msra.gmra.mrb[56].mxu0 %v4918_v19  ;;  %11608 = vmatprep.subr.bf16.mxu1 %v14343_v18  ;;  %v14294_v19 = vmax.f32 %v13932_v48, -1e+30 }
 0xc77   : > { %11586 = vmatpush3.bf16.msra.mxu0 %v12462_v29  ;;  %9734 = vmatprep.mubr.msk.f32.mxu0 %vm12108_vm0, %v14319_v41 }
 0xc78   : > { %9700 = vmatmul.mubr.f32.vlgmr.msra.gmra.mrb[56].mxu1 %v4990_v25  ;;  %11587 = vmatprep.subr.bf16.mxu0 %v14343_v18  ;;  %v14518_v25 = vld [vmem:[#allocation42_spill] sm:$0xff] }
 0xc79   : > { %11610 = vmatpush3.bf16.msra.mxu1 %v12469_v37  ;;  %9769 = vmatprep.mubr.msk.f32.mxu1 %vm12108_vm0, %v14319_v41 }
 0xc7a   : > { %11611 = vmatprep.subr.bf16.mxu1 %v14343_v18 }
 0xc7b   : > { %11589 = vmatpush3.bf16.msra.mxu0 %v12476_v47 }
 0xc7c   : > { %11590 = vmatprep.subr.bf16.mxu0 %v14343_v18 }
 0xc7d   : > { %11613 = vmatpush3.bf16.msra.mxu1 %v12484_v54 }
 0xc7e   : > { %11614 = vmatprep.subr.bf16.mxu1 %v14343_v18 }
 0xc7f   : > { %11592 = vmatpush3.bf16.msra.mxu0 %v12492_v61 }
 0xc80   : > { %11593 = vmatprep.subr.bf16.mxu0 %v14343_v18 }
 0xc81   : > { %11616 = vmatpush3.bf16.msra.mxu1 %v12498_v6 }
 0xc82   : > { %11617 = vmatprep.subr.bf16.mxu1 %v14343_v18 }
 0xc83   : > { %11595 = vmatpush3.bf16.msra.mxu0 %v12504_v11 }
 0xc84   : > { %11596 = vmatprep.subr.bf16.mxu0 %v14343_v18 }
 0xc85   : > { %11619 = vmatpush3.bf16.msra.mxu1 %v12510_v24 }
 0xc86   : > { %11620 = vmatprep.subr.bf16.mxu1 %v14343_v18 }
 0xc87   : > { %11598 = vmatpush3.bf16.msra.mxu0 %v12516_v34 }
 0xc88   : > { %11599 = vmatprep.subr.bf16.mxu0 %v14343_v18 }
 0xc89   : > { %11622 = vmatpush3.bf16.msra.mxu1 %v12522_v43 }
 0xc8a   : > { %11623 = vmatprep.subr.bf16.mxu1 %v14343_v18 }
 0xc8b   : > { %11601 = vmatpush3.bf16.msra.mxu0 %v12528_v52 }
 0xc8c   : > { %11602 = vmatprep.subr.bf16.mxu0 %v14343_v18 }
 0xc8d   : > { %11625 = vmatpush3.bf16.msra.mxu1 %v12534_v3 }
 0xc8e   : > { %11626 = vmatprep.subr.bf16.mxu1 %v14343_v18 }
 0xc8f   : > { %11604 = vmatpush3.bf16.msra.mxu0 %v12540_v10 }
 0xc90   : > { %11605 = vmatprep.subr.bf16.mxu0 %v14343_v18 }
 0xc91   : > { %11628 = vmatpush3.bf16.msra.mxu1 %v14344_v12 }
 0xc92   : > { %11629 = vmatprep.subr.bf16.mxu1 %v14343_v18 }
 0xc93   : > { %11607 = vmatpush3.bf16.msra.mxu0 %v14345_v33 }
 0xc94   : > { %11632 = vmatprep.subr.bf16.mxu0 %v14343_v18 }
 0xc95   : > { %11631 = vmatpush3.bf16.msra.mxu1 %v14346_v27 }
 0xc96   : > { %9735 = vmatmul.mubr.f32.vlgmr.msra.gmra.mrb[58].mxu0 %v5062_v20  ;;  %11656 = vmatprep.subr.bf16.mxu1 %v14343_v18  ;;  %v14519_v20 = vld [vmem:[#allocation9_spill] sm:$0xff] }
 0xc97   : > { %11634 = vmatpush3.bf16.msra.mxu0 %v14347_v39  ;;  %9804 = vmatprep.mubr.msk.f32.mxu0 %vm12108_vm0, %v14319_v41 }
 0xc98   : > { %9770 = vmatmul.mubr.f32.vlgmr.msra.gmra.mrb[58].mxu1 %v5134_v60  ;;  %11635 = vmatprep.subr.bf16.mxu0 %v14343_v18  ;;  %v5385_v60 = vsub.f32 %v13797_v16, %v14294_v19  ;;  %v14525_v16 = vld [vmem:[#allocation15_spill] sm:$0xff] }
 0xc99   : > { %11658 = vmatpush3.bf16.msra.mxu1 %v14348_v51  ;;  %9839 = vmatprep.mubr.msk.f32.mxu1 %vm12108_vm0, %v14319_v41  ;;  %v14529_v19 = vld [vmem:[#allocation19_spill] sm:$0xff] }
 0xc9a   : > { %11659 = vmatprep.subr.bf16.mxu1 %v14343_v18 }
 0xc9b   : > { %11637 = vmatpush3.bf16.msra.mxu0 %v14349_v58 }
 0xc9c   : > { %11638 = vmatprep.subr.bf16.mxu0 %v14343_v18 }
 0xc9d   : > { %11661 = vmatpush3.bf16.msra.mxu1 %v14350_v63 }
 0xc9e   : > { %11662 = vmatprep.subr.bf16.mxu1 %v14343_v18 }
 0xc9f   : > { %11640 = vmatpush3.bf16.msra.mxu0 %v14351_v57 }
 0xca0   : > { %11641 = vmatprep.subr.bf16.mxu0 %v14343_v18 }
 0xca1   : > { %11664 = vmatpush3.bf16.msra.mxu1 %v14352_v13 }
 0xca2   : > { %11665 = vmatprep.subr.bf16.mxu1 %v14343_v18 }
 0xca3   : > { %11643 = vmatpush3.bf16.msra.mxu0 %v14353_v17 }
 0xca4   : > { %11644 = vmatprep.subr.bf16.mxu0 %v14343_v18 }
 0xca5   : > { %11667 = vmatpush3.bf16.msra.mxu1 %v14354_v7 }
 0xca6   : > { %11668 = vmatprep.subr.bf16.mxu1 %v14343_v18 }
 0xca7   : > { %11646 = vmatpush3.bf16.msra.mxu0 %v14355_v46 }
 0xca8   : > { %11647 = vmatprep.subr.bf16.mxu0 %v14343_v18 }
 0xca9   : > { %11670 = vmatpush3.bf16.msra.mxu1 %v14507_v50 }
 0xcaa   : > { %11671 = vmatprep.subr.bf16.mxu1 %v14343_v18 }
 0xcab   : > { %11649 = vmatpush3.bf16.msra.mxu0 %v14508_v38 }
 0xcac   : > { %11650 = vmatprep.subr.bf16.mxu0 %v14343_v18 }
 0xcad   : > { %11673 = vmatpush3.bf16.msra.mxu1 %v14509_v21 }
 0xcae   : > { %11674 = vmatprep.subr.bf16.mxu1 %v14343_v18 }
 0xcaf   : > { %11652 = vmatpush3.bf16.msra.mxu0 %v14510_v32 }
 0xcb0   : > { %11653 = vmatprep.subr.bf16.mxu0 %v14343_v18 }
 0xcb1   : > { %11676 = vmatpush3.bf16.msra.mxu1 %v14511_v45 }
 0xcb2   : > { %11677 = vmatprep.subr.bf16.mxu1 %v14343_v18 }
 0xcb3   : > { %11655 = vmatpush3.bf16.msra.mxu0 %v14512_v42 }
 0xcb4   : > { %11680 = vmatprep.subr.bf16.mxu0 %v14343_v18 }
 0xcb5   : > { %11679 = vmatpush3.bf16.msra.mxu1 %v14513_v36 }
 0xcb6   : > { %9805 = vmatmul.mubr.f32.vlgmr.msra.gmra.mrb[60].mxu0 %v5206_v2  ;;  %11704 = vmatprep.subr.bf16.mxu1 %v14343_v18  ;;  %v14520_v2 = vld [vmem:[#allocation43_spill] sm:$0xff] }
 0xcb7   : > { %11682 = vmatpush3.bf16.msra.mxu0 %v14514_v55  ;;  %9874 = vmatprep.mubr.msk.f32.mxu0 %vm12108_vm0, %v14319_v41 }
 0xcb8   : > { %9840 = vmatmul.mubr.f32.vlgmr.msra.gmra.mrb[60].mxu1 %v5278_v31  ;;  %11683 = vmatprep.subr.bf16.mxu0 %v14343_v18  ;;  %v14521_v31 = vld [vmem:[#allocation11_spill] sm:$0xff] }
 0xcb9   : > { %11706 = vmatpush3.bf16.msra.mxu1 %v14515_v56  ;;  %9909 = vmatprep.mubr.msk.f32.mxu1 %vm12108_vm0, %v14319_v41  ;;  %v5386_v56 = vmul.f32 1.442695, %v5385_v60  ;;  %v14527_v60 = vld [vmem:[#allocation17_spill] sm:$0xff] }
 0xcba   : > { %11707 = vmatprep.subr.bf16.mxu1 %v14343_v18 }
 0xcbb   : > { %11685 = vmatpush3.bf16.msra.mxu0 %v14516_v4  ;;  %12029 = vpow2.f32 %v5386_v56 }
 0xcbc   : > { %11686 = vmatprep.subr.bf16.mxu0 %v14343_v18 }
 0xcbd   : > { %11709 = vmatpush3.bf16.msra.mxu1 %v14517_v1  ;;  %v14522_v1 = vld [vmem:[#allocation44_spill] sm:$0xff] }
 0xcbe   : > { %11710 = vmatprep.subr.bf16.mxu1 %v14343_v18 }
 0xcbf   : > { %11688 = vmatpush3.bf16.msra.mxu0 %v14518_v25 }
 0xcc0   : > { %11689 = vmatprep.subr.bf16.mxu0 %v14343_v18 }
 0xcc1   : > { %11712 = vmatpush3.bf16.msra.mxu1 %v14519_v20  ;;  %v14523_v20 = vld [vmem:[#allocation13_spill] sm:$0xff] }
 0xcc2   : > { %11713 = vmatprep.subr.bf16.mxu1 %v14343_v18 }
 0xcc3   : > { %11691 = vmatpush3.bf16.msra.mxu0 %v14520_v2 }
 0xcc4   : > { %11692 = vmatprep.subr.bf16.mxu0 %v14343_v18 }
 0xcc5   : > { %11715 = vmatpush3.bf16.msra.mxu1 %v14521_v31  ;;  %v14526_v31 = vld [vmem:[#allocation46_spill] sm:$0xff]  ;;  %v12030_v56 = vpop.eup %12029 }
 0xcc6   : > { %11716 = vmatprep.subr.bf16.mxu1 %v14343_v18 }
 0xcc7   : > { %11694 = vmatpush3.bf16.msra.mxu0 %v14522_v1 }
 0xcc8   : > { %11695 = vmatprep.subr.bf16.mxu0 %v14343_v18 }
 0xcc9   : > { %11718 = vmatpush3.bf16.msra.mxu1 %v14523_v20  ;;  %v14528_v20 = vld [vmem:[#allocation47_spill] sm:$0xff] }
 0xcca   : > { %11719 = vmatprep.subr.bf16.mxu1 %v14343_v18 }
 0xccb   : > { %11697 = vmatpush3.bf16.msra.mxu0 %v14524_v0 }
 0xccc   : > { %11698 = vmatprep.subr.bf16.mxu0 %v14343_v18 }
 0xccd   : > { %11721 = vmatpush3.bf16.msra.mxu1 %v14525_v16  ;;  %v14530_v16 = vld [vmem:[#allocation6_spill] sm:$0xff] }
 0xcce   : > { %11722 = vmatprep.subr.bf16.mxu1 %v14343_v18 }
 0xccf   : > { %11700 = vmatpush3.bf16.msra.mxu0 %v14526_v31  ;;  %v14533_v31 = vld [vmem:[#allocation12_spill] sm:$0xff] }
 0xcd0   : > { %11701 = vmatprep.subr.bf16.mxu0 %v14343_v18 }
 0xcd1   : > { %11724 = vmatpush3.bf16.msra.mxu1 %v14527_v60  ;;  %v14531_v60 = vld [vmem:[#allocation8_spill] sm:$0xff] }
 0xcd2   : > { %11725 = vmatprep.subr.bf16.mxu1 %v14343_v18 }
 0xcd3   : > { %11703 = vmatpush3.bf16.msra.mxu0 %v14528_v20  ;;  %v14532_v20 = vld [vmem:[#allocation10_spill] sm:$0xff] }
 0xcd4   : > { %11728 = vmatprep.subr.bf16.mxu0 %v14343_v18 }
 0xcd5   : > { %11727 = vmatpush3.bf16.msra.mxu1 %v14529_v19  ;;  %v14534_v19 = vld [vmem:[#allocation14_spill] sm:$0xff] }
 0xcd6   : > { %9875 = vmatmul.mubr.f32.vlgmr.msra.gmra.mrb[62].mxu0 %v12030_v56  ;;  %11752 = vmatprep.subr.bf16.mxu1 %v14343_v18  ;;  %v14535_v56 = vld [vmem:[#allocation16_spill] sm:$0xff] }
 0xcd7   : > { %11730 = vmatpush3.bf16.msra.mxu0 %v14530_v16  ;;  %9944 = vmatprep.mubr.msk.f32.mxu0 %vm12108_vm0, %v14319_v41  ;;  %v14536_v16 = vld [vmem:[#allocation18_spill] sm:$0xff] }
 0xcd8   : > { %11731 = vmatprep.subr.bf16.mxu0 %v14343_v18 }
 0xcdb   : > { %11733 = vmatpush3.bf16.msra.mxu0 %v14531_v60  ;;  %v14537_v60 = vld [vmem:[#allocation20_spill] sm:$0xff] }
 0xcdc   : > { %11734 = vmatprep.subr.bf16.mxu0 %v14343_v18 }
 0xcdf   : > { %11736 = vmatpush3.bf16.msra.mxu0 %v14532_v20 }
 0xce0   : > { %11737 = vmatprep.subr.bf16.mxu0 %v14343_v18 }
 0xce3   : > { %11739 = vmatpush3.bf16.msra.mxu0 %v14533_v31 }
 0xce4   : > { %11740 = vmatprep.subr.bf16.mxu0 %v14343_v18 }
 0xce7   : > { %11742 = vmatpush3.bf16.msra.mxu0 %v14534_v19 }
 0xce8   : > { %11743 = vmatprep.subr.bf16.mxu0 %v14343_v18 }
 0xceb   : > { %11745 = vmatpush3.bf16.msra.mxu0 %v14535_v56 }
 0xcec   : > { %11746 = vmatprep.subr.bf16.mxu0 %v14343_v18 }
 0xcef   : > { %11748 = vmatpush3.bf16.msra.mxu0 %v14536_v16 }
 0xcf0   : > { %11749 = vmatprep.subr.bf16.mxu0 %v14343_v18 }
 0xcf3   : > { %11751 = vmatpush3.bf16.msra.mxu0 %v14537_v60 }
 0xcf4   : > { %11776 = vmatprep.subr.bf16.mxu0 %v14343_v18 }
 0xd29   : > { %v4841_v20 = vpop.f32.mrb[54].mxu0 }
 0xd2a   : > { %v9596_v31 = vpop.f32.mrb[55].mxu0 }
 0xd2b   : > { %v4914_v0 = vpop.f32.mrb[54].mxu1 }
 0xd2c   : > { %v5351_v1 = vrot.slane %v4914_v0, 7  ;;  %v9631_v2 = vpop.f32.mrb[55].mxu1 }
 0xd2e   : > { %v5371_v19 = vsel %vm1173_vm1, %v4841_v20, %v5351_v1 }
 0xd49   : > { %v4986_v25 = vpop.f32.mrb[56].mxu0 }
 0xd4a   : > { %v5354_v4 = vrot.slane %v4986_v25, 6  ;;  %v9666_v56 = vpop.f32.mrb[57].mxu0 }
 0xd4b   : > { %v5058_v55 = vpop.f32.mrb[56].mxu1 }
 0xd4c   : > { %v5372_v36 = vsel %vm1175_vm2, %v5371_v19, %v5354_v4  ;;  %v5357_v16 = vrot.slane %v5058_v55, 5  ;;  %v9701_v42 = vpop.f32.mrb[57].mxu1 }
 0xd4e   : > { %v5373_v45 = vsel %vm1177_vm3, %v5372_v36, %v5357_v16  ;;  %v6440_v16 = vld [vmem:[%s12236_s15 + $0x30] sm:$0xff] }
 0xd69   : > { %v5130_v60 = vpop.f32.mrb[58].mxu0 }
 0xd6a   : > { %v5360_v32 = vrot.slane %v5130_v60, 4  ;;  %v9736_v21 = vpop.f32.mrb[59].mxu0 }
 0xd6b   : > { %v5202_v38 = vpop.f32.mrb[58].mxu1 }
 0xd6c   : > { %v5374_v0 = vsel %vm1179_vm4, %v5373_v45, %v5360_v32  ;;  %v5363_v2 = vrot.slane %v5202_v38, 3  ;;  %v9771_v31 = vpop.f32.mrb[59].mxu1  ;;  %v14538_v32 = vmax.f32 %v13800_v28, -1e+30 }
 0xd6e   : > { %v5375_v1 = vsel %vm1181_vm5, %v5374_v0, %v5363_v2 }
 0xd89   : > { %v5274_v25 = vpop.f32.mrb[60].mxu0 }
 0xd8a   : > { %v5366_v20 = vrot.slane %v5274_v25, 2  ;;  %v9806_v56 = vpop.f32.mrb[61].mxu0 }
 0xd8b   : > { %v5346_v50 = vpop.f32.mrb[60].mxu1 }
 0xd8c   : > { %v5376_v55 = vsel %vm1183_vm6, %v5375_v1, %v5366_v20  ;;  %v5369_v42 = vrot.slane %v5346_v50, 1  ;;  %v9841_v4 = vpop.f32.mrb[61].mxu1  ;;  %v14539_v1 = vmax.f32 %v13932_v48, -1e+30 }
 0xd8e   : > { %v5377_v36 = vsel %vm1185_vm7, %v5376_v55, %v5369_v42 }
 0xd8f   : > { %12031 = vlog2.f32 %v5377_v36 }
 0xd99   : > { %v12032_v21 = vpop.eup %12031 }
 0xd9a   : > { %v5379_v19 = vmul.f32 0.6931472, %v12032_v21 }
 0xd9c   : > { %v5380_v38 = vadd.f32 %v5379_v19, %v14538_v32 }
 0xd9e   : > { %v5381_v45 = vadd.f32 %v6440_v16, %v5380_v38 }
 0xda0   : > { %5464 = vmax.xlane.f32.xlu0 %v5381_v45 }
 0xda9   : > { %v5454_v60 = vpop.f32.mrb[62].mxu0 }
 0xdaa   : > { %12033 = vlog2.f32 %v5454_v60  ;;  %v9876_v0 = vpop.f32.mrb[63].mxu0 }
 0xdb4   : > { %v12034_v2 = vpop.eup %12033 }
 0xdb5   : > { %v5459_v31 = vmul.f32 0.6931472, %v12034_v2 }
 0xdb7   : > { %v5460_v50 = vadd.f32 %v5459_v31, %v14539_v1 }
 0xdb9   : > { %v13995_v25 = vadd.f32 %v6440_v16, %v5460_v50 }
 0xdbb   : > { %6077 = vmax.xlane.f32.xlu1 %v13995_v25 }
 0xe2d   : > { %v13998_v20 = vpop.xlane.xlu0 %5464 }
 0xe2e   : > { %v5466_v56 = vmax.f32 %v13998_v20, -1e+30  ;;  %v6163_v20 = vld [vmem:[%s410_s23] sm:$0xff] (!%p6442_p0) }
 0xe30   : > { %v5467_v28 = vsub.f32 %v5381_v45, %v5466_v56 }
 0xe32   : > { %v5468_v55 = vmul.f32 1.442695, %v5467_v28  ;;  %v6441_v28 = vld [vmem:[%s12236_s15 + $0x38] sm:$0xff] }
 0xe34   : > { %12035 = vpow2.f32 %v5468_v55 }
 0xe3e   : > { %v14003_v42 = vpop.eup %12035 }
 0xe3f   : > { %9910 = vmatmul.mubr.f32.vlgmr.msra.gmra.mrb[62].mxu1 %v14003_v42  ;;  %v5541_v48 = vrot.slane %v14003_v42, 1 }
 0xe40   : > { %11754 = vmatpush3.bf16.msra.mxu1 %v12361_v9  ;;  %9979 = vmatprep.mubr.msk.f32.mxu1 %vm12108_vm0, %v14319_v41  ;;  %v5613_v9 = vrot.slane %v14003_v42, 2 }
 0xe41   : > { %9945 = vmatmul.mubr.f32.vlgmr.msra.gmra.mrb[64].mxu0 %v5541_v48  ;;  %11755 = vmatprep.subr.bf16.mxu1 %v14343_v18 }
 0xe42   : > { %11778 = vmatpush3.bf16.msra.mxu0 %v12367_v14  ;;  %10014 = vmatprep.mubr.msk.f32.mxu0 %vm12108_vm0, %v14319_v41  ;;  %v5685_v14 = vrot.slane %v14003_v42, 3 }
 0xe43   : > { %11779 = vmatprep.subr.bf16.mxu0 %v14343_v18 }
 0xe44   : > { %11757 = vmatpush3.bf16.msra.mxu1 %v12374_v22  ;;  %v5757_v22 = vrot.slane %v14003_v42, 4 }
 0xe45   : > { %11758 = vmatprep.subr.bf16.mxu1 %v14343_v18 }
 0xe46   : > { %11781 = vmatpush3.bf16.msra.mxu0 %v12382_v26  ;;  %v5829_v26 = vrot.slane %v14003_v42, 5 }
 0xe47   : > { %11782 = vmatprep.subr.bf16.mxu0 %v14343_v18 }
 0xe48   : > { %11760 = vmatpush3.bf16.msra.mxu1 %v12390_v30  ;;  %v14540_v30 = vld [vmem:[#allocation33_spill] sm:$0xff] }
 0xe49   : > { %11761 = vmatprep.subr.bf16.mxu1 %v14343_v18 }
 0xe4a   : > { %11784 = vmatpush3.bf16.msra.mxu0 %v12396_v35  ;;  %v14541_v35 = vld [vmem:[#allocation34_spill] sm:$0xff] }
 0xe4b   : > { %11785 = vmatprep.subr.bf16.mxu0 %v14343_v18 }
 0xe4c   : > { %11763 = vmatpush3.bf16.msra.mxu1 %v12402_v40  ;;  %v14542_v40 = vld [vmem:[#allocation35_spill] sm:$0xff] }
 0xe4d   : > { %11764 = vmatprep.subr.bf16.mxu1 %v14343_v18 }
 0xe4e   : > { %11787 = vmatpush3.bf16.msra.mxu0 %v12408_v44  ;;  %v14543_v44 = vld [vmem:[#allocation36_spill] sm:$0xff] }
 0xe4f   : > { %11788 = vmatprep.subr.bf16.mxu0 %v14343_v18 }
 0xe50   : > { %11766 = vmatpush3.bf16.msra.mxu1 %v12414_v49  ;;  %v14544_v49 = vld [vmem:[#allocation37_spill] sm:$0xff] }
 0xe51   : > { %11767 = vmatprep.subr.bf16.mxu1 %v14343_v18 }
 0xe52   : > { %11790 = vmatpush3.bf16.msra.mxu0 %v12420_v53  ;;  %v14545_v53 = vld [vmem:[#allocation38_spill] sm:$0xff] }
 0xe53   : > { %11791 = vmatprep.subr.bf16.mxu0 %v14343_v18 }
 0xe54   : > { %11769 = vmatpush3.bf16.msra.mxu1 %v12426_v59  ;;  %v5901_v59 = vrot.slane %v14003_v42, 6 }
 0xe55   : > { %11770 = vmatprep.subr.bf16.mxu1 %v14343_v18 }
 0xe56   : > { %11793 = vmatpush3.bf16.msra.mxu0 %v12432_v62  ;;  %v14546_v62 = vld [vmem:[#allocation39_spill] sm:$0xff] }
 0xe57   : > { %11794 = vmatprep.subr.bf16.mxu0 %v14343_v18 }
 0xe58   : > { %11772 = vmatpush3.bf16.msra.mxu1 %v12438_v5  ;;  %v5973_v5 = vrot.slane %v14003_v42, 7 }
 0xe59   : > { %11773 = vmatprep.subr.bf16.mxu1 %v14343_v18 }
 0xe5a   : > { %11796 = vmatpush3.bf16.msra.mxu0 %v12444_v8  ;;  %v14547_v8 = vld [vmem:[#allocation40_spill] sm:$0xff] }
 0xe5b   : > { %11797 = vmatprep.subr.bf16.mxu0 %v14343_v18 }
 0xe5c   : > { %11775 = vmatpush3.bf16.msra.mxu1 %v12450_v15  ;;  %v14548_v15 = vld [vmem:[#allocation41_spill] sm:$0xff] }
 0xe5d   : > { %11800 = vmatprep.subr.bf16.mxu1 %v14343_v18 }
 0xe5e   : > { %11799 = vmatpush3.bf16.msra.mxu0 %v12456_v23  ;;  %v6078_v23 = vpop.xlane.xlu1 %6077 }
 0xe5f   : > { %9980 = vmatmul.mubr.f32.vlgmr.msra.gmra.mrb[64].mxu1 %v5613_v9  ;;  %11824 = vmatprep.subr.bf16.mxu0 %v14343_v18 }
 0xe60   : > { %11802 = vmatpush3.bf16.msra.mxu1 %v12462_v29  ;;  %10049 = vmatprep.mubr.msk.f32.mxu1 %vm12108_vm0, %v14319_v41  ;;  %v6079_v29 = vmax.f32 %v6078_v23, -1e+30 }
 0xe61   : > { %10015 = vmatmul.mubr.f32.vlgmr.msra.gmra.mrb[66].mxu0 %v5685_v14  ;;  %11803 = vmatprep.subr.bf16.mxu1 %v14343_v18 }
 0xe62   : > { %11826 = vmatpush3.bf16.msra.mxu0 %v12469_v37  ;;  %10084 = vmatprep.mubr.msk.f32.mxu0 %vm12108_vm0, %v14319_v41  ;;  %v14549_v37 = vld [vmem:[#allocation42_spill] sm:$0xff] }
 0xe63   : > { %11827 = vmatprep.subr.bf16.mxu0 %v14343_v18 }
 0xe64   : > { %11805 = vmatpush3.bf16.msra.mxu1 %v12476_v47  ;;  %v6080_v47 = vsub.f32 %v13995_v25, %v6079_v29 }
 0xe65   : > { %11806 = vmatprep.subr.bf16.mxu1 %v14343_v18 }
 0xe66   : > { %11829 = vmatpush3.bf16.msra.mxu0 %v12484_v54  ;;  %v14550_v54 = vld [vmem:[#allocation43_spill] sm:$0xff] }
 0xe67   : > { %11830 = vmatprep.subr.bf16.mxu0 %v14343_v18 }
 0xe68   : > { %11808 = vmatpush3.bf16.msra.mxu1 %v12492_v61  ;;  %v6081_v61 = vmul.f32 1.442695, %v6080_v47 }
 0xe69   : > { %11809 = vmatprep.subr.bf16.mxu1 %v14343_v18 }
 0xe6a   : > { %11832 = vmatpush3.bf16.msra.mxu0 %v12498_v6  ;;  %v14551_v6 = vld [vmem:[#allocation44_spill] sm:$0xff]  ;;  %12037 = vpow2.f32 %v6081_v61 }
 0xe6b   : > { %11833 = vmatprep.subr.bf16.mxu0 %v14343_v18 }
 0xe6c   : > { %11811 = vmatpush3.bf16.msra.mxu1 %v12504_v11  ;;  %v14552_v11 = vld [vmem:[#allocation45_spill] sm:$0xff] }
 0xe6d   : > { %11812 = vmatprep.subr.bf16.mxu1 %v14343_v18 }
 0xe6e   : > { %11835 = vmatpush3.bf16.msra.mxu0 %v12510_v24  ;;  %v14553_v24 = vld [vmem:[#allocation46_spill] sm:$0xff] }
 0xe6f   : > { %11836 = vmatprep.subr.bf16.mxu0 %v14343_v18 }
 0xe70   : > { %11814 = vmatpush3.bf16.msra.mxu1 %v12516_v34  ;;  %v14554_v34 = vld [vmem:[#allocation47_spill] sm:$0xff] }
 0xe71   : > { %11815 = vmatprep.subr.bf16.mxu1 %v14343_v18 }
 0xe72   : > { %11838 = vmatpush3.bf16.msra.mxu0 %v12522_v43 }
 0xe73   : > { %11839 = vmatprep.subr.bf16.mxu0 %v14343_v18 }
 0xe74   : > { %11817 = vmatpush3.bf16.msra.mxu1 %v12528_v52  ;;  %v12038_v43 = vpop.eup %12037 }
 0xe75   : > { %11818 = vmatprep.subr.bf16.mxu1 %v14343_v18 }
 0xe76   : > { %11841 = vmatpush3.bf16.msra.mxu0 %v12534_v3 }
 0xe77   : > { %11842 = vmatprep.subr.bf16.mxu0 %v14343_v18 }
 0xe78   : > { %11820 = vmatpush3.bf16.msra.mxu1 %v12540_v10 }
 0xe79   : > { %11821 = vmatprep.subr.bf16.mxu1 %v14343_v18 }
 0xe7a   : > { %11844 = vmatpush3.bf16.msra.mxu0 %v14344_v12 }
 0xe7b   : > { %11845 = vmatprep.subr.bf16.mxu0 %v14343_v18 }
 0xe7c   : > { %11823 = vmatpush3.bf16.msra.mxu1 %v14345_v33 }
 0xe7d   : > { %11848 = vmatprep.subr.bf16.mxu1 %v14343_v18 }
 0xe7e   : > { %11847 = vmatpush3.bf16.msra.mxu0 %v14346_v27 }
 0xe7f   : > { %10050 = vmatmul.mubr.f32.vlgmr.msra.gmra.mrb[66].mxu1 %v5757_v22  ;;  %11872 = vmatprep.subr.bf16.mxu0 %v14343_v18 }
 0xe80   : > { %11850 = vmatpush3.bf16.msra.mxu1 %v14347_v39  ;;  %10119 = vmatprep.mubr.msk.f32.mxu1 %vm12108_vm0, %v14319_v41 }
 0xe81   : > { %10085 = vmatmul.mubr.f32.vlgmr.msra.gmra.mrb[68].mxu0 %v5829_v26  ;;  %11851 = vmatprep.subr.bf16.mxu1 %v14343_v18 }
 0xe82   : > { %11874 = vmatpush3.bf16.msra.mxu0 %v14348_v51  ;;  %10154 = vmatprep.mubr.msk.f32.mxu0 %vm12108_vm0, %v14319_v41 }
 0xe83   : > { %11875 = vmatprep.subr.bf16.mxu0 %v14343_v18 }
 0xe84   : > { %11853 = vmatpush3.bf16.msra.mxu1 %v14349_v58 }
 0xe85   : > { %11854 = vmatprep.subr.bf16.mxu1 %v14343_v18 }
 0xe86   : > { %11877 = vmatpush3.bf16.msra.mxu0 %v14350_v63 }
 0xe87   : > { %11878 = vmatprep.subr.bf16.mxu0 %v14343_v18 }
 0xe88   : > { %11856 = vmatpush3.bf16.msra.mxu1 %v14351_v57 }
 0xe89   : > { %11857 = vmatprep.subr.bf16.mxu1 %v14343_v18 }
 0xe8a   : > { %11880 = vmatpush3.bf16.msra.mxu0 %v14352_v13 }
 0xe8b   : > { %11881 = vmatprep.subr.bf16.mxu0 %v14343_v18 }
 0xe8c   : > { %11859 = vmatpush3.bf16.msra.mxu1 %v14353_v17 }
 0xe8d   : > { %11860 = vmatprep.subr.bf16.mxu1 %v14343_v18 }
 0xe8e   : > { %11883 = vmatpush3.bf16.msra.mxu0 %v14354_v7 }
 0xe8f   : > { %11884 = vmatprep.subr.bf16.mxu0 %v14343_v18 }
 0xe90   : > { %11862 = vmatpush3.bf16.msra.mxu1 %v14355_v46 }
 0xe91   : > { %11863 = vmatprep.subr.bf16.mxu1 %v14343_v18 }
 0xe92   : > { %11886 = vmatpush3.bf16.msra.mxu0 %v14540_v30 }
 0xe93   : > { %11887 = vmatprep.subr.bf16.mxu0 %v14343_v18 }
 0xe94   : > { %11865 = vmatpush3.bf16.msra.mxu1 %v14541_v35 }
 0xe95   : > { %11866 = vmatprep.subr.bf16.mxu1 %v14343_v18 }
 0xe96   : > { %11889 = vmatpush3.bf16.msra.mxu0 %v14542_v40 }
 0xe97   : > { %11890 = vmatprep.subr.bf16.mxu0 %v14343_v18 }
 0xe98   : > { %11868 = vmatpush3.bf16.msra.mxu1 %v14543_v44 }
 0xe99   : > { %11869 = vmatprep.subr.bf16.mxu1 %v14343_v18 }
 0xe9a   : > { %11892 = vmatpush3.bf16.msra.mxu0 %v14544_v49 }
 0xe9b   : > { %11893 = vmatprep.subr.bf16.mxu0 %v14343_v18 }
 0xe9c   : > { %11871 = vmatpush3.bf16.msra.mxu1 %v14545_v53 }
 0xe9d   : > { %11896 = vmatprep.subr.bf16.mxu1 %v14343_v18 }
 0xe9e   : > { %11895 = vmatpush3.bf16.msra.mxu0 %v14546_v62 }
 0xe9f   : > { %10120 = vmatmul.mubr.f32.vlgmr.msra.gmra.mrb[68].mxu1 %v5901_v59 }
 0xea0   : > { %11898 = vmatpush3.bf16.msra.mxu1 %v14547_v8  ;;  %10189 = vmatprep.mubr.msk.f32.mxu1 %vm12108_vm0, %v14319_v41 }
 0xea1   : > { %10155 = vmatmul.mubr.f32.vlgmr.msra.gmra.mrb[70].mxu0 %v5973_v5  ;;  %11899 = vmatprep.subr.bf16.mxu1 %v14343_v18 }
 0xea4   : > { %11901 = vmatpush3.bf16.msra.mxu1 %v14548_v15 }
 0xea5   : > { %11902 = vmatprep.subr.bf16.mxu1 %v14343_v18 }
 0xea8   : > { %11904 = vmatpush3.bf16.msra.mxu1 %v14549_v37 }
 0xea9   : > { %11905 = vmatprep.subr.bf16.mxu1 %v14343_v18 }
 0xeac   : > { %11907 = vmatpush3.bf16.msra.mxu1 %v14550_v54 }
 0xead   : > { %11908 = vmatprep.subr.bf16.mxu1 %v14343_v18 }
 0xeb0   : > { %11910 = vmatpush3.bf16.msra.mxu1 %v14551_v6 }
 0xeb1   : > { %11911 = vmatprep.subr.bf16.mxu1 %v14343_v18 }
 0xeb4   : > { %11913 = vmatpush3.bf16.msra.mxu1 %v14552_v11 }
 0xeb5   : > { %11914 = vmatprep.subr.bf16.mxu1 %v14343_v18 }
 0xeb8   : > { %11916 = vmatpush3.bf16.msra.mxu1 %v14553_v24 }
 0xeb9   : > { %11917 = vmatprep.subr.bf16.mxu1 %v14343_v18 }
 0xebc   : > { %11919 = vmatpush3.bf16.msra.mxu1 %v14554_v34 }
 0xebf   : > { %10190 = vmatmul.mubr.f32.vlgmr.msra.gmra.mrb[70].mxu1 %v12038_v43 }
 0xf12   : > { %v5536_v52 = vpop.f32.mrb[62].mxu1 }
 0xf13   : > { %v9911_v3 = vpop.f32.mrb[63].mxu1 }
 0xf14   : > { %v5609_v10 = vpop.f32.mrb[64].mxu0 }
 0xf15   : > { %v6046_v41 = vrot.slane %v5609_v10, 7  ;;  %v9946_v12 = vpop.f32.mrb[65].mxu0 }
 0xf17   : > { %v6066_v33 = vsel %vm1173_vm1, %v5536_v52, %v6046_v41 }
 0xf32   : > { %v5681_v27 = vpop.f32.mrb[64].mxu1 }
 0xf33   : > { %v6049_v39 = vrot.slane %v5681_v27, 6  ;;  %v9981_v51 = vpop.f32.mrb[65].mxu1 }
 0xf34   : > { %v5753_v58 = vpop.f32.mrb[66].mxu0 }
 0xf35   : > { %v6067_v63 = vsel %vm1175_vm2, %v6066_v33, %v6049_v39  ;;  %v6052_v57 = vrot.slane %v5753_v58, 5  ;;  %v10016_v13 = vpop.f32.mrb[67].mxu0 }
 0xf37   : > { %v6068_v18 = vsel %vm1177_vm3, %v6067_v63, %v6052_v57 }
 0xf52   : > { %v5825_v17 = vpop.f32.mrb[66].mxu1 }
 0xf53   : > { %v6055_v7 = vrot.slane %v5825_v17, 4  ;;  %v10051_v46 = vpop.f32.mrb[67].mxu1 }
 0xf54   : > { %v5897_v4 = vpop.f32.mrb[68].mxu0 }
 0xf55   : > { %v6069_v36 = vsel %vm1179_vm4, %v6068_v18, %v6055_v7  ;;  %v6058_v21 = vrot.slane %v5897_v4, 3  ;;  %v10086_v19 = vpop.f32.mrb[69].mxu0 }
 0xf57   : > { %v6070_v16 = vsel %vm1181_vm5, %v6069_v36, %v6058_v21 }
 0xf72   : > { %v5969_v32 = vpop.f32.mrb[68].mxu1 }
 0xf73   : > { %v6061_v38 = vrot.slane %v5969_v32, 2  ;;  %v10121_v45 = vpop.f32.mrb[69].mxu1 }
 0xf74   : > { %v6041_v60 = vpop.f32.mrb[70].mxu0 }
 0xf75   : > { %v6071_v0 = vsel %vm1183_vm6, %v6070_v16, %v6061_v38  ;;  %v6064_v2 = vrot.slane %v6041_v60, 1  ;;  %v10156_v31 = vpop.f32.mrb[71].mxu0 }
 0xf77   : > { %v6072_v1 = vsel %vm1185_vm7, %v6071_v0, %v6064_v2 }
 0xf78   : > { %12039 = vlog2.f32 %v6072_v1 }
 0xf82   : > { %v12040_v50 = vpop.eup %12039 }
 0xf83   : > { %v6074_v25 = vmul.f32 0.6931472, %v12040_v50 }
 0xf85   : > { %v6075_v55 = vadd.f32 %v6074_v25, %v5466_v56  ;;  %v6443_v56 = vld [vmem:[%s14188_s5] ss:$0 sm:$0xff] (!%p6442_p0) }
 0xf87   : > { %v6076_v42 = vadd.f32 %v6441_v28, %v6075_v55 }
 0xf89   : > { %6157 = vst [vmem:[#allocation2] sm:$0xff] %v6076_v42  ;;  %v6164_v35 = vadd.f32 (!%p6442_p0), %v6163_v20, %v6076_v42 }
 0xf8b   : > { %6165 = vmax.xlane.f32.xlu0 (!%p6442_p0), %v6164_v35 }
 0xf92   : > { %v6149_v48 = vpop.f32.mrb[70].mxu1 }
 0xf93   : > { %12041 = vlog2.f32 %v6149_v48  ;;  %v10191_v9 = vpop.f32.mrb[71].mxu1 }
 0xf9d   : > { %v12042_v14 = vpop.eup %12041 }
 0xf9e   : > { %v6154_v22 = vmul.f32 0.6931472, %v12042_v14  ;;  %6162 = sbr.rel (%p6442_p0) target bundleno = 4325 (0x10e5), region = 94 }
 0xfa0   : > { %v6155_v26 = vadd.f32 %v6154_v22, %v6079_v29 }
 0xfa2   : > { %v6156_v30 = vadd.f32 %v6441_v28, %v6155_v26 }
 0xfa4   : > { %6158 = vst [vmem:[#allocation3] sm:$0xff] %v6156_v30  ;;  %v6183_v40 = vadd.f32 (!%p6442_p0), %v6443_v56, %v6156_v30 }
 0xfa6   : > { %6184 = vmax.xlane.f32.xlu0 %v6183_v40 }
0x1018   : > { %v6166_v44 = vpop.xlane.xlu0 %6165 }
0x1019   : > { %v6167_v49 = vmax.f32 %v6166_v44, -1e+30 }
0x101b   : > { %v6168_v53 = vsub.f32 %v6164_v35, %v6167_v49 }
0x101d   : > { %v6169_v5 = vmul.f32 1.442695, %v6168_v53 }
0x101f   : > { %12043 = vpow2.f32 %v6169_v5 }
0x1029   : > { %v12044_v23 = vpop.eup %12043 }
0x102a   : > { %6171 = vadd.xlane.f32.xlu1 %v12044_v23 }
0x1033   : > { %v6185_v59 = vpop.xlane.xlu0 %6184 }
0x1034   : > { %v6186_v62 = vmax.f32 %v6185_v59, -1e+30 }
0x1036   : > { %v6187_v8 = vsub.f32 %v6183_v40, %v6186_v62 }
0x1038   : > { %v6188_v15 = vmul.f32 1.442695, %v6187_v8 }
0x103a   : > { %12045 = vpow2.f32 %v6188_v15 }
0x1044   : > { %v12046_v29 = vpop.eup %12045 }
0x1045   : > { %6190 = vadd.xlane.f32.xlu1 %v12046_v29 }
0x10b7   : > { %v6172_v37 = vpop.xlane.xlu1 %6171 }
0x10b8   : > { %12047 = vlog2.f32 %v6172_v37 }
0x10c2   : > { %v12048_v54 = vpop.eup %12047 }
0x10c3   : > { %v6174_v61 = vmul.f32 0.6931472, %v12048_v54 }
0x10c5   : > { %v6175_v24 = vadd.f32 %v6174_v61, %v6167_v49 }
0x10d2   : > { %v6191_v47 = vpop.xlane.xlu1 %6190 }
0x10d3   : > { %12049 = vlog2.f32 %v6191_v47 }
0x10dd   : > { %v12050_v6 = vpop.eup %12049 }
0x10de   : > { %v6193_v11 = vmul.f32 0.6931472, %v12050_v6 }
0x10e0   : > { %v6194_v34 = vadd.f32 %v6193_v11, %v6186_v62 }
0x10e2   : > { %v6195_v43 = vsub.f32 %v6175_v24, %v6194_v34 }
0x10e4   : > { %6196 = vst [vmem:[%s415_s6] sm:$0xff] %v6195_v43 }
0x10e5 PF: > { %s17_s30 = sadd.s32 1, %s12105_s30   ;;  %s14555_s24 = smov %s12085_s25 }
0x10e6   : > { %p14_p1 = scmp.ge.s32.totalorder %s17_s30, 8   ;;  %s14556_s25 = smov %s12201_s14 }
0x10e7   : > { %s14557_s26 = smov %s12097_s28  ;;  %s14558_s27 = smov %s12101_s29 }
0x10e8   : > { %s14559_s28 = smov %s14562_s8  ;;  %s14560_s29 = smov %s14566_s9 }
0x10e9   :  { %16 = sbr.rel (!%p14_p1) target bundleno = 6 (0x6), region = 152 }

</bundles_post_ra>
